<compile_context>
chip_gen: v7x
topology: tpu7x:2x2x1
jax: 0.10.0
libtpu: 0.0.40
codegen_flags: <defaults>
</compile_context>

<pallas_src>
import functools
import math

import jax
import jax.numpy as jnp
from jax import lax
from jax.experimental import pallas as pl
from jax.experimental.pallas import tpu as pltpu

LN_EPS = 1e-5


def _round_up(x, m):
    return (x + m - 1) // m * m


def _default_row_cap():
    """Row-tile cap per chip generation (big tiles only where VMEM allows)."""
    try:
        vmem = pltpu.get_tpu_info().vmem_capacity_bytes
    except Exception:
        vmem = 64 << 20
    return 1024 if vmem >= (128 << 20) else 512


def _row_tiling(rows, cap):
    """Row tile (multiple of 8) + padded row count.

    tm ~ rows / ceil(rows/cap) so padding is bounded by <8 rows per tile
    (instead of up to ~2x with round_up(rows, tm)).  Rows large enough to
    matter are split into >=2 tiles so both v7x TensorCores get work.
    """
    rows8 = _round_up(rows, 8)
    if rows8 > 256:
        n_tiles = max(2, -(-rows // cap))
    else:
        n_tiles = max(1, -(-rows // cap))
    tm = _round_up(-(-rows // n_tiles), 8)
    tm = min(tm, rows8)
    padded = _round_up(rows, tm)
    return tm, padded


def _k_tiling(k, cap=512):
    """Contraction tile: a 128-multiple divisor of K when K is large, else full K."""
    if k <= cap:
        return k
    for tk in (512, 384, 256, 128):
        if tk <= cap and k % tk == 0:
            return tk
    return k


def _compiler_params(dim_sems, est_bytes):
    # Explicit scoped-VMEM budget: never below the 32 MiB default, never above
    # v7x's 64 MiB physical capacity.
    limit = int(min(64 << 20, max(32 << 20, 2 * int(est_bytes))))
    return pltpu.CompilerParams(dimension_semantics=dim_sems,
                                vmem_limit_bytes=limit)


# --------------------------------------------------------------------------
# Kernel 1a: K-tiled  y = x @ w + b   (match_c 1x1 conv, output projection)
# --------------------------------------------------------------------------
def _matmul_kernel(x_ref, w_ref, b_ref, o_ref, acc_ref):
    @pl.when(pl.program_id(1) == 0)
    def _():
        acc_ref[...] = jnp.zeros_like(acc_ref)

    acc_ref[...] += jnp.dot(x_ref[...], w_ref[...],
                            preferred_element_type=jnp.float32)

    @pl.when(pl.program_id(1) == pl.num_programs(1) - 1)
    def _():
        o_ref[...] = (acc_ref[...]
                      + b_ref[...].astype(jnp.float32)).astype(o_ref.dtype)


def pallas_matmul(x, w, b, *, row_cap=None):
    """x:(R,K) @ w:(K,F) + b:(F,) -> (R,F); remainder-safe, K-tiled accumulator."""
    rows, k = x.shape
    f = w.shape[1]
    if row_cap is None:
        row_cap = _default_row_cap()
    tm, padded = _row_tiling(rows, row_cap)
    tk = _k_tiling(k)
    xp = x if padded == rows else jnp.pad(x, ((0, padded - rows), (0, 0)))
    sz = x.dtype.itemsize
    est = (2 * tm * tk * sz + 2 * tk * f * sz + 2 * f * sz
           + 2 * tm * f * sz + tm * f * 4)
    # TODO(synk): grid-invariant operands (w when k-untiled, bias) could be
    # single-buffered via pipeline_mode=pl.Buffered(1) to save VMEM.
    out = pl.pallas_call(
        _matmul_kernel,
        out_shape=jax.ShapeDtypeStruct((padded, f), x.dtype),
        grid_spec=pltpu.PrefetchScalarGridSpec(
            num_scalar_prefetch=0,
            grid=(padded // tm, k // tk),
            in_specs=[
                pl.BlockSpec((tm, tk), lambda i, j: (i, j)),
                pl.BlockSpec((tk, f), lambda i, j: (j, 0)),
                pl.BlockSpec((1, f), lambda i, j: (0, 0)),
            ],
            out_specs=pl.BlockSpec((tm, f), lambda i, j: (i, 0)),
            scratch_shapes=[pltpu.VMEM((tm, f), jnp.float32)],
        ),
        compiler_params=_compiler_params(("parallel", "arbitrary"), est),
    )(xp, w, b.reshape(1, f))
    return out[:rows]


# --------------------------------------------------------------------------
# Kernel 1b: fused  y = (LayerNorm(x) * g + b_ln) @ w + b
# --------------------------------------------------------------------------
def _ln_matmul_kernel(x_ref, g_ref, bln_ref, w_ref, b_ref, o_ref):
    x = x_ref[...]
    xf = x.astype(jnp.float32)                       # LN statistics in f32
    mean = jnp.mean(xf, axis=-1, keepdims=True)
    xc = xf - mean
    var = jnp.mean(xc * xc, axis=-1, keepdims=True)
    xn = xc * lax.rsqrt(var + LN_EPS)
    xn = xn * g_ref[...].astype(jnp.float32) + bln_ref[...].astype(jnp.float32)
    # Feed the MXU in the input dtype (bf16 stays bf16), accumulate in f32.
    y = jnp.dot(xn.astype(x.dtype), w_ref[...],
                preferred_element_type=jnp.float32)
    o_ref[...] = (y + b_ref[...].astype(jnp.float32)).astype(o_ref.dtype)


def pallas_ln_matmul(x, gamma, beta, w, b, *, row_cap=None):
    """LayerNorm(x; gamma, beta) @ w + b, fused in one kernel."""
    rows, k = x.shape
    f = w.shape[1]
    if row_cap is None:
        row_cap = _default_row_cap()
    tm, padded = _row_tiling(rows, row_cap)
    xp = x if padded == rows else jnp.pad(x, ((0, padded - rows), (0, 0)))
    sz = x.dtype.itemsize
    est = (2 * tm * k * sz + 4 * k * sz + 2 * k * f * sz + 2 * f * sz
           + 2 * tm * f * sz + tm * k * 4)
    # TODO(synk): LN needs the full K row, so the weight is held full-K here;
    # for very large C the weight K dim could still be streamed in chunks.
    out = pl.pallas_call(
        _ln_matmul_kernel,
        out_shape=jax.ShapeDtypeStruct((padded, f), x.dtype),
        grid_spec=pltpu.PrefetchScalarGridSpec(
            num_scalar_prefetch=0,
            grid=(padded // tm,),
            in_specs=[
                pl.BlockSpec((tm, k), lambda i: (i, 0)),
                pl.BlockSpec((1, k), lambda i: (0, 0)),
                pl.BlockSpec((1, k), lambda i: (0, 0)),
                pl.BlockSpec((k, f), lambda i: (0, 0)),
                pl.BlockSpec((1, f), lambda i: (0, 0)),
            ],
            out_specs=pl.BlockSpec((tm, f), lambda i: (i, 0)),
        ),
        compiler_params=_compiler_params(("parallel",), est),
    )(xp, gamma.reshape(1, k), beta.reshape(1, k), w, b.reshape(1, f))
    return out[:rows]


# --------------------------------------------------------------------------
# Kernel 2: fused multi-head attention per batch element, lane-dense layout:
#   q:(1,N,C)  kv:(1,M,2C) with k = cols[0:C], v = cols[C:2C]
#   out:(1,N,C) = concat_h softmax((q_h*scale_h) @ k_h^T) @ v_h
# --------------------------------------------------------------------------
def _attention_kernel(scale_ref, q_ref, kv_ref, o_ref, *, num_heads, head_dim):
    C = num_heads * head_dim
    q = q_ref[0]        # (N, C)
    kv = kv_ref[0]      # (M, 2C)
    outs = []
    for h in range(num_heads):
        lo, hi = h * head_dim, (h + 1) * head_dim
        # Fold per-head scale into q (N*hd ops instead of N*M on the scores).
        qh = (q[:, lo:hi].astype(jnp.float32) * scale_ref[h]).astype(q.dtype)
        kh = kv[:, lo:hi]
        vh = kv[:, C + lo:C + hi]
        s = lax.dot_general(qh, kh, (((1,), (1,)), ((), ())),
                            preferred_element_type=jnp.float32)       # (N, M)
        s = s - jnp.max(s, axis=-1, keepdims=True)
        p = jnp.exp(s)
        p = p * pl.reciprocal(jnp.sum(p, axis=-1, keepdims=True), approx=True)
        outs.append(jnp.dot(p.astype(kv.dtype), vh,
                            preferred_element_type=jnp.float32))      # (N, hd)
    o_ref[0] = jnp.concatenate(outs, axis=-1).astype(o_ref.dtype)


def pallas_attention(q, kv, scale, num_heads):
    """q:(B,N,C)  kv:(B,M,2C)  scale:(nh,) -> (B,N,C)."""
    B, N, C = q.shape
    M = kv.shape[1]
    hd = C // num_heads
    sz = q.dtype.itemsize
    est = (2 * N * C * sz + 2 * M * 2 * C * sz + 2 * N * C * sz
           + num_heads * N * M * 4 + 2 * N * C * 4)
    kernel = functools.partial(_attention_kernel,
                               num_heads=num_heads, head_dim=hd)
    return pl.pallas_call(
        kernel,
        out_shape=jax.ShapeDtypeStruct((B, N, C), q.dtype),
        grid_spec=pltpu.PrefetchScalarGridSpec(
            num_scalar_prefetch=0,
            grid=(B,),
            in_specs=[
                pl.BlockSpec(memory_space=pltpu.MemorySpace.SMEM),     # scale
                pl.BlockSpec((1, N, C), lambda b: (b, 0, 0)),
                pl.BlockSpec((1, M, 2 * C), lambda b: (b, 0, 0)),
            ],
            out_specs=pl.BlockSpec((1, N, C), lambda b: (b, 0, 0)),
        ),
        compiler_params=_compiler_params(("parallel",), est),
    )(scale, q, kv)


# --------------------------------------------------------------------------
# Pure-JAX references (used to build the self-check reference)
# --------------------------------------------------------------------------
def _ref_matmul(x, w, b, **_):
    return x @ w + b


def _ref_ln_matmul(x, g, be, w, b, **_):
    mean = jnp.mean(x, axis=-1, keepdims=True)
    xc = x - mean
    var = jnp.mean(xc * xc, axis=-1, keepdims=True)
    xn = xc * lax.rsqrt(var + LN_EPS)
    return (xn * g + be) @ w + b


def _ref_attention(q, kv, scale, num_heads):
    B, N, C = q.shape
    M = kv.shape[1]
    hd = C // num_heads
    qh = q.reshape(B, N, num_heads, hd).transpose(0, 2, 1, 3)
    k = kv[:, :, :C].reshape(B, M, num_heads, hd).transpose(0, 2, 1, 3)
    v = kv[:, :, C:].reshape(B, M, num_heads, hd).transpose(0, 2, 1, 3)
    s = jnp.einsum('bhnd,bhmd->bhnm', qh, k) * scale[None, :, None, None]
    p = jax.nn.softmax(s, axis=-1)
    o = jnp.einsum('bhnm,bhmd->bhnd', p, v)
    return o.transpose(0, 2, 1, 3).reshape(B, N, C)


# --------------------------------------------------------------------------
# Non-Pallas preprocessing helpers (memory-light, done with lax/jnp)
# --------------------------------------------------------------------------
def _dw_conv(x, w, b, strides, padding):
    # depthwise Conv2d (groups == channels), NCHW / OIHW
    out = lax.conv_general_dilated(
        x, w, window_strides=strides,
        padding=[(padding[0], padding[0]), (padding[1], padding[1])],
        dimension_numbers=('NCHW', 'OIHW', 'NCHW'),
        feature_group_count=x.shape[1])
    return out + b.reshape(1, -1, 1, 1)


# --------------------------------------------------------------------------
# Full forward pass of SpatialIncepAttention (eval mode; dropout = identity)
# --------------------------------------------------------------------------
def spatial_incep_attention(params, tgt, mem, *, num_heads, stride=5,
                            use_pallas=True):
    matmul = pallas_matmul if use_pallas else _ref_matmul
    ln_matmul = pallas_ln_matmul if use_pallas else _ref_ln_matmul
    attention = pallas_attention if use_pallas else _ref_attention

    B, C, H, W = tgt.shape
    N = H * W

    # ---- match_c: 1x1 conv (== per-pixel linear) ----
    # TODO(synk): for tiny dim2 this underfills the MXU; leaving it in the
    # generic Pallas matmul for one code path (XLA would also be fine).
    Bm, C2, Hm, Wm = mem.shape
    mem_rows = mem.transpose(0, 2, 3, 1).reshape(Bm * Hm * Wm, C2)
    mem_rows = matmul(mem_rows, params['match_c_w'].T, params['match_c_b'])
    mem_p = mem_rows.reshape(Bm, Hm, Wm, C).transpose(0, 3, 1, 2)

    # ---- F.interpolate(mode='nearest') to tgt spatial size ----
    ih = (jnp.arange(H) * Hm) // H
    iw = (jnp.arange(W) * Wm) // W
    mem_up = mem_p[:, :, ih, :][:, :, :, iw]

    residual = mem_up - tgt
    # adaptive_avg_pool2d to (H//4, W//4): exact uniform pooling when divisible.
    # TODO(synk): general (non-divisible) adaptive pooling not implemented.
    assert H % 4 == 0 and W % 4 == 0
    reduced = residual.reshape(B, C, H // 4, 4, W // 4, 4).mean(axis=(3, 5))

    # ---- q path: LayerNorm + Linear fused; head split happens in-kernel ----
    x_layer = tgt.reshape(B, C, N).transpose(0, 2, 1).reshape(B * N, C)
    q = ln_matmul(x_layer, params['q_norm_g'], params['q_norm_b'],
                  params['q_w'].T, params['q_b'])
    q = q.reshape(B, N, C)                                   # free reshape

    # ---- kv path: depthwise conv pyramid (lax convs), then fused LN+Linear ----
    # TODO(synk): conv1/conv2/dwConv are small depthwise convs done with
    # lax.conv_general_dilated rather than a dedicated Pallas kernel.
    x1 = _dw_conv(reduced, params['conv1a_w'], params['conv1a_b'],
                  (1, stride), (1, stride // 2))
    x1 = _dw_conv(x1, params['conv1b_w'], params['conv1b_b'],
                  (stride, 1), (1, stride // 2))
    x2 = _dw_conv(reduced, params['conv2_w'], params['conv2_b'],
                  (stride, stride), (stride // 2, stride // 2))
    # TODO(synk): DWConv class is not defined in the provided spec; assumed
    # depthwise Conv2d(embed_dim, embed_dim, k=3, s=1, p=1, groups=embed_dim).
    x3 = _dw_conv(reduced, params['dw_w'], params['dw_b'], (1, 1), (1, 1))

    x_cat = jnp.concatenate([x1.reshape(B, C, -1),
                             x2.reshape(B, C, -1),
                             x3.reshape(B, C, -1)], axis=2)   # (B, C, M)
    M = x_cat.shape[2]
    kv_in = x_cat.transpose(0, 2, 1).reshape(B * M, C)
    kv = ln_matmul(kv_in, params['kv_norm_g'], params['kv_norm_b'],
                   params['kv_w'].T, params['kv_b'])          # (B*M, 2C)
    kv = kv.reshape(B, M, 2 * C)                              # free reshape

    # ---- fused lane-dense attention (scale + softmax + AV, all heads) ----
    o = attention(q, kv, params['scale'], num_heads)          # (B, N, C)
    # attn_drop is identity in eval mode.

    # ---- output projection + residual ----
    o = matmul(o.reshape(B * N, C), params['proj_w'].T, params['proj_b'])
    # proj_drop is identity in eval mode.
    out = o.reshape(B, N, C).transpose(0, 2, 1).reshape(B, C, H, W)
    return out + tgt


# --------------------------------------------------------------------------
# Parameter init mirroring the PyTorch module's _init_weights
# --------------------------------------------------------------------------
def init_params(key, *, dim1, dim2, embed_dim, num_heads, stride=5):
    C = embed_dim
    ks = jax.random.split(key, 8)
    p = {}
    # nn.Parameter(torch.ones(num_heads, 1, 1)) -> ones per head (learnable).
    p['scale'] = jnp.ones((num_heads,), jnp.float32)

    # match_c: Conv2d(dim2, dim1, 1) — kaiming weight, zero bias
    p['match_c_w'] = (jax.random.normal(ks[0], (dim1, dim2), jnp.float32)
                      * math.sqrt(2.0 / dim2))
    p['match_c_b'] = jnp.zeros((dim1,), jnp.float32)

    # Linears: trunc_normal(std=0.02) approx; biases zero (qkv_bias=False)
    p['q_w'] = 0.02 * jax.random.normal(ks[1], (C, C), jnp.float32)
    p['q_b'] = jnp.zeros((C,), jnp.float32)
    p['kv_w'] = 0.02 * jax.random.normal(ks[2], (2 * C, C), jnp.float32)
    p['kv_b'] = jnp.zeros((2 * C,), jnp.float32)
    p['proj_w'] = 0.02 * jax.random.normal(ks[3], (C, C), jnp.float32)
    p['proj_b'] = jnp.zeros((C,), jnp.float32)

    # LayerNorms: weight=1, bias=0
    p['q_norm_g'] = jnp.ones((C,), jnp.float32)
    p['q_norm_b'] = jnp.zeros((C,), jnp.float32)
    p['kv_norm_g'] = jnp.ones((C,), jnp.float32)
    p['kv_norm_b'] = jnp.zeros((C,), jnp.float32)

    # Depthwise convs: kaiming weights, zero bias
    p['conv1a_w'] = (jax.random.normal(ks[4], (C, 1, 1, stride), jnp.float32)
                     * math.sqrt(2.0 / stride))
    p['conv1a_b'] = jnp.zeros((C,), jnp.float32)
    p['conv1b_w'] = (jax.random.normal(ks[5], (C, 1, stride, 1), jnp.float32)
                     * math.sqrt(2.0 / stride))
    p['conv1b_b'] = jnp.zeros((C,), jnp.float32)
    p['conv2_w'] = (jax.random.normal(ks[6], (C, 1, stride, stride), jnp.float32)
                    * math.sqrt(2.0 / (stride * stride)))
    p['conv2_b'] = jnp.zeros((C,), jnp.float32)
    p['dw_w'] = (jax.random.normal(ks[7], (C, 1, 3, 3), jnp.float32)
                 * math.sqrt(2.0 / 9.0))
    p['dw_b'] = jnp.zeros((C,), jnp.float32)
    return p


if __name__ == "__main__":
    key = jax.random.PRNGKey(0)
    k_tgt, k_mem, k_par = jax.random.split(key, 3)

    # Small shapes consistent with the module:
    # tgt: (B, embed_dim, H, W), mem: (B, dim2, Hm, Wm)
    B, C, H, W = 2, 32, 16, 16
    dim2, Hm, Wm = 16, 8, 8
    num_heads = 2
    stride = 5

    tgt = jax.random.normal(k_tgt, (B, C, H, W), jnp.float32)
    mem = jax.random.normal(k_mem, (B, dim2, Hm, Wm), jnp.float32)
    params = init_params(k_par, dim1=C, dim2=dim2, embed_dim=C,
                         num_heads=num_heads, stride=stride)

    fwd_pallas = jax.jit(functools.partial(
        spatial_incep_attention, num_heads=num_heads, stride=stride,
        use_pallas=True))
    fwd_ref = jax.jit(functools.partial(
        spatial_incep_attention, num_heads=num_heads, stride=stride,
        use_pallas=False))

    out = jax.block_until_ready(fwd_pallas(params, tgt, mem))
    ref = jax.block_until_ready(fwd_ref(params, tgt, mem))

    assert out.shape == (B, C, H, W)
    # Tolerance slightly relaxed vs exact f32 because the softmax denominator
    # uses the approximate EUP reciprocal (pl.reciprocal(..., approx=True)).
    assert jnp.allclose(out, ref, atol=1e-3, rtol=1e-3), \
        float(jnp.max(jnp.abs(out - ref)))
    print("KERNEL_OK")
</pallas_src>

<mosaic_0001>
module attributes {stable_mosaic.version = 11 : i64} {
  func.func @_matmul_kernel(%arg0: i32, %arg1: i32, %arg2: memref<128x16xf32, #tpu.memory_space<vmem>>, %arg3: memref<16x32xf32, #tpu.memory_space<vmem>>, %arg4: memref<1x32xf32, #tpu.memory_space<vmem>>, %arg5: memref<128x32xf32, #tpu.memory_space<vmem>>, %arg6: memref<128x32xf32, #tpu.memory_space<vmem>>) attributes {dimension_semantics = [#tpu.dimension_semantics<parallel>, #tpu.dimension_semantics<arbitrary>], iteration_bounds = array<i64: 1, 1>, scalar_prefetch = 0 : i64, scratch_operands = 1 : i64, tpu.core_type = #tpu.core_type<tc>, window_params = [{transform_indices = @transform_0, window_bounds = array<i64: 128, 16>}, {transform_indices = @transform_1, window_bounds = array<i64: 16, 32>}, {pipeline_mode = #tpu.pipeline_mode<synchronous>, transform_indices = @transform_2, window_bounds = array<i64: 1, 32>}, {transform_indices = @transform_3, window_bounds = array<i64: 128, 32>}]} {
    %c0_i32 = arith.constant 0 : i32
    %0 = arith.cmpi eq, %arg1, %c0_i32 : i32
    %1 = arith.extui %0 : i1 to i32
    %c0_i32_0 = arith.constant 0 : i32
    %2 = arith.cmpi ne, %1, %c0_i32_0 : i32
    scf.if %2 {
      %cst_10 = arith.constant 0.000000e+00 : f32
      %12 = vector.broadcast %cst_10 : f32 to vector<128x32xf32>
      %c0_11 = arith.constant 0 : index
      %c0_12 = arith.constant 0 : index
      %13 = vector.load %arg6[%c0_11, %c0_12] : memref<128x32xf32, #tpu.memory_space<vmem>>, vector<128x32xf32>
      tpu.vector_store %arg6[%c0_11, %c0_12], %12 {strides = array<i32>} : memref<128x32xf32, #tpu.memory_space<vmem>>, vector<128x32xf32>,
    } else {
    }
    %c0 = arith.constant 0 : index
    %c0_1 = arith.constant 0 : index
    %3 = vector.load %arg6[%c0, %c0_1] : memref<128x32xf32, #tpu.memory_space<vmem>>, vector<128x32xf32>
    %c0_2 = arith.constant 0 : index
    %c0_3 = arith.constant 0 : index
    %4 = vector.load %arg2[%c0_2, %c0_3] : memref<128x16xf32, #tpu.memory_space<vmem>>, vector<128x16xf32>
    %c0_4 = arith.constant 0 : index
    %c0_5 = arith.constant 0 : index
    %5 = vector.load %arg3[%c0_4, %c0_5] : memref<16x32xf32, #tpu.memory_space<vmem>>, vector<16x32xf32>
    %cst = arith.constant dense<0.000000e+00> : vector<128x32xf32>
    %6 = tpu.matmul %4, %5, %cst {dimension_numbers = #tpu.dot_dimension_numbers<[1], [0], [0], [1], [0, 0, 1, 1], [], []>} : vector<128x16xf32>, vector<16x32xf32>, vector<128x32xf32> -> vector<128x32xf32>
    %7 = arith.addf %3, %6 : vector<128x32xf32>
    %c0_6 = arith.constant 0 : index
    %c0_7 = arith.constant 0 : index
    %8 = vector.load %arg6[%c0_6, %c0_7] : memref<128x32xf32, #tpu.memory_space<vmem>>, vector<128x32xf32>
    tpu.vector_store %arg6[%c0_6, %c0_7], %7 {strides = array<i32>} : memref<128x32xf32, #tpu.memory_space<vmem>>, vector<128x32xf32>,
    %c0_i32_8 = arith.constant 0 : i32
    %9 = arith.cmpi eq, %arg1, %c0_i32_8 : i32
    %10 = arith.extui %9 : i1 to i32
    %c0_i32_9 = arith.constant 0 : i32
    %11 = arith.cmpi ne, %10, %c0_i32_9 : i32
    scf.if %11 {
      %c0_10 = arith.constant 0 : index
      %c0_11 = arith.constant 0 : index
      %12 = vector.load %arg6[%c0_10, %c0_11] : memref<128x32xf32, #tpu.memory_space<vmem>>, vector<128x32xf32>
      %c0_12 = arith.constant 0 : index
      %c0_13 = arith.constant 0 : index
      %13 = vector.load %arg4[%c0_12, %c0_13] : memref<1x32xf32, #tpu.memory_space<vmem>>, vector<1x32xf32>
      %14 = vector.broadcast %13 : vector<1x32xf32> to vector<128x32xf32>
      %15 = arith.addf %12, %14 : vector<128x32xf32>
      %c0_14 = arith.constant 0 : index
      %c0_15 = arith.constant 0 : index
      %16 = vector.load %arg5[%c0_14, %c0_15] : memref<128x32xf32, #tpu.memory_space<vmem>>, vector<128x32xf32>
      tpu.vector_store %arg5[%c0_14, %c0_15], %15 {strides = array<i32>} : memref<128x32xf32, #tpu.memory_space<vmem>>, vector<128x32xf32>,
    } else {
    }
    return
  }
  func.func @transform_0(%arg0: i32, %arg1: i32) -> (i32, i32) {
    %c0_i32 = arith.constant 0 : i32
    return %arg0, %arg1 : i32, i32
  }
  func.func @transform_1(%arg0: i32, %arg1: i32) -> (i32, i32) {
    %c0_i32 = arith.constant 0 : i32
    %c0_i32_0 = arith.constant 0 : i32
    return %arg1, %c0_i32 : i32, i32
  }
  func.func @transform_2(%arg0: i32, %arg1: i32) -> (i32, i32) {
    %c0_i32 = arith.constant 0 : i32
    %c0_i32_0 = arith.constant 0 : i32
    %c0_i32_1 = arith.constant 0 : i32
    return %c0_i32, %c0_i32_0 : i32, i32
  }
  func.func @transform_3(%arg0: i32, %arg1: i32) -> (i32, i32) {
    %c0_i32 = arith.constant 0 : i32
    %c0_i32_0 = arith.constant 0 : i32
    return %arg0, %c0_i32 : i32, i32
  }
}

module attributes {stable_mosaic.version = 11 : i64} {
  func.func @_ln_matmul_kernel(%arg0: i32, %arg1: memref<48x32xf32, #tpu.memory_space<vmem>>, %arg2: memref<1x32xf32, #tpu.memory_space<vmem>>, %arg3: memref<1x32xf32, #tpu.memory_space<vmem>>, %arg4: memref<32x64xf32, #tpu.memory_space<vmem>>, %arg5: memref<1x64xf32, #tpu.memory_space<vmem>>, %arg6: memref<48x64xf32, #tpu.memory_space<vmem>>) attributes {dimension_semantics = [#tpu.dimension_semantics<parallel>], iteration_bounds = array<i64: 1>, scalar_prefetch = 0 : i64, scratch_operands = 0 : i64, tpu.core_type = #tpu.core_type<tc>, window_params = [{transform_indices = @transform_0, window_bounds = array<i64: 48, 32>}, {pipeline_mode = #tpu.pipeline_mode<synchronous>, transform_indices = @transform_1, window_bounds = array<i64: 1, 32>}, {pipeline_mode = #tpu.pipeline_mode<synchronous>, transform_indices = @transform_2, window_bounds = array<i64: 1, 32>}, {pipeline_mode = #tpu.pipeline_mode<synchronous>, transform_indices = @transform_3, window_bounds = array<i64: 32, 64>}, {pipeline_mode = #tpu.pipeline_mode<synchronous>, transform_indices = @transform_4, window_bounds = array<i64: 1, 64>}, {transform_indices = @transform_5, window_bounds = array<i64: 48, 64>}]} {
    %c0 = arith.constant 0 : index
    %c0_0 = arith.constant 0 : index
    %0 = vector.load %arg1[%c0, %c0_0] : memref<48x32xf32, #tpu.memory_space<vmem>>, vector<48x32xf32>
    %cst = arith.constant dense<0.000000e+00> : vector<48xf32>
    %1 = vector.multi_reduction <add>, %0, %cst [1] : vector<48x32xf32> to vector<48xf32>
    %2 = vector.shape_cast %1 : vector<48xf32> to vector<48x1xf32>
    %cst_1 = arith.constant 3.200000e+01 : f32
    %3 = vector.broadcast %cst_1 : f32 to vector<48x1xf32>
    %4 = arith.divf %2, %3 : vector<48x1xf32>
    %5 = vector.broadcast %4 : vector<48x1xf32> to vector<48x32xf32>
    %6 = arith.subf %0, %5 : vector<48x32xf32>
    %7 = arith.mulf %6, %6 : vector<48x32xf32>
    %cst_2 = arith.constant dense<0.000000e+00> : vector<48xf32>
    %8 = vector.multi_reduction <add>, %7, %cst_2 [1] : vector<48x32xf32> to vector<48xf32>
    %9 = vector.shape_cast %8 : vector<48xf32> to vector<48x1xf32>
    %cst_3 = arith.constant 3.200000e+01 : f32
    %10 = vector.broadcast %cst_3 : f32 to vector<48x1xf32>
    %11 = arith.divf %9, %10 : vector<48x1xf32>
    %cst_4 = arith.constant 9.99999974E-6 : f32
    %12 = vector.broadcast %cst_4 : f32 to vector<48x1xf32>
    %13 = arith.addf %11, %12 : vector<48x1xf32>
    %14 = math.rsqrt %13 : vector<48x1xf32>
    %15 = vector.broadcast %14 : vector<48x1xf32> to vector<48x32xf32>
    %16 = arith.mulf %6, %15 : vector<48x32xf32>
    %c0_5 = arith.constant 0 : index
    %c0_6 = arith.constant 0 : index
    %17 = vector.load %arg2[%c0_5, %c0_6] : memref<1x32xf32, #tpu.memory_space<vmem>>, vector<1x32xf32>
    %18 = vector.broadcast %17 : vector<1x32xf32> to vector<48x32xf32>
    %19 = arith.mulf %16, %18 : vector<48x32xf32>
    %c0_7 = arith.constant 0 : index
    %c0_8 = arith.constant 0 : index
    %20 = vector.load %arg3[%c0_7, %c0_8] : memref<1x32xf32, #tpu.memory_space<vmem>>, vector<1x32xf32>
    %21 = vector.broadcast %20 : vector<1x32xf32> to vector<48x32xf32>
    %22 = arith.addf %19, %21 : vector<48x32xf32>
    %c0_9 = arith.constant 0 : index
    %c0_10 = arith.constant 0 : index
    %23 = vector.load %arg4[%c0_9, %c0_10] : memref<32x64xf32, #tpu.memory_space<vmem>>, vector<32x64xf32>
    %cst_11 = arith.constant dense<0.000000e+00> : vector<48x64xf32>
    %24 = tpu.matmul %22, %23, %cst_11 {dimension_numbers = #tpu.dot_dimension_numbers<[1], [0], [0], [1], [0, 0, 1, 1], [], []>} : vector<48x32xf32>, vector<32x64xf32>, vector<48x64xf32> -> vector<48x64xf32>
    %c0_12 = arith.constant 0 : index
    %c0_13 = arith.constant 0 : index
    %25 = vector.load %arg5[%c0_12, %c0_13] : memref<1x64xf32, #tpu.memory_space<vmem>>, vector<1x64xf32>
    %26 = vector.broadcast %25 : vector<1x64xf32> to vector<48x64xf32>
    %27 = arith.addf %24, %26 : vector<48x64xf32>
    %c0_14 = arith.constant 0 : index
    %c0_15 = arith.constant 0 : index
    %28 = vector.load %arg6[%c0_14, %c0_15] : memref<48x64xf32, #tpu.memory_space<vmem>>, vector<48x64xf32>
    tpu.vector_store %arg6[%c0_14, %c0_15], %27 {strides = array<i32>} : memref<48x64xf32, #tpu.memory_space<vmem>>, vector<48x64xf32>,
    return
  }
  func.func @transform_0(%arg0: i32) -> (i32, i32) {
    %c0_i32 = arith.constant 0 : i32
    %c0_i32_0 = arith.constant 0 : i32
    return %arg0, %c0_i32 : i32, i32
  }
  func.func @transform_1(%arg0: i32) -> (i32, i32) {
    %c0_i32 = arith.constant 0 : i32
    %c0_i32_0 = arith.constant 0 : i32
    %c0_i32_1 = arith.constant 0 : i32
    return %c0_i32, %c0_i32_0 : i32, i32
  }
  func.func @transform_2(%arg0: i32) -> (i32, i32) {
    %c0_i32 = arith.constant 0 : i32
    %c0_i32_0 = arith.constant 0 : i32
    %c0_i32_1 = arith.constant 0 : i32
    return %c0_i32, %c0_i32_0 : i32, i32
  }
  func.func @transform_3(%arg0: i32) -> (i32, i32) {
    %c0_i32 = arith.constant 0 : i32
    %c0_i32_0 = arith.constant 0 : i32
    %c0_i32_1 = arith.constant 0 : i32
    return %c0_i32, %c0_i32_0 : i32, i32
  }
  func.func @transform_4(%arg0: i32) -> (i32, i32) {
    %c0_i32 = arith.constant 0 : i32
    %c0_i32_0 = arith.constant 0 : i32
    %c0_i32_1 = arith.constant 0 : i32
    return %c0_i32, %c0_i32_0 : i32, i32
  }
  func.func @transform_5(%arg0: i32) -> (i32, i32) {
    %c0_i32 = arith.constant 0 : i32
    %c0_i32_0 = arith.constant 0 : i32
    return %arg0, %c0_i32 : i32, i32
  }
}

module attributes {stable_mosaic.version = 11 : i64} {
  func.func @_ln_matmul_kernel(%arg0: i32, %arg1: memref<256x32xf32, #tpu.memory_space<vmem>>, %arg2: memref<1x32xf32, #tpu.memory_space<vmem>>, %arg3: memref<1x32xf32, #tpu.memory_space<vmem>>, %arg4: memref<32x32xf32, #tpu.memory_space<vmem>>, %arg5: memref<1x32xf32, #tpu.memory_space<vmem>>, %arg6: memref<256x32xf32, #tpu.memory_space<vmem>>) attributes {dimension_semantics = [#tpu.dimension_semantics<parallel>], iteration_bounds = array<i64: 2>, scalar_prefetch = 0 : i64, scratch_operands = 0 : i64, tpu.core_type = #tpu.core_type<tc>, window_params = [{transform_indices = @transform_0, window_bounds = array<i64: 256, 32>}, {pipeline_mode = #tpu.pipeline_mode<synchronous>, transform_indices = @transform_1, window_bounds = array<i64: 1, 32>}, {pipeline_mode = #tpu.pipeline_mode<synchronous>, transform_indices = @transform_2, window_bounds = array<i64: 1, 32>}, {pipeline_mode = #tpu.pipeline_mode<synchronous>, transform_indices = @transform_3, window_bounds = array<i64: 32, 32>}, {pipeline_mode = #tpu.pipeline_mode<synchronous>, transform_indices = @transform_4, window_bounds = array<i64: 1, 32>}, {transform_indices = @transform_5, window_bounds = array<i64: 256, 32>}]} {
    %c0 = arith.constant 0 : index
    %c0_0 = arith.constant 0 : index
    %0 = vector.load %arg1[%c0, %c0_0] : memref<256x32xf32, #tpu.memory_space<vmem>>, vector<256x32xf32>
    %cst = arith.constant dense<0.000000e+00> : vector<256xf32>
    %1 = vector.multi_reduction <add>, %0, %cst [1] : vector<256x32xf32> to vector<256xf32>
    %2 = vector.shape_cast %1 : vector<256xf32> to vector<256x1xf32>
    %cst_1 = arith.constant 3.200000e+01 : f32
    %3 = vector.broadcast %cst_1 : f32 to vector<256x1xf32>
    %4 = arith.divf %2, %3 : vector<256x1xf32>
    %5 = vector.broadcast %4 : vector<256x1xf32> to vector<256x32xf32>
    %6 = arith.subf %0, %5 : vector<256x32xf32>
    %7 = arith.mulf %6, %6 : vector<256x32xf32>
    %cst_2 = arith.constant dense<0.000000e+00> : vector<256xf32>
    %8 = vector.multi_reduction <add>, %7, %cst_2 [1] : vector<256x32xf32> to vector<256xf32>
    %9 = vector.shape_cast %8 : vector<256xf32> to vector<256x1xf32>
    %cst_3 = arith.constant 3.200000e+01 : f32
    %10 = vector.broadcast %cst_3 : f32 to vector<256x1xf32>
    %11 = arith.divf %9, %10 : vector<256x1xf32>
    %cst_4 = arith.constant 9.99999974E-6 : f32
    %12 = vector.broadcast %cst_4 : f32 to vector<256x1xf32>
    %13 = arith.addf %11, %12 : vector<256x1xf32>
    %14 = math.rsqrt %13 : vector<256x1xf32>
    %15 = vector.broadcast %14 : vector<256x1xf32> to vector<256x32xf32>
    %16 = arith.mulf %6, %15 : vector<256x32xf32>
    %c0_5 = arith.constant 0 : index
    %c0_6 = arith.constant 0 : index
    %17 = vector.load %arg2[%c0_5, %c0_6] : memref<1x32xf32, #tpu.memory_space<vmem>>, vector<1x32xf32>
    %18 = vector.broadcast %17 : vector<1x32xf32> to vector<256x32xf32>
    %19 = arith.mulf %16, %18 : vector<256x32xf32>
    %c0_7 = arith.constant 0 : index
    %c0_8 = arith.constant 0 : index
    %20 = vector.load %arg3[%c0_7, %c0_8] : memref<1x32xf32, #tpu.memory_space<vmem>>, vector<1x32xf32>
    %21 = vector.broadcast %20 : vector<1x32xf32> to vector<256x32xf32>
    %22 = arith.addf %19, %21 : vector<256x32xf32>
    %c0_9 = arith.constant 0 : index
    %c0_10 = arith.constant 0 : index
    %23 = vector.load %arg4[%c0_9, %c0_10] : memref<32x32xf32, #tpu.memory_space<vmem>>, vector<32x32xf32>
    %cst_11 = arith.constant dense<0.000000e+00> : vector<256x32xf32>
    %24 = tpu.matmul %22, %23, %cst_11 {dimension_numbers = #tpu.dot_dimension_numbers<[1], [0], [0], [1], [0, 0, 1, 1], [], []>} : vector<256x32xf32>, vector<32x32xf32>, vector<256x32xf32> -> vector<256x32xf32>
    %c0_12 = arith.constant 0 : index
    %c0_13 = arith.constant 0 : index
    %25 = vector.load %arg5[%c0_12, %c0_13] : memref<1x32xf32, #tpu.memory_space<vmem>>, vector<1x32xf32>
    %26 = vector.broadcast %25 : vector<1x32xf32> to vector<256x32xf32>
    %27 = arith.addf %24, %26 : vector<256x32xf32>
    %c0_14 = arith.constant 0 : index
    %c0_15 = arith.constant 0 : index
    %28 = vector.load %arg6[%c0_14, %c0_15] : memref<256x32xf32, #tpu.memory_space<vmem>>, vector<256x32xf32>
    tpu.vector_store %arg6[%c0_14, %c0_15], %27 {strides = array<i32>} : memref<256x32xf32, #tpu.memory_space<vmem>>, vector<256x32xf32>,
    return
  }
  func.func @transform_0(%arg0: i32) -> (i32, i32) {
    %c0_i32 = arith.constant 0 : i32
    %c0_i32_0 = arith.constant 0 : i32
    return %arg0, %c0_i32 : i32, i32
  }
  func.func @transform_1(%arg0: i32) -> (i32, i32) {
    %c0_i32 = arith.constant 0 : i32
    %c0_i32_0 = arith.constant 0 : i32
    %c0_i32_1 = arith.constant 0 : i32
    return %c0_i32, %c0_i32_0 : i32, i32
  }
  func.func @transform_2(%arg0: i32) -> (i32, i32) {
    %c0_i32 = arith.constant 0 : i32
    %c0_i32_0 = arith.constant 0 : i32
    %c0_i32_1 = arith.constant 0 : i32
    return %c0_i32, %c0_i32_0 : i32, i32
  }
  func.func @transform_3(%arg0: i32) -> (i32, i32) {
    %c0_i32 = arith.constant 0 : i32
    %c0_i32_0 = arith.constant 0 : i32
    %c0_i32_1 = arith.constant 0 : i32
    return %c0_i32, %c0_i32_0 : i32, i32
  }
  func.func @transform_4(%arg0: i32) -> (i32, i32) {
    %c0_i32 = arith.constant 0 : i32
    %c0_i32_0 = arith.constant 0 : i32
    %c0_i32_1 = arith.constant 0 : i32
    return %c0_i32, %c0_i32_0 : i32, i32
  }
  func.func @transform_5(%arg0: i32) -> (i32, i32) {
    %c0_i32 = arith.constant 0 : i32
    %c0_i32_0 = arith.constant 0 : i32
    return %arg0, %c0_i32 : i32, i32
  }
}

module attributes {stable_mosaic.version = 11 : i64} {
  func.func @_matmul_kernel(%arg0: i32, %arg1: i32, %arg2: memref<256x32xf32, #tpu.memory_space<vmem>>, %arg3: memref<32x32xf32, #tpu.memory_space<vmem>>, %arg4: memref<1x32xf32, #tpu.memory_space<vmem>>, %arg5: memref<256x32xf32, #tpu.memory_space<vmem>>, %arg6: memref<256x32xf32, #tpu.memory_space<vmem>>) attributes {dimension_semantics = [#tpu.dimension_semantics<parallel>, #tpu.dimension_semantics<arbitrary>], iteration_bounds = array<i64: 2, 1>, scalar_prefetch = 0 : i64, scratch_operands = 1 : i64, tpu.core_type = #tpu.core_type<tc>, window_params = [{transform_indices = @transform_0, window_bounds = array<i64: 256, 32>}, {transform_indices = @transform_1, window_bounds = array<i64: 32, 32>}, {pipeline_mode = #tpu.pipeline_mode<synchronous>, transform_indices = @transform_2, window_bounds = array<i64: 1, 32>}, {transform_indices = @transform_3, window_bounds = array<i64: 256, 32>}]} {
    %c0_i32 = arith.constant 0 : i32
    %0 = arith.cmpi eq, %arg1, %c0_i32 : i32
    %1 = arith.extui %0 : i1 to i32
    %c0_i32_0 = arith.constant 0 : i32
    %2 = arith.cmpi ne, %1, %c0_i32_0 : i32
    scf.if %2 {
      %cst_10 = arith.constant 0.000000e+00 : f32
      %12 = vector.broadcast %cst_10 : f32 to vector<256x32xf32>
      %c0_11 = arith.constant 0 : index
      %c0_12 = arith.constant 0 : index
      %13 = vector.load %arg6[%c0_11, %c0_12] : memref<256x32xf32, #tpu.memory_space<vmem>>, vector<256x32xf32>
      tpu.vector_store %arg6[%c0_11, %c0_12], %12 {strides = array<i32>} : memref<256x32xf32, #tpu.memory_space<vmem>>, vector<256x32xf32>,
    } else {
    }
    %c0 = arith.constant 0 : index
    %c0_1 = arith.constant 0 : index
    %3 = vector.load %arg6[%c0, %c0_1] : memref<256x32xf32, #tpu.memory_space<vmem>>, vector<256x32xf32>
    %c0_2 = arith.constant 0 : index
    %c0_3 = arith.constant 0 : index
    %4 = vector.load %arg2[%c0_2, %c0_3] : memref<256x32xf32, #tpu.memory_space<vmem>>, vector<256x32xf32>
    %c0_4 = arith.constant 0 : index
    %c0_5 = arith.constant 0 : index
    %5 = vector.load %arg3[%c0_4, %c0_5] : memref<32x32xf32, #tpu.memory_space<vmem>>, vector<32x32xf32>
    %cst = arith.constant dense<0.000000e+00> : vector<256x32xf32>
    %6 = tpu.matmul %4, %5, %cst {dimension_numbers = #tpu.dot_dimension_numbers<[1], [0], [0], [1], [0, 0, 1, 1], [], []>} : vector<256x32xf32>, vector<32x32xf32>, vector<256x32xf32> -> vector<256x32xf32>
    %7 = arith.addf %3, %6 : vector<256x32xf32>
    %c0_6 = arith.constant 0 : index
    %c0_7 = arith.constant 0 : index
    %8 = vector.load %arg6[%c0_6, %c0_7] : memref<256x32xf32, #tpu.memory_space<vmem>>, vector<256x32xf32>
    tpu.vector_store %arg6[%c0_6, %c0_7], %7 {strides = array<i32>} : memref<256x32xf32, #tpu.memory_space<vmem>>, vector<256x32xf32>,
    %c0_i32_8 = arith.constant 0 : i32
    %9 = arith.cmpi eq, %arg1, %c0_i32_8 : i32
    %10 = arith.extui %9 : i1 to i32
    %c0_i32_9 = arith.constant 0 : i32
    %11 = arith.cmpi ne, %10, %c0_i32_9 : i32
    scf.if %11 {
      %c0_10 = arith.constant 0 : index
      %c0_11 = arith.constant 0 : index
      %12 = vector.load %arg6[%c0_10, %c0_11] : memref<256x32xf32, #tpu.memory_space<vmem>>, vector<256x32xf32>
      %c0_12 = arith.constant 0 : index
      %c0_13 = arith.constant 0 : index
      %13 = vector.load %arg4[%c0_12, %c0_13] : memref<1x32xf32, #tpu.memory_space<vmem>>, vector<1x32xf32>
      %14 = vector.broadcast %13 : vector<1x32xf32> to vector<256x32xf32>
      %15 = arith.addf %12, %14 : vector<256x32xf32>
      %c0_14 = arith.constant 0 : index
      %c0_15 = arith.constant 0 : index
      %16 = vector.load %arg5[%c0_14, %c0_15] : memref<256x32xf32, #tpu.memory_space<vmem>>, vector<256x32xf32>
      tpu.vector_store %arg5[%c0_14, %c0_15], %15 {strides = array<i32>} : memref<256x32xf32, #tpu.memory_space<vmem>>, vector<256x32xf32>,
    } else {
    }
    return
  }
  func.func @transform_0(%arg0: i32, %arg1: i32) -> (i32, i32) {
    %c0_i32 = arith.constant 0 : i32
    return %arg0, %arg1 : i32, i32
  }
  func.func @transform_1(%arg0: i32, %arg1: i32) -> (i32, i32) {
    %c0_i32 = arith.constant 0 : i32
    %c0_i32_0 = arith.constant 0 : i32
    return %arg1, %c0_i32 : i32, i32
  }
  func.func @transform_2(%arg0: i32, %arg1: i32) -> (i32, i32) {
    %c0_i32 = arith.constant 0 : i32
    %c0_i32_0 = arith.constant 0 : i32
    %c0_i32_1 = arith.constant 0 : i32
    return %c0_i32, %c0_i32_0 : i32, i32
  }
  func.func @transform_3(%arg0: i32, %arg1: i32) -> (i32, i32) {
    %c0_i32 = arith.constant 0 : i32
    %c0_i32_0 = arith.constant 0 : i32
    return %arg0, %c0_i32 : i32, i32
  }
}

module attributes {stable_mosaic.version = 11 : i64} {
  func.func @_attention_kernel(%arg0: i32, %arg1: memref<2xf32, #tpu.memory_space<smem>>, %arg2: memref<1x256x32xf32, #tpu.memory_space<vmem>>, %arg3: memref<1x22x64xf32, #tpu.memory_space<vmem>>, %arg4: memref<1x256x32xf32, #tpu.memory_space<vmem>>) attributes {dimension_semantics = [#tpu.dimension_semantics<parallel>], iteration_bounds = array<i64: 2>, scalar_prefetch = 0 : i64, scratch_operands = 0 : i64, tpu.core_type = #tpu.core_type<tc>, window_params = [{transform_indices = @transform_0, window_bounds = array<i64: 2>}, {transform_indices = @transform_1, window_bounds = array<i64: 1, 256, 32>}, {transform_indices = @transform_2, window_bounds = array<i64: 1, 22, 64>}, {transform_indices = @transform_3, window_bounds = array<i64: 1, 256, 32>}]} {
    %c0 = arith.constant 0 : index
    %c0_0 = arith.constant 0 : index
    %c0_1 = arith.constant 0 : index
    %0 = vector.load %arg2[%c0, %c0_0, %c0_1] : memref<1x256x32xf32, #tpu.memory_space<vmem>>, vector<1x256x32xf32>
    %1 = vector.shape_cast %0 : vector<1x256x32xf32> to vector<256x32xf32>
    %c0_2 = arith.constant 0 : index
    %c0_3 = arith.constant 0 : index
    %c0_4 = arith.constant 0 : index
    %2 = vector.load %arg3[%c0_2, %c0_3, %c0_4] : memref<1x22x64xf32, #tpu.memory_space<vmem>>, vector<1x22x64xf32>
    %3 = vector.shape_cast %2 : vector<1x22x64xf32> to vector<22x64xf32>
    %4 = vector.extract_strided_slice %1 {offsets = [0, 0], sizes = [256, 16], strides = [1, 1]} : vector<256x32xf32> to vector<256x16xf32>
    %c0_5 = arith.constant 0 : index
    %5 = memref.load %arg1[%c0_5] : memref<2xf32, #tpu.memory_space<smem>>
    %6 = vector.broadcast %5 : f32 to vector<256x16xf32>
    %7 = arith.mulf %4, %6 : vector<256x16xf32>
    %8 = vector.extract_strided_slice %3 {offsets = [0, 0], sizes = [22, 16], strides = [1, 1]} : vector<22x64xf32> to vector<22x16xf32>
    %9 = vector.extract_strided_slice %3 {offsets = [0, 32], sizes = [22, 16], strides = [1, 1]} : vector<22x64xf32> to vector<22x16xf32>
    %cst = arith.constant dense<0.000000e+00> : vector<256x22xf32>
    %10 = tpu.matmul %7, %8, %cst {dimension_numbers = #tpu.dot_dimension_numbers<[1], [1], [0], [0], [0, 0, 1, 0], [], []>} : vector<256x16xf32>, vector<22x16xf32>, vector<256x22xf32> -> vector<256x22xf32>
    %cst_6 = arith.constant dense<0xFF800000> : vector<256xf32>
    %11 = vector.multi_reduction <maximumf>, %10, %cst_6 [1] : vector<256x22xf32> to vector<256xf32>
    %12 = vector.shape_cast %11 : vector<256xf32> to vector<256x1xf32>
    %13 = vector.broadcast %12 : vector<256x1xf32> to vector<256x22xf32>
    %14 = arith.subf %10, %13 : vector<256x22xf32>
    %15 = math.exp %14 : vector<256x22xf32>
    %cst_7 = arith.constant dense<0.000000e+00> : vector<256xf32>
    %16 = vector.multi_reduction <add>, %15, %cst_7 [1] : vector<256x22xf32> to vector<256xf32>
    %17 = vector.shape_cast %16 : vector<256xf32> to vector<256x1xf32>
    %18 = tpu.reciprocal %17 {approx = true} : vector<256x1xf32> -> vector<256x1xf32>
    %19 = vector.broadcast %18 : vector<256x1xf32> to vector<256x22xf32>
    %20 = arith.mulf %15, %19 : vector<256x22xf32>
    %cst_8 = arith.constant dense<0.000000e+00> : vector<256x16xf32>
    %21 = tpu.matmul %20, %9, %cst_8 {dimension_numbers = #tpu.dot_dimension_numbers<[1], [0], [0], [1], [0, 0, 1, 1], [], []>} : vector<256x22xf32>, vector<22x16xf32>, vector<256x16xf32> -> vector<256x16xf32>
    %22 = vector.extract_strided_slice %1 {offsets = [0, 16], sizes = [256, 16], strides = [1, 1]} : vector<256x32xf32> to vector<256x16xf32>
    %c1 = arith.constant 1 : index
    %23 = memref.load %arg1[%c1] : memref<2xf32, #tpu.memory_space<smem>>
    %24 = vector.broadcast %23 : f32 to vector<256x16xf32>
    %25 = arith.mulf %22, %24 : vector<256x16xf32>
    %26 = vector.extract_strided_slice %3 {offsets = [0, 16], sizes = [22, 16], strides = [1, 1]} : vector<22x64xf32> to vector<22x16xf32>
    %27 = vector.extract_strided_slice %3 {offsets = [0, 48], sizes = [22, 16], strides = [1, 1]} : vector<22x64xf32> to vector<22x16xf32>
    %cst_9 = arith.constant dense<0.000000e+00> : vector<256x22xf32>
    %28 = tpu.matmul %25, %26, %cst_9 {dimension_numbers = #tpu.dot_dimension_numbers<[1], [1], [0], [0], [0, 0, 1, 0], [], []>} : vector<256x16xf32>, vector<22x16xf32>, vector<256x22xf32> -> vector<256x22xf32>
    %cst_10 = arith.constant dense<0xFF800000> : vector<256xf32>
    %29 = vector.multi_reduction <maximumf>, %28, %cst_10 [1] : vector<256x22xf32> to vector<256xf32>
    %30 = vector.shape_cast %29 : vector<256xf32> to vector<256x1xf32>
    %31 = vector.broadcast %30 : vector<256x1xf32> to vector<256x22xf32>
    %32 = arith.subf %28, %31 : vector<256x22xf32>
    %33 = math.exp %32 : vector<256x22xf32>
    %cst_11 = arith.constant dense<0.000000e+00> : vector<256xf32>
    %34 = vector.multi_reduction <add>, %33, %cst_11 [1] : vector<256x22xf32> to vector<256xf32>
    %35 = vector.shape_cast %34 : vector<256xf32> to vector<256x1xf32>
    %36 = tpu.reciprocal %35 {approx = true} : vector<256x1xf32> -> vector<256x1xf32>
    %37 = vector.broadcast %36 : vector<256x1xf32> to vector<256x22xf32>
    %38 = arith.mulf %33, %37 : vector<256x22xf32>
    %cst_12 = arith.constant dense<0.000000e+00> : vector<256x16xf32>
    %39 = tpu.matmul %38, %27, %cst_12 {dimension_numbers = #tpu.dot_dimension_numbers<[1], [0], [0], [1], [0, 0, 1, 1], [], []>} : vector<256x22xf32>, vector<22x16xf32>, vector<256x16xf32> -> vector<256x16xf32>
    %40 = tpu.concatenate %21, %39 in 1 : vector<256x16xf32>, vector<256x16xf32> -> vector<256x32xf32>
    %c0_13 = arith.constant 0 : index
    %c0_14 = arith.constant 0 : index
    %c0_15 = arith.constant 0 : index
    %41 = vector.load %arg4[%c0_13, %c0_14, %c0_15] : memref<1x256x32xf32, #tpu.memory_space<vmem>>, vector<1x256x32xf32>
    %42 = vector.shape_cast %41 : vector<1x256x32xf32> to vector<256x32xf32>
    %43 = vector.shape_cast %40 : vector<256x32xf32> to vector<1x256x32xf32>
    tpu.vector_store %arg4[%c0_13, %c0_14, %c0_15], %43 {strides = array<i32>} : memref<1x256x32xf32, #tpu.memory_space<vmem>>, vector<1x256x32xf32>,
    return
  }
  func.func @transform_0(%arg0: i32) -> i32 {
    %c0_i32 = arith.constant 0 : i32
    %c0_i32_0 = arith.constant 0 : i32
    return %c0_i32 : i32
  }
  func.func @transform_1(%arg0: i32) -> (i32, i32, i32) {
    %c0_i32 = arith.constant 0 : i32
    %c0_i32_0 = arith.constant 0 : i32
    %c0_i32_1 = arith.constant 0 : i32
    return %arg0, %c0_i32, %c0_i32_0 : i32, i32, i32
  }
  func.func @transform_2(%arg0: i32) -> (i32, i32, i32) {
    %c0_i32 = arith.constant 0 : i32
    %c0_i32_0 = arith.constant 0 : i32
    %c0_i32_1 = arith.constant 0 : i32
    return %arg0, %c0_i32, %c0_i32_0 : i32, i32, i32
  }
  func.func @transform_3(%arg0: i32) -> (i32, i32, i32) {
    %c0_i32 = arith.constant 0 : i32
    %c0_i32_0 = arith.constant 0 : i32
    %c0_i32_1 = arith.constant 0 : i32
    return %arg0, %c0_i32, %c0_i32_0 : i32, i32, i32
  }
}

</mosaic_0001>

<bundles_post_ra>
// kernel: spatial_incep_attention.5
= control target key start
LH: loop header
LB: loop body
LE: loop exit
PB: predicated region body
PF: predicated region fallthrough
CT: control target
= control target key end

     0   :  { %8 = vsyncpa [#allocation4], 0  ;;  %s470_s12 = smov [#allocation3]   ;;  %s645_s0 = inlined_call_operand.hbm [shape: f32[128,16], index: 0, kind: input, shape index: {}]   ;;  %s646_s1 = inlined_call_operand.vmem [shape: f32[16,32], index: 1, kind: input, shape index: {}]   ;;  %s647_s2 = inlined_call_operand.vmem [shape: f32[1,32], index: 2, kind: input, shape index: {}]   ;;  %s648_s3 = inlined_call_operand.vmem [shape: f32[128,32], index: 3, kind: output, shape index: {}]  }
   0x1   :  { %s14_s13 = sshll.u32 %s470_s12, 4  ;;  %s446_s16 = scalar_lea.hbm %s645_s0, 2048  ;;  %s15_s13 = int_to_ptr.vmem [resolvable:$true] %s14_s13 }
   0x2   :  { %p447_p0 = scmp.ne.s32.totalorder %s645_s0, %s446_s16  ;;  %p450_p1 = scmp.lt.u32.totalorder %s446_s16, %s645_s0 }
   0x4   :  { %p452_p2 = pnand %p450_p1, %p447_p0 }
   0x6   :  { %455 = shalt.err (!%p452_p2)
}
   0x7   :  { %s456_s21 = scalar_lea.vmem %s15_s13, 2048  ;;  %p461_p4 = scmp.lt.s32.totalorder %s15_s13, %s15_s13 }
   0x8   :  { %p457_p3 = scmp.ne.s32.totalorder %s15_s13, %s456_s21  ;;  %p462_p5 = scmp.lt.s32.totalorder %s456_s21, %s456_s21 }
   0xa   :  { %p463_p6 = por %p462_p5, %p461_p4 }
   0xc   :  { %p464_p7 = pnand %p463_p6, %p457_p3 }
   0xe   :  { %467 = shalt.err (!%p464_p7)
}
   0xf   :  { %s471_s22 = smov 128   ;;  %s472_s23 = smov 8  }
  0x10   :  { %20 = dma.hbm_to_vmem [thread:$0]  %s645_s0, 2048, %s15_s13, [#allocation4], %s471_s22, %s471_s22, %s472_s23  }
  0x11   :  { %468 = dma.done.wait [#allocation4], 2048  }
  0x12   :  { %469 = vsyncadd [#allocation4], 4294965248  ;;  %vm32_vm0 = vcmask 261120   ;;  %v473_v0 = vmov 0.0   ;;  %vm83_vm1 = vcmask 130048   ;;  %v81_v1 = vld [vmem:[%s646_s1] sm:$0xff] }
  0x13   :  { %34 = vst.msk [vmem:[#allocation2 + $0x8] sm:$0xff] %vm32_vm0, %v473_v0  ;;  %33 = vst.msk [vmem:[#allocation2] sm:$0xff] %vm32_vm0, %v473_v0  ;;  %v82_v2 = vld [vmem:[%s646_s1 + $0x8] sm:$0xff]  ;;  %v65_v3 = vld [vmem:[#allocation3] sm:$0xff] }
  0x14   :  { %35 = vst.msk [vmem:[#allocation2 + $0x10] sm:$0xff] %vm32_vm0, %v473_v0  ;;  %36 = vst.msk [vmem:[#allocation2 + $0x18] sm:$0xff] %vm32_vm0, %v473_v0  ;;  %v436_v4 = vpack.c.bf16 %v82_v2, %v81_v1  ;;  %412 = vmatprep.mubr.msk.f32.mxu0 %vm83_vm1, %v65_v3  ;;  %v73_v5 = vld [vmem:[#allocation3 + $0x40] sm:$0xff]  ;;  %v66_v6 = vld [vmem:[#allocation3 + $0x8] sm:$0xff] }
  0x15   :  { %37 = vst.msk [vmem:[#allocation2 + $0x20] sm:$0xff] %vm32_vm0, %v473_v0  ;;  %38 = vst.msk [vmem:[#allocation2 + $0x28] sm:$0xff] %vm32_vm0, %v473_v0  ;;  %424 = vmatprep.mubr.msk.f32.mxu1 %vm83_vm1, %v73_v5  ;;  %v74_v7 = vld [vmem:[#allocation3 + $0x48] sm:$0xff]  ;;  %v67_v8 = vld [vmem:[#allocation3 + $0x10] sm:$0xff] }
  0x16   :  { %39 = vst.msk [vmem:[#allocation2 + $0x30] sm:$0xff] %vm32_vm0, %v473_v0  ;;  %40 = vst.msk [vmem:[#allocation2 + $0x38] sm:$0xff] %vm32_vm0, %v473_v0  ;;  %437 = vmatprep.subr.bf16.mxu0 %v436_v4  ;;  %440 = vmatprep.subr.bf16.mxu1 %v436_v4  ;;  %v75_v9 = vld [vmem:[#allocation3 + $0x50] sm:$0xff]  ;;  %v68_v10 = vld [vmem:[#allocation3 + $0x18] sm:$0xff] }
  0x17   :  { %41 = vst.msk [vmem:[#allocation2 + $0x40] sm:$0xff] %vm32_vm0, %v473_v0  ;;  %42 = vst.msk [vmem:[#allocation2 + $0x48] sm:$0xff] %vm32_vm0, %v473_v0  ;;  %439 = vmatpush3.bf16.msra.mxu0 %v436_v4  ;;  %441 = vmatpush3.bf16.msra.mxu1 %v436_v4  ;;  %v76_v11 = vld [vmem:[#allocation3 + $0x58] sm:$0xff]  ;;  %v69_v12 = vld [vmem:[#allocation3 + $0x20] sm:$0xff] }
  0x18   :  { %43 = vst.msk [vmem:[#allocation2 + $0x50] sm:$0xff] %vm32_vm0, %v473_v0  ;;  %44 = vst.msk [vmem:[#allocation2 + $0x58] sm:$0xff] %vm32_vm0, %v473_v0  ;;  %v77_v13 = vld [vmem:[#allocation3 + $0x60] sm:$0xff]  ;;  %v70_v14 = vld [vmem:[#allocation3 + $0x28] sm:$0xff] }
  0x19   :  { %45 = vst.msk [vmem:[#allocation2 + $0x60] sm:$0xff] %vm32_vm0, %v473_v0  ;;  %46 = vst.msk [vmem:[#allocation2 + $0x68] sm:$0xff] %vm32_vm0, %v473_v0  ;;  %v78_v15 = vld [vmem:[#allocation3 + $0x68] sm:$0xff]  ;;  %v71_v16 = vld [vmem:[#allocation3 + $0x30] sm:$0xff] }
  0x1a   :  { %47 = vst.msk [vmem:[#allocation2 + $0x70] sm:$0xff] %vm32_vm0, %v473_v0  ;;  %48 = vst.msk [vmem:[#allocation2 + $0x78] sm:$0xff] %vm32_vm0, %v473_v0  ;;  %413 = vmatmul.mubr.msk.f32.vlgmr.msra.gmra.mrb[0].mxu0 %vm83_vm1, %v66_v6  ;;  %425 = vmatmul.mubr.msk.f32.vlgmr.msra.gmra.mrb[0].mxu1 %vm83_vm1, %v74_v7  ;;  %v79_v17 = vld [vmem:[#allocation3 + $0x70] sm:$0xff]  ;;  %v72_v18 = vld [vmem:[#allocation3 + $0x38] sm:$0xff] }
  0x1b   :  { %415 = vmatprep.mubr.msk.f32.mxu0 %vm83_vm1, %v67_v8  ;;  %427 = vmatprep.mubr.msk.f32.mxu1 %vm83_vm1, %v75_v9  ;;  %v80_v19 = vld [vmem:[#allocation3 + $0x78] sm:$0xff]  ;;  %v50_v20 = vld [vmem:[#allocation2 + $0x8] sm:$0xff]  ;;  %v49_v22 = vld [vmem:[#allocation2] sm:$0xff] }
  0x1c   :  { %v52_v32 = vld [vmem:[#allocation2 + $0x18] sm:$0xff]  ;;  %v51_v34 = vld [vmem:[#allocation2 + $0x10] sm:$0xff]  ;;  %v54_v44 = vld [vmem:[#allocation2 + $0x28] sm:$0xff] }
  0x1d   :  { %v53_v46 = vld [vmem:[#allocation2 + $0x20] sm:$0xff]  ;;  %v56_v55 = vld [vmem:[#allocation2 + $0x38] sm:$0xff]  ;;  %v55_v61 = vld [vmem:[#allocation2 + $0x30] sm:$0xff] }
  0x1e   :  { %416 = vmatmul.mubr.msk.f32.gmra.mrb[2].mxu0 %vm83_vm1, %v68_v10  ;;  %428 = vmatmul.mubr.msk.f32.gmra.mrb[2].mxu1 %vm83_vm1, %v76_v11  ;;  %v58_v21 = vld [vmem:[#allocation2 + $0x48] sm:$0xff]  ;;  %v57_v23 = vld [vmem:[#allocation2 + $0x40] sm:$0xff] }
  0x1f   :  { %418 = vmatprep.mubr.msk.f32.mxu0 %vm83_vm1, %v69_v12  ;;  %430 = vmatprep.mubr.msk.f32.mxu1 %vm83_vm1, %v77_v13  ;;  %v60_v33 = vld [vmem:[#allocation2 + $0x58] sm:$0xff]  ;;  %v59_v35 = vld [vmem:[#allocation2 + $0x50] sm:$0xff]  ;;  %v553_v48 = vld [vmem:[%s647_s2] ss:$0 sm:$0xff] }
  0x20   :  { %v62_v45 = vld [vmem:[#allocation2 + $0x68] sm:$0xff]  ;;  %v61_v47 = vld [vmem:[#allocation2 + $0x60] sm:$0xff] }
  0x21   :  { %v64_v56 = vld [vmem:[#allocation2 + $0x78] sm:$0xff]  ;;  %v63_v2 = vld [vmem:[#allocation2 + $0x70] sm:$0xff] }
  0x22   :  { %419 = vmatmul.mubr.msk.f32.gmra.mrb[4].mxu0 %vm83_vm1, %v70_v14  ;;  %431 = vmatmul.mubr.msk.f32.gmra.mrb[4].mxu1 %vm83_vm1, %v78_v15 }
  0x23   :  { %421 = vmatprep.mubr.msk.f32.mxu0 %vm83_vm1, %v71_v16  ;;  %433 = vmatprep.mubr.msk.f32.mxu1 %vm83_vm1, %v79_v17 }
  0x26   :  { %422 = vmatmul.mubr.msk.f32.gmra.mrb[6].mxu0 %vm83_vm1, %v72_v18  ;;  %434 = vmatmul.mubr.msk.f32.gmra.mrb[6].mxu1 %vm83_vm1, %v80_v19 }
  0xed   :  { %v414_v24 = vpop.f32.mrb[0].mxu0  ;;  %v426_v25 = vpop.f32.mrb[0].mxu1 }
  0xee   :  { %v278_v26 = vadd.f32 %v414_v24, %v50_v20  ;;  %v286_v27 = vadd.f32 %v426_v25, %v58_v21  ;;  %v198_v28 = vpop.f32.mrb[1].mxu0  ;;  %v238_v29 = vpop.f32.mrb[1].mxu1 }
  0xef   :  { %v277_v30 = vadd.f32 %v198_v28, %v49_v22  ;;  %v285_v31 = vadd.f32 %v238_v29, %v57_v23 }
  0xf0   :  { %295 = vst.msk [vmem:[#allocation2 + $0x8] sm:$0xff] %vm32_vm0, %v278_v26  ;;  %303 = vst.msk [vmem:[#allocation2 + $0x48] sm:$0xff] %vm32_vm0, %v286_v27 }
  0xf1   :  { %294 = vst.msk [vmem:[#allocation2] sm:$0xff] %vm32_vm0, %v277_v30  ;;  %302 = vst.msk [vmem:[#allocation2 + $0x40] sm:$0xff] %vm32_vm0, %v285_v31  ;;  %v417_v36 = vpop.f32.mrb[2].mxu0  ;;  %v429_v37 = vpop.f32.mrb[2].mxu1 }
  0xf2   :  { %v280_v38 = vadd.f32 %v417_v36, %v52_v32  ;;  %v288_v39 = vadd.f32 %v429_v37, %v60_v33  ;;  %v208_v40 = vpop.f32.mrb[3].mxu0  ;;  %v248_v41 = vpop.f32.mrb[3].mxu1 }
  0xf3   :  { %v279_v42 = vadd.f32 %v208_v40, %v51_v34  ;;  %v287_v43 = vadd.f32 %v248_v41, %v59_v35 }
  0xf4   :  { %297 = vst.msk [vmem:[#allocation2 + $0x18] sm:$0xff] %vm32_vm0, %v280_v38  ;;  %305 = vst.msk [vmem:[#allocation2 + $0x58] sm:$0xff] %vm32_vm0, %v288_v39 }
  0xf5   :  { %296 = vst.msk [vmem:[#allocation2 + $0x10] sm:$0xff] %vm32_vm0, %v279_v42  ;;  %304 = vst.msk [vmem:[#allocation2 + $0x50] sm:$0xff] %vm32_vm0, %v287_v43  ;;  %v420_v49 = vpop.f32.mrb[4].mxu0  ;;  %v432_v50 = vpop.f32.mrb[4].mxu1 }
  0xf6   :  { %v282_v51 = vadd.f32 %v420_v49, %v54_v44  ;;  %v290_v52 = vadd.f32 %v432_v50, %v62_v45  ;;  %v218_v53 = vpop.f32.mrb[5].mxu0  ;;  %v258_v54 = vpop.f32.mrb[5].mxu1 }
  0xf7   :  { %v314_v57 = vld [vmem:[#allocation2 + $0x8] sm:$0xff]  ;;  %v281_v59 = vadd.f32 %v218_v53, %v53_v46  ;;  %v289_v60 = vadd.f32 %v258_v54, %v61_v47 }
  0xf8   :  { %v322_v58 = vld [vmem:[#allocation2 + $0x48] sm:$0xff]  ;;  %v337_v62 = vadd.f32 %v553_v48, %v314_v57  ;;  %v313_v0 = vld [vmem:[#allocation2] sm:$0xff]  ;;  %299 = vst.msk [vmem:[#allocation2 + $0x28] sm:$0xff] %vm32_vm0, %v282_v51  ;;  %307 = vst.msk [vmem:[#allocation2 + $0x68] sm:$0xff] %vm32_vm0, %v290_v52 }
  0xf9   :  { %v345_v63 = vadd.f32 %v553_v48, %v322_v58  ;;  %v321_v1 = vld [vmem:[#allocation2 + $0x40] sm:$0xff]  ;;  %v336_v3 = vadd.f32 %v553_v48, %v313_v0  ;;  %298 = vst.msk [vmem:[#allocation2 + $0x20] sm:$0xff] %vm32_vm0, %v281_v59  ;;  %306 = vst.msk [vmem:[#allocation2 + $0x60] sm:$0xff] %vm32_vm0, %v289_v60  ;;  %v423_v5 = vpop.f32.mrb[6].mxu0  ;;  %v435_v6 = vpop.f32.mrb[6].mxu1 }
  0xfa   :  { %v344_v4 = vadd.f32 %v553_v48, %v321_v1  ;;  %353 = vst.msk [vmem:[%s648_s3 + $0x8] sm:$0xff] %vm32_vm0, %v337_v62  ;;  %v284_v7 = vadd.f32 %v423_v5, %v56_v55  ;;  %v292_v8 = vadd.f32 %v435_v6, %v64_v56  ;;  %v228_v9 = vpop.f32.mrb[7].mxu0  ;;  %v268_v10 = vpop.f32.mrb[7].mxu1 }
  0xfb   :  { %361 = vst.msk [vmem:[%s648_s3 + $0x48] sm:$0xff] %vm32_vm0, %v345_v63  ;;  %352 = vst.msk [vmem:[%s648_s3] sm:$0xff] %vm32_vm0, %v336_v3  ;;  %v316_v11 = vld [vmem:[#allocation2 + $0x18] sm:$0xff]  ;;  %v283_v13 = vadd.f32 %v228_v9, %v55_v61  ;;  %v291_v14 = vadd.f32 %v268_v10, %v63_v2 }
  0xfc   :  { %360 = vst.msk [vmem:[%s648_s3 + $0x40] sm:$0xff] %vm32_vm0, %v344_v4  ;;  %v324_v12 = vld [vmem:[#allocation2 + $0x58] sm:$0xff]  ;;  %v339_v15 = vadd.f32 %v553_v48, %v316_v11  ;;  %v315_v17 = vld [vmem:[#allocation2 + $0x10] sm:$0xff]  ;;  %301 = vst.msk [vmem:[#allocation2 + $0x38] sm:$0xff] %vm32_vm0, %v284_v7 }
  0xfd   :  { %v347_v16 = vadd.f32 %v553_v48, %v324_v12  ;;  %v323_v18 = vld [vmem:[#allocation2 + $0x50] sm:$0xff]  ;;  %309 = vst.msk [vmem:[#allocation2 + $0x78] sm:$0xff] %vm32_vm0, %v292_v8  ;;  %v338_v19 = vadd.f32 %v553_v48, %v315_v17  ;;  %300 = vst.msk [vmem:[#allocation2 + $0x30] sm:$0xff] %vm32_vm0, %v283_v13 }
  0xfe   :  { %v346_v20 = vadd.f32 %v553_v48, %v323_v18  ;;  %308 = vst.msk [vmem:[#allocation2 + $0x70] sm:$0xff] %vm32_vm0, %v291_v14  ;;  %355 = vst.msk [vmem:[%s648_s3 + $0x18] sm:$0xff] %vm32_vm0, %v339_v15 }
  0xff   :  { %363 = vst.msk [vmem:[%s648_s3 + $0x58] sm:$0xff] %vm32_vm0, %v347_v16  ;;  %354 = vst.msk [vmem:[%s648_s3 + $0x10] sm:$0xff] %vm32_vm0, %v338_v19  ;;  %v318_v21 = vld [vmem:[#allocation2 + $0x28] sm:$0xff] }
 0x100   :  { %362 = vst.msk [vmem:[%s648_s3 + $0x50] sm:$0xff] %vm32_vm0, %v346_v20  ;;  %v326_v22 = vld [vmem:[#allocation2 + $0x68] sm:$0xff]  ;;  %v341_v23 = vadd.f32 %v553_v48, %v318_v21  ;;  %v317_v25 = vld [vmem:[#allocation2 + $0x20] sm:$0xff] }
 0x101   :  { %v349_v24 = vadd.f32 %v553_v48, %v326_v22  ;;  %v325_v26 = vld [vmem:[#allocation2 + $0x60] sm:$0xff]  ;;  %v340_v27 = vadd.f32 %v553_v48, %v317_v25 }
 0x102   :  { %v348_v28 = vadd.f32 %v553_v48, %v325_v26  ;;  %357 = vst.msk [vmem:[%s648_s3 + $0x28] sm:$0xff] %vm32_vm0, %v341_v23 }
 0x103   :  { %365 = vst.msk [vmem:[%s648_s3 + $0x68] sm:$0xff] %vm32_vm0, %v349_v24  ;;  %356 = vst.msk [vmem:[%s648_s3 + $0x20] sm:$0xff] %vm32_vm0, %v340_v27  ;;  %v320_v29 = vld [vmem:[#allocation2 + $0x38] sm:$0xff] }
 0x104   :  { %364 = vst.msk [vmem:[%s648_s3 + $0x60] sm:$0xff] %vm32_vm0, %v348_v28  ;;  %v328_v30 = vld [vmem:[#allocation2 + $0x78] sm:$0xff]  ;;  %v343_v31 = vadd.f32 %v553_v48, %v320_v29  ;;  %v319_v33 = vld [vmem:[#allocation2 + $0x30] sm:$0xff] }
 0x105   :  { %v351_v32 = vadd.f32 %v553_v48, %v328_v30  ;;  %v327_v34 = vld [vmem:[#allocation2 + $0x70] sm:$0xff]  ;;  %v342_v35 = vadd.f32 %v553_v48, %v319_v33 }
 0x106   :  { %v350_v36 = vadd.f32 %v553_v48, %v327_v34  ;;  %359 = vst.msk [vmem:[%s648_s3 + $0x38] sm:$0xff] %vm32_vm0, %v343_v31 }
 0x107   :  { %367 = vst.msk [vmem:[%s648_s3 + $0x78] sm:$0xff] %vm32_vm0, %v351_v32  ;;  %358 = vst.msk [vmem:[%s648_s3 + $0x30] sm:$0xff] %vm32_vm0, %v342_v35 }
 0x108   :  { %366 = vst.msk [vmem:[%s648_s3 + $0x70] sm:$0xff] %vm32_vm0, %v350_v36 }
 0x109   :  { %372 = vsyncpa [#allocation4], 1 }

// kernel: spatial_incep_attention.7
= control target key start
LH: loop header
LB: loop body
LE: loop exit
PB: predicated region body
PF: predicated region fallthrough
CT: control target
= control target key end

     0   :  { %vm26_vm0 = vcmask 261120   ;;  %vm256_vm1 = vcmask 523264   ;;  %s468_s0 = inlined_call_operand.vmem [shape: f32[48,32], index: 0, kind: input, shape index: {}]   ;;  %s469_s3 = inlined_call_operand.vmem [shape: f32[32,64], index: 3, kind: input, shape index: {}]   ;;  %s470_s1 = inlined_call_operand.vmem [shape: f32[1,32], index: 1, kind: input, shape index: {}]   ;;  %s471_s2 = inlined_call_operand.vmem [shape: f32[1,32], index: 2, kind: input, shape index: {}]   ;;  %s472_s4 = inlined_call_operand.vmem [shape: f32[1,64], index: 4, kind: input, shape index: {}]   ;;  %s473_s5 = inlined_call_operand.vmem [shape: f32[48,64], index: 5, kind: output, shape index: {}]  }
   0x1   :  { %v22_v0 = vld [vmem:[%s468_s0 + $0x10] sm:$0xff]  ;;  %v23_v1 = vld [vmem:[%s468_s0 + $0x18] sm:$0xff]  ;;  %v20_v2 = vld [vmem:[%s468_s0] sm:$0xff] }
   0x2   :  { %v33_v3 = vsel %vm26_vm0, %v22_v0, 0.0  ;;  %v27_v4 = vsel %vm26_vm0, %v20_v2, 0.0  ;;  %v24_v5 = vld [vmem:[%s468_s0 + $0x20] sm:$0xff]  ;;  %v36_v6 = vsel %vm26_vm0, %v23_v1, 0.0  ;;  %v21_v8 = vld [vmem:[%s468_s0 + $0x8] sm:$0xff]  ;;  %v134_v45 = vld [vmem:[%s469_s3 + $0x10] sm:$0xff] }
   0x3   :  { %34 = vadd.xlane.f32.xlu0 %v33_v3  ;;  %28 = vadd.xlane.f32.xlu1 %v27_v4  ;;  %v39_v7 = vsel %vm26_vm0, %v24_v5, 0.0  ;;  %v25_v9 = vld [vmem:[%s468_s0 + $0x28] sm:$0xff]  ;;  %v30_v10 = vsel %vm26_vm0, %v21_v8, 0.0  ;;  %v132_v42 = vld [vmem:[%s469_s3] sm:$0xff]  ;;  %v135_v46 = vld [vmem:[%s469_s3 + $0x18] sm:$0xff] }
   0x4   :  { %v42_v11 = vsel %vm26_vm0, %v25_v9, 0.0  ;;  %v133_v43 = vld [vmem:[%s469_s3 + $0x8] sm:$0xff]  ;;  %v307_v47 = vpack.c.bf16 %v135_v46, %v134_v45  ;;  %v267_v3 = vld [vmem:[%s470_s1] ss:$0 sm:$0xff] }
   0x5   :  { %v303_v44 = vpack.c.bf16 %v133_v43, %v132_v42 }
   0x7   :  { %37 = vadd.xlane.f32.xlu0 %v36_v6  ;;  %40 = vadd.xlane.f32.xlu1 %v39_v7 }
   0x8   :  { %311 = vmatprep.subr.bf16.mxu1 %v303_v44  ;;  %304 = vmatprep.subr.bf16.mxu0 %v303_v44 }
   0x9   :  { %313 = vmatpush3.bf16.msra.mxu1 %v303_v44  ;;  %306 = vmatpush3.bf16.msra.mxu0 %v303_v44 }
   0xa   :  { %312 = vmatprep.subr.bf16.mxu1 %v307_v47  ;;  %308 = vmatprep.subr.bf16.mxu0 %v307_v47 }
   0xb   :  { %31 = vadd.xlane.f32.xlu0 %v30_v10  ;;  %43 = vadd.xlane.f32.xlu1 %v42_v11 }
   0xd   :  { %314 = vmatpush3.bf16.msra.mxu1 %v307_v47  ;;  %310 = vmatpush3.bf16.msra.mxu0 %v307_v47 }
  0x90   :  { %v35_v12 = vpop.xlane.xlu0 %34  ;;  %v29_v13 = vpop.xlane.xlu1 %28 }
  0x91   :  { %v48_v14 = vmul.f32 0.03125, %v35_v12  ;;  %v46_v15 = vmul.f32 0.03125, %v29_v13 }
  0x93   :  { %v381_v16 = vsub.f32 %v22_v0, %v48_v14  ;;  %v383_v17 = vsub.f32 %v20_v2, %v46_v15 }
  0x94   :  { %v38_v18 = vpop.xlane.xlu0 %37  ;;  %v41_v19 = vpop.xlane.xlu1 %40 }
  0x95   :  { %v49_v20 = vmul.f32 0.03125, %v38_v18  ;;  %v60_v21 = vmul.f32 %v381_v16, %v381_v16  ;;  %v50_v22 = vmul.f32 0.03125, %v41_v19  ;;  %v58_v23 = vmul.f32 %v383_v17, %v383_v17 }
  0x97   :  { %v389_v24 = vsub.f32 %v23_v1, %v49_v20  ;;  %v70_v25 = vsel %vm26_vm0, %v60_v21, 0.0  ;;  %v392_v26 = vsub.f32 %v24_v5, %v50_v22  ;;  %v64_v28 = vsel %vm26_vm0, %v58_v23, 0.0  ;;  %v268_v5 = vld [vmem:[%s471_s2] ss:$0 sm:$0xff] }
  0x98   :  { %71 = vadd.xlane.f32.xlu0 %v70_v25  ;;  %v32_v27 = vpop.xlane.xlu0 %31  ;;  %v44_v29 = vpop.xlane.xlu1 %43 }
  0x99   :  { %v47_v30 = vmul.f32 0.03125, %v32_v27  ;;  %v61_v31 = vmul.f32 %v389_v24, %v389_v24  ;;  %v51_v32 = vmul.f32 0.03125, %v44_v29  ;;  %v62_v33 = vmul.f32 %v392_v26, %v392_v26 }
  0x9b   :  { %v399_v34 = vsub.f32 %v21_v8, %v47_v30  ;;  %v73_v35 = vsel %vm26_vm0, %v61_v31, 0.0  ;;  %v402_v36 = vsub.f32 %v25_v9, %v51_v32  ;;  %v76_v38 = vsel %vm26_vm0, %v62_v33, 0.0 }
  0x9c   :  { %74 = vadd.xlane.f32.xlu1 %v73_v35  ;;  %65 = vadd.xlane.f32.xlu0 %v64_v28 }
  0x9d   :  { %v59_v37 = vmul.f32 %v399_v34, %v399_v34  ;;  %v63_v39 = vmul.f32 %v402_v36, %v402_v36 }
  0x9f   :  { %v67_v40 = vsel %vm26_vm0, %v59_v37, 0.0  ;;  %v79_v41 = vsel %vm26_vm0, %v63_v39, 0.0 }
  0xa0   :  { %68 = vadd.xlane.f32.xlu0 %v67_v40  ;;  %77 = vadd.xlane.f32.xlu1 %v76_v38 }
  0xa4   :  { %80 = vadd.xlane.f32.xlu1 %v79_v41 }
 0x125   :  { %v72_v48 = vpop.xlane.xlu0 %71 }
 0x126   :  { %v84_v49 = vmul.f32 0.03125, %v72_v48 }
 0x128   :  { %v90_v50 = vadd.f32 1e-05, %v84_v49 }
 0x129   :  { %v66_v51 = vpop.xlane.xlu0 %65  ;;  %v75_v52 = vpop.xlane.xlu1 %74 }
 0x12a   :  { %315 = vrsqrt.f32 %v90_v50  ;;  %v82_v53 = vmul.f32 0.03125, %v66_v51  ;;  %v85_v54 = vmul.f32 0.03125, %v75_v52 }
 0x12c   :  { %v88_v55 = vadd.f32 1e-05, %v82_v53  ;;  %v91_v56 = vadd.f32 1e-05, %v85_v54 }
 0x12d   :  { %v69_v57 = vpop.xlane.xlu0 %68  ;;  %v78_v58 = vpop.xlane.xlu1 %77 }
 0x12e   :  { %317 = vrsqrt.f32 %v88_v55  ;;  %v83_v59 = vmul.f32 0.03125, %v69_v57  ;;  %v86_v60 = vmul.f32 0.03125, %v78_v58 }
 0x12f   :  { %319 = vrsqrt.f32 %v91_v56 }
 0x130   :  { %v89_v61 = vadd.f32 1e-05, %v83_v59  ;;  %v92_v62 = vadd.f32 1e-05, %v86_v60 }
 0x131   :  { %v81_v63 = vpop.xlane.xlu1 %80 }
 0x132   :  { %321 = vrsqrt.f32 %v89_v61  ;;  %v87_v0 = vmul.f32 0.03125, %v81_v63 }
 0x133   :  { %323 = vrsqrt.f32 %v92_v62 }
 0x134   :  { %v316_v1 = vpop.eup %315  ;;  %v93_v2 = vadd.f32 1e-05, %v87_v0 }
 0x135   :  { %v102_v4 = vmul.f32 %v316_v1, %v381_v16 }
 0x136   :  { %325 = vrsqrt.f32 %v93_v2 }
 0x137   :  { %v115_v6 = vmul.f32 %v267_v3, %v102_v4 }
 0x138   :  { %v318_v7 = vpop.eup %317 }
 0x139   :  { %v320_v8 = vpop.eup %319  ;;  %v128_v9 = vadd.f32 %v268_v5, %v115_v6  ;;  %v100_v10 = vmul.f32 %v318_v7, %v383_v17 }
 0x13a   :  { %v103_v11 = vmul.f32 %v320_v8, %v389_v24 }
 0x13b   :  { %297 = vmatprep.mubr.msk.f32.mxu1 %vm26_vm0, %v128_v9  ;;  %v113_v12 = vmul.f32 %v267_v3, %v100_v10 }
 0x13c   :  { %v322_v13 = vpop.eup %321  ;;  %v116_v14 = vmul.f32 %v267_v3, %v103_v11 }
 0x13d   :  { %v324_v15 = vpop.eup %323  ;;  %v126_v16 = vadd.f32 %v268_v5, %v113_v12  ;;  %v101_v18 = vmul.f32 %v322_v13, %v399_v34 }
 0x13e   :  { %v129_v19 = vadd.f32 %v268_v5, %v116_v14  ;;  %v104_v20 = vmul.f32 %v324_v15, %v392_v26  ;;  %v269_v26 = vld [vmem:[%s472_s4] ss:$0 sm:$0xff] }
 0x13f   :  { %294 = vmatprep.mubr.msk.f32.mxu0 %vm26_vm0, %v126_v16  ;;  %v114_v21 = vmul.f32 %v267_v3, %v101_v18 }
 0x140   :  { %v326_v22 = vpop.eup %325  ;;  %298 = vmatmul.mubr.msk.f32.vlgmr.msra.gmra.mrb[0].mxu1 %vm26_vm0, %v129_v19  ;;  %v117_v17 = vmul.f32 %v267_v3, %v104_v20 }
 0x141   :  { %v127_v23 = vadd.f32 %v268_v5, %v114_v21  ;;  %v105_v24 = vmul.f32 %v326_v22, %v402_v36 }
 0x142   :  { %v130_v25 = vadd.f32 %v268_v5, %v117_v17 }
 0x143   :  { %295 = vmatmul.mubr.msk.f32.vlgmr.msra.gmra.mrb[0].mxu0 %vm26_vm0, %v127_v23  ;;  %v118_v27 = vmul.f32 %v267_v3, %v105_v24 }
 0x144   :  { %300 = vmatprep.mubr.msk.f32.mxu1 %vm26_vm0, %v130_v25 }
 0x145   :  { %v131_v28 = vadd.f32 %v268_v5, %v118_v27 }
 0x147   :  { %301 = vmatmul.mubr.msk.f32.gmra.mrb[2].mxu1 %vm26_vm0, %v131_v28 }
 0x213   :  { %v299_v29 = vpop.f32.mrb[0].mxu1 }
 0x214   :  { %v243_v30 = vadd.f32 %v299_v29, %v269_v26  ;;  %v237_v31 = vpop.f32.mrb[1].mxu1 }
 0x215   :  { %v238_v32 = vadd.f32 %v269_v26, %v237_v31 }
 0x216   :  { %260 = vst.msk [vmem:[%s473_s5 + $0x18] sm:$0xff] %vm256_vm1, %v243_v30  ;;  %v296_v33 = vpop.f32.mrb[0].mxu0 }
 0x217   :  { %259 = vst.msk [vmem:[%s473_s5 + $0x10] sm:$0xff] %vm256_vm1, %v238_v32  ;;  %v233_v34 = vadd.f32 %v296_v33, %v269_v26  ;;  %v227_v35 = vpop.f32.mrb[1].mxu0 }
 0x218   :  { %v228_v36 = vadd.f32 %v269_v26, %v227_v35 }
 0x219   :  { %258 = vst.msk [vmem:[%s473_s5 + $0x8] sm:$0xff] %vm256_vm1, %v233_v34 }
 0x21a   :  { %257 = vst.msk [vmem:[%s473_s5] sm:$0xff] %vm256_vm1, %v228_v36  ;;  %v302_v37 = vpop.f32.mrb[2].mxu1 }
 0x21b   :  { %v253_v38 = vadd.f32 %v302_v37, %v269_v26  ;;  %v247_v39 = vpop.f32.mrb[3].mxu1 }
 0x21c   :  { %v248_v40 = vadd.f32 %v269_v26, %v247_v39 }
 0x21d   :  { %262 = vst.msk [vmem:[%s473_s5 + $0x28] sm:$0xff] %vm256_vm1, %v253_v38 }
 0x21e   :  { %261 = vst.msk [vmem:[%s473_s5 + $0x20] sm:$0xff] %vm256_vm1, %v248_v40 }

// kernel: spatial_incep_attention.6
= control target key start
LH: loop header
LB: loop body
LE: loop exit
PB: predicated region body
PF: predicated region fallthrough
CT: control target
= control target key end

     0   :  { %s1436_s18 = smov 0   ;;  %s2067_s0 = inlined_call_operand.vmem [shape: f32[512,32], index: 0, kind: input, shape index: {}]   ;;  %s2068_s1 = inlined_call_operand.vmem [shape: f32[1,32], index: 1, kind: input, shape index: {}]   ;;  %s2069_s2 = inlined_call_operand.vmem [shape: f32[1,32], index: 2, kind: input, shape index: {}]   ;;  %s2070_s3 = inlined_call_operand.vmem [shape: f32[32,32], index: 3, kind: input, shape index: {}]   ;;  %s2071_s4 = inlined_call_operand.vmem [shape: f32[1,32], index: 4, kind: input, shape index: {}]   ;;  %s2072_s5 = inlined_call_operand.vmem [shape: f32[512,32], index: 5, kind: output, shape index: {}]  }
   0x1 LB: > { %s1176_s19 = sadd.s32 4294967295, %s1404_s18   ;;  %p1180_p0 = scmp.ge.s32.totalorder %s1404_s18, 1  ;;  %s1404_s18 = sphi %s1436_s18, %s15_s18  }
   0x2   : > { %p188_p1 = scmp.lt.s32.totalorder %s1404_s18, 3 }
   0x4   : > { %p189_p2 = pnand %p1180_p0, %p188_p1 }
   0x5   : > { %s1181_s20 = sshll.u32 (!%p189_p2), %s1176_s19, 5  ;;  %vm260_vm0 = vcmask (!%p189_p2), 261120  }
   0x6   : > { %192 = sbr.rel (%p189_p2) target bundleno = 610 (0x262), region = 40  ;;  %p217_p3 = scmp.lt.s32.totalorder (!%p189_p2), %s1181_s20, 63 }
   0xd   : > { %s2074_s20 = smov (!%p217_p3, %s1181_s20), 63 }
   0xe   : > { %s1182_s21 = sshll.u32 %s2074_s20, 3 }
   0xf   : > { %s1452_s24 = scalar_lea.vmem %s2067_s0, %s1182_s21  ;;  %s1966_s16 = scalar_lea.vmem %s2072_s5, %s1182_s21 }
  0x10   : > { %v1455_v0 = vld [vmem:[%s1452_s24] sm:$0xff]  ;;  %v1458_v1 = vld [vmem:[%s1452_s24 + $0x8] sm:$0xff]  ;;  %v1475_v8 = vld [vmem:[%s1452_s24 + $0x10] sm:$0xff] }
  0x11   : > { %v1461_v2 = vld [vmem:[%s1452_s24 + $0x80] sm:$0xff]  ;;  %v261_v3 = vsel %vm260_vm0, %v1455_v0, 0.0  ;;  %v264_v4 = vsel %vm260_vm0, %v1458_v1, 0.0  ;;  %v1468_v5 = vld [vmem:[%s1452_s24 + $0x88] sm:$0xff]  ;;  %v1478_v9 = vld [vmem:[%s1452_s24 + $0x90] sm:$0xff]  ;;  %v267_v10 = vsel %vm260_vm0, %v1475_v8, 0.0 }
  0x12   : > { %262 = vadd.xlane.f32.xlu0 %v261_v3  ;;  %265 = vadd.xlane.f32.xlu1 %v264_v4  ;;  %v309_v6 = vsel %vm260_vm0, %v1461_v2, 0.0  ;;  %v312_v7 = vsel %vm260_vm0, %v1468_v5, 0.0  ;;  %v315_v11 = vsel %vm260_vm0, %v1478_v9, 0.0  ;;  %v1485_v12 = vld [vmem:[%s1452_s24 + $0x18] sm:$0xff]  ;;  %v1495_v16 = vld [vmem:[%s1452_s24 + $0x20] sm:$0xff]  ;;  %v1505_v20 = vld [vmem:[%s1452_s24 + $0x28] sm:$0xff] }
  0x13   : > { %v1488_v13 = vld [vmem:[%s1452_s24 + $0x98] sm:$0xff]  ;;  %v270_v14 = vsel %vm260_vm0, %v1485_v12, 0.0  ;;  %v1498_v17 = vld [vmem:[%s1452_s24 + $0xa0] sm:$0xff]  ;;  %v273_v18 = vsel %vm260_vm0, %v1495_v16, 0.0  ;;  %v1508_v21 = vld [vmem:[%s1452_s24 + $0xa8] sm:$0xff]  ;;  %v276_v22 = vsel %vm260_vm0, %v1505_v20, 0.0 }
  0x14   : > { %v318_v15 = vsel %vm260_vm0, %v1488_v13, 0.0  ;;  %v321_v19 = vsel %vm260_vm0, %v1498_v17, 0.0  ;;  %v324_v23 = vsel %vm260_vm0, %v1508_v21, 0.0  ;;  %v1515_v24 = vld [vmem:[%s1452_s24 + $0x30] sm:$0xff]  ;;  %v1525_v28 = vld [vmem:[%s1452_s24 + $0x38] sm:$0xff]  ;;  %v1535_v32 = vld [vmem:[%s1452_s24 + $0x40] sm:$0xff] }
  0x15   : > { %v1518_v25 = vld [vmem:[%s1452_s24 + $0xb0] sm:$0xff]  ;;  %v279_v26 = vsel %vm260_vm0, %v1515_v24, 0.0  ;;  %v1528_v29 = vld [vmem:[%s1452_s24 + $0xb8] sm:$0xff]  ;;  %v282_v30 = vsel %vm260_vm0, %v1525_v28, 0.0  ;;  %v1538_v33 = vld [vmem:[%s1452_s24 + $0xc0] sm:$0xff]  ;;  %v285_v34 = vsel %vm260_vm0, %v1535_v32, 0.0 }
  0x16   : > { %310 = vadd.xlane.f32.xlu0 %v309_v6  ;;  %313 = vadd.xlane.f32.xlu1 %v312_v7  ;;  %v327_v27 = vsel %vm260_vm0, %v1518_v25, 0.0  ;;  %v330_v31 = vsel %vm260_vm0, %v1528_v29, 0.0  ;;  %v333_v35 = vsel %vm260_vm0, %v1538_v33, 0.0  ;;  %v1545_v36 = vld [vmem:[%s1452_s24 + $0x48] sm:$0xff]  ;;  %v1555_v40 = vld [vmem:[%s1452_s24 + $0x50] sm:$0xff]  ;;  %v1565_v44 = vld [vmem:[%s1452_s24 + $0x58] sm:$0xff] }
  0x17   : > { %v1548_v37 = vld [vmem:[%s1452_s24 + $0xc8] sm:$0xff]  ;;  %v288_v38 = vsel %vm260_vm0, %v1545_v36, 0.0  ;;  %v1558_v41 = vld [vmem:[%s1452_s24 + $0xd0] sm:$0xff]  ;;  %v291_v42 = vsel %vm260_vm0, %v1555_v40, 0.0  ;;  %v1568_v45 = vld [vmem:[%s1452_s24 + $0xd8] sm:$0xff]  ;;  %v294_v46 = vsel %vm260_vm0, %v1565_v44, 0.0 }
  0x18   : > { %v336_v39 = vsel %vm260_vm0, %v1548_v37, 0.0  ;;  %v339_v43 = vsel %vm260_vm0, %v1558_v41, 0.0  ;;  %v342_v47 = vsel %vm260_vm0, %v1568_v45, 0.0  ;;  %v1575_v48 = vld [vmem:[%s1452_s24 + $0x60] sm:$0xff]  ;;  %v1585_v52 = vld [vmem:[%s1452_s24 + $0x68] sm:$0xff]  ;;  %v1595_v56 = vld [vmem:[%s1452_s24 + $0x70] sm:$0xff] }
  0x19   : > { %v1578_v49 = vld [vmem:[%s1452_s24 + $0xe0] sm:$0xff]  ;;  %v297_v50 = vsel %vm260_vm0, %v1575_v48, 0.0  ;;  %v1588_v53 = vld [vmem:[%s1452_s24 + $0xe8] sm:$0xff]  ;;  %v300_v54 = vsel %vm260_vm0, %v1585_v52, 0.0  ;;  %v1598_v57 = vld [vmem:[%s1452_s24 + $0xf0] sm:$0xff]  ;;  %v303_v58 = vsel %vm260_vm0, %v1595_v56, 0.0 }
  0x1a   : > { %268 = vadd.xlane.f32.xlu0 %v267_v10  ;;  %316 = vadd.xlane.f32.xlu1 %v315_v11  ;;  %v345_v51 = vsel %vm260_vm0, %v1578_v49, 0.0  ;;  %v348_v55 = vsel %vm260_vm0, %v1588_v53, 0.0  ;;  %v351_v59 = vsel %vm260_vm0, %v1598_v57, 0.0  ;;  %v1605_v60 = vld [vmem:[%s1452_s24 + $0x78] sm:$0xff] }
  0x1b   : > { %v1608_v61 = vld [vmem:[%s1452_s24 + $0xf8] sm:$0xff]  ;;  %v306_v62 = vsel %vm260_vm0, %v1605_v60, 0.0 }
  0x1c   : > { %v354_v63 = vsel %vm260_vm0, %v1608_v61, 0.0 }
  0x1e   : > { %271 = vadd.xlane.f32.xlu0 %v270_v14  ;;  %319 = vadd.xlane.f32.xlu1 %v318_v15 }
  0x22   : > { %274 = vadd.xlane.f32.xlu0 %v273_v18  ;;  %322 = vadd.xlane.f32.xlu1 %v321_v19 }
  0x26   : > { %277 = vadd.xlane.f32.xlu0 %v276_v22  ;;  %325 = vadd.xlane.f32.xlu1 %v324_v23 }
  0x2a   : > { %280 = vadd.xlane.f32.xlu0 %v279_v26  ;;  %328 = vadd.xlane.f32.xlu1 %v327_v27 }
  0x2e   : > { %283 = vadd.xlane.f32.xlu0 %v282_v30  ;;  %331 = vadd.xlane.f32.xlu1 %v330_v31 }
  0x32   : > { %286 = vadd.xlane.f32.xlu0 %v285_v34  ;;  %334 = vadd.xlane.f32.xlu1 %v333_v35 }
  0x36   : > { %289 = vadd.xlane.f32.xlu0 %v288_v38  ;;  %337 = vadd.xlane.f32.xlu1 %v336_v39 }
  0x3a   : > { %292 = vadd.xlane.f32.xlu0 %v291_v42  ;;  %340 = vadd.xlane.f32.xlu1 %v339_v43 }
  0x3e   : > { %295 = vadd.xlane.f32.xlu0 %v294_v46  ;;  %343 = vadd.xlane.f32.xlu1 %v342_v47 }
  0x42   : > { %298 = vadd.xlane.f32.xlu0 %v297_v50  ;;  %346 = vadd.xlane.f32.xlu1 %v345_v51 }
  0x46   : > { %301 = vadd.xlane.f32.xlu0 %v300_v54  ;;  %349 = vadd.xlane.f32.xlu1 %v348_v55 }
  0x4a   : > { %304 = vadd.xlane.f32.xlu0 %v303_v58  ;;  %352 = vadd.xlane.f32.xlu1 %v351_v59 }
  0x4e   : > { %307 = vadd.xlane.f32.xlu0 %v306_v62  ;;  %355 = vadd.xlane.f32.xlu1 %v354_v63 }
  0x9f   : > { %v263_v3 = vpop.xlane.xlu0 %262  ;;  %v266_v4 = vpop.xlane.xlu1 %265 }
  0xa0   : > { %v358_v6 = vmul.f32 0.03125, %v263_v3  ;;  %v359_v7 = vmul.f32 0.03125, %v266_v4 }
  0xa2   : > { %v1615_v10 = vsub.f32 %v1455_v0, %v358_v6  ;;  %v1618_v11 = vsub.f32 %v1458_v1, %v359_v7 }
  0xa3   : > { %v311_v14 = vpop.xlane.xlu0 %310  ;;  %v314_v15 = vpop.xlane.xlu1 %313 }
  0xa4   : > { %v374_v18 = vmul.f32 0.03125, %v311_v14  ;;  %v375_v19 = vmul.f32 0.03125, %v314_v15  ;;  %v422_v22 = vmul.f32 %v1615_v10, %v1615_v10  ;;  %v423_v23 = vmul.f32 %v1618_v11, %v1618_v11 }
  0xa6   : > { %v1625_v26 = vsub.f32 %v1461_v2, %v374_v18  ;;  %v1628_v27 = vsub.f32 %v1468_v5, %v375_v19  ;;  %v454_v0 = vsel %vm260_vm0, %v422_v22, 0.0  ;;  %v457_v31 = vsel %vm260_vm0, %v423_v23, 0.0 }
  0xa7   : > { %455 = vadd.xlane.f32.xlu0 %v454_v0  ;;  %v269_v1 = vpop.xlane.xlu0 %268  ;;  %v317_v30 = vpop.xlane.xlu1 %316 }
  0xa8   : > { %v360_v34 = vmul.f32 0.03125, %v269_v1  ;;  %v376_v35 = vmul.f32 0.03125, %v317_v30  ;;  %v438_v38 = vmul.f32 %v1625_v26, %v1625_v26  ;;  %v439_v39 = vmul.f32 %v1628_v27, %v1628_v27 }
  0xaa   : > { %v1637_v2 = vsub.f32 %v1475_v8, %v360_v34  ;;  %v1640_v5 = vsub.f32 %v1478_v9, %v376_v35  ;;  %v502_v42 = vsel %vm260_vm0, %v438_v38, 0.0  ;;  %v505_v47 = vsel %vm260_vm0, %v439_v39, 0.0 }
  0xab   : > { %458 = vadd.xlane.f32.xlu0 %v457_v31  ;;  %503 = vadd.xlane.f32.xlu1 %v502_v42  ;;  %v272_v43 = vpop.xlane.xlu0 %271  ;;  %v320_v46 = vpop.xlane.xlu1 %319 }
  0xac   : > { %v361_v50 = vmul.f32 0.03125, %v272_v43  ;;  %v377_v51 = vmul.f32 0.03125, %v320_v46  ;;  %v424_v54 = vmul.f32 %v1637_v2, %v1637_v2  ;;  %v440_v8 = vmul.f32 %v1640_v5, %v1640_v5 }
  0xae   : > { %v1649_v55 = vsub.f32 %v1485_v12, %v361_v50  ;;  %v1652_v9 = vsub.f32 %v1488_v13, %v377_v51  ;;  %v460_v58 = vsel %vm260_vm0, %v424_v54, 0.0  ;;  %v508_v63 = vsel %vm260_vm0, %v440_v8, 0.0 }
  0xaf   : > { %506 = vadd.xlane.f32.xlu1 %v505_v47  ;;  %461 = vadd.xlane.f32.xlu0 %v460_v58  ;;  %v275_v59 = vpop.xlane.xlu0 %274  ;;  %v323_v62 = vpop.xlane.xlu1 %322 }
  0xb0   : > { %v362_v3 = vmul.f32 0.03125, %v275_v59  ;;  %v378_v4 = vmul.f32 0.03125, %v323_v62  ;;  %v425_v6 = vmul.f32 %v1649_v55, %v1649_v55  ;;  %v441_v12 = vmul.f32 %v1652_v9, %v1652_v9 }
  0xb2   : > { %v1661_v7 = vsub.f32 %v1495_v16, %v362_v3  ;;  %v1664_v13 = vsub.f32 %v1498_v17, %v378_v4  ;;  %v463_v14 = vsel %vm260_vm0, %v425_v6, 0.0  ;;  %v511_v19 = vsel %vm260_vm0, %v441_v12, 0.0 }
  0xb3   : > { %509 = vadd.xlane.f32.xlu1 %v508_v63  ;;  %464 = vadd.xlane.f32.xlu0 %v463_v14  ;;  %v278_v15 = vpop.xlane.xlu0 %277  ;;  %v326_v18 = vpop.xlane.xlu1 %325 }
  0xb4   : > { %v363_v22 = vmul.f32 0.03125, %v278_v15  ;;  %v379_v23 = vmul.f32 0.03125, %v326_v18  ;;  %v426_v0 = vmul.f32 %v1661_v7, %v1661_v7  ;;  %v442_v16 = vmul.f32 %v1664_v13, %v1664_v13 }
  0xb6   : > { %v1673_v1 = vsub.f32 %v1505_v20, %v363_v22  ;;  %v1676_v17 = vsub.f32 %v1508_v21, %v379_v23  ;;  %v466_v30 = vsel %vm260_vm0, %v426_v0, 0.0  ;;  %v514_v35 = vsel %vm260_vm0, %v442_v16, 0.0 }
  0xb7   : > { %512 = vadd.xlane.f32.xlu1 %v511_v19  ;;  %467 = vadd.xlane.f32.xlu0 %v466_v30  ;;  %v281_v31 = vpop.xlane.xlu0 %280  ;;  %v329_v34 = vpop.xlane.xlu1 %328 }
  0xb8   : > { %v364_v38 = vmul.f32 0.03125, %v281_v31  ;;  %v380_v39 = vmul.f32 0.03125, %v329_v34  ;;  %v427_v42 = vmul.f32 %v1673_v1, %v1673_v1  ;;  %v443_v20 = vmul.f32 %v1676_v17, %v1676_v17  ;;  %v757_v31 = vld [vmem:[%s2070_s3 + $0x8] sm:$0xff] }
  0xba   : > { %v1685_v43 = vsub.f32 %v1515_v24, %v364_v38  ;;  %v1688_v21 = vsub.f32 %v1518_v25, %v380_v39  ;;  %v469_v46 = vsel %vm260_vm0, %v427_v42, 0.0  ;;  %v517_v51 = vsel %vm260_vm0, %v443_v20, 0.0 }
  0xbb   : > { %515 = vadd.xlane.f32.xlu1 %v514_v35  ;;  %470 = vadd.xlane.f32.xlu0 %v469_v46  ;;  %v284_v47 = vpop.xlane.xlu0 %283  ;;  %v332_v50 = vpop.xlane.xlu1 %331 }
  0xbc   : > { %v365_v54 = vmul.f32 0.03125, %v284_v47  ;;  %v381_v8 = vmul.f32 0.03125, %v332_v50  ;;  %v428_v58 = vmul.f32 %v1685_v43, %v1685_v43  ;;  %v444_v24 = vmul.f32 %v1688_v21, %v1688_v21 }
  0xbe   : > { %v1697_v59 = vsub.f32 %v1525_v28, %v365_v54  ;;  %v1700_v25 = vsub.f32 %v1528_v29, %v381_v8  ;;  %v472_v62 = vsel %vm260_vm0, %v428_v58, 0.0  ;;  %v520_v4 = vsel %vm260_vm0, %v444_v24, 0.0  ;;  %v759_v54 = vld [vmem:[%s2070_s3 + $0x18] sm:$0xff] }
  0xbf   : > { %518 = vadd.xlane.f32.xlu1 %v517_v51  ;;  %473 = vadd.xlane.f32.xlu0 %v472_v62  ;;  %v287_v63 = vpop.xlane.xlu0 %286  ;;  %v335_v3 = vpop.xlane.xlu1 %334 }
  0xc0   : > { %v366_v6 = vmul.f32 0.03125, %v287_v63  ;;  %v382_v12 = vmul.f32 0.03125, %v335_v3  ;;  %v429_v14 = vmul.f32 %v1697_v59, %v1697_v59  ;;  %v445_v28 = vmul.f32 %v1700_v25, %v1700_v25 }
  0xc2   : > { %v1709_v15 = vsub.f32 %v1535_v32, %v366_v6  ;;  %v1712_v29 = vsub.f32 %v1538_v33, %v382_v12  ;;  %v475_v18 = vsel %vm260_vm0, %v429_v14, 0.0  ;;  %v523_v23 = vsel %vm260_vm0, %v445_v28, 0.0  ;;  %v756_v33 = vld [vmem:[%s2070_s3] sm:$0xff] }
  0xc3   : > { %521 = vadd.xlane.f32.xlu1 %v520_v4  ;;  %476 = vadd.xlane.f32.xlu0 %v475_v18  ;;  %v290_v19 = vpop.xlane.xlu0 %289  ;;  %v338_v22 = vpop.xlane.xlu1 %337  ;;  %v1314_v34 = vpack.c.bf16 %v757_v31, %v756_v33 }
  0xc4   : > { %v367_v0 = vmul.f32 0.03125, %v290_v19  ;;  %v383_v16 = vmul.f32 0.03125, %v338_v22  ;;  %v430_v30 = vmul.f32 %v1709_v15, %v1709_v15  ;;  %v446_v32 = vmul.f32 %v1712_v29, %v1712_v29 }
  0xc5   : > { %1315 = vmatprep.subr.bf16.mxu0 %v1314_v34  ;;  %1322 = vmatprep.subr.bf16.mxu1 %v1314_v34 }
  0xc6   : > { %v1727_v35 = vsub.f32 %v1545_v36, %v367_v0  ;;  %v1730_v38 = vsub.f32 %v1548_v37, %v383_v16  ;;  %v478_v39 = vsel %vm260_vm0, %v430_v30, 0.0  ;;  %v526_v46 = vsel %vm260_vm0, %v446_v32, 0.0  ;;  %v758_v37 = vld [vmem:[%s2070_s3 + $0x10] sm:$0xff]  ;;  %1317 = vmatpush3.bf16.msra.mxu0 %v1314_v34  ;;  %1324 = vmatpush3.bf16.msra.mxu1 %v1314_v34 }
  0xc7   : > { %524 = vadd.xlane.f32.xlu1 %v523_v23  ;;  %479 = vadd.xlane.f32.xlu0 %v478_v39  ;;  %v293_v42 = vpop.xlane.xlu0 %292  ;;  %v341_v20 = vpop.xlane.xlu1 %340  ;;  %v1318_v8 = vpack.c.bf16 %v759_v54, %v758_v37 }
  0xc8   : > { %v368_v47 = vmul.f32 0.03125, %v293_v42  ;;  %v384_v50 = vmul.f32 0.03125, %v341_v20  ;;  %v431_v51 = vmul.f32 %v1727_v35, %v1727_v35  ;;  %v447_v36 = vmul.f32 %v1730_v38, %v1730_v38 }
  0xc9   : > { %1319 = vmatprep.subr.bf16.mxu0 %v1318_v8  ;;  %1323 = vmatprep.subr.bf16.mxu1 %v1318_v8 }
  0xca   : > { %v1745_v58 = vsub.f32 %v1555_v40, %v368_v47  ;;  %v1748_v24 = vsub.f32 %v1558_v41, %v384_v50  ;;  %v481_v62 = vsel %vm260_vm0, %v431_v51, 0.0  ;;  %v529_v4 = vsel %vm260_vm0, %v447_v36, 0.0  ;;  %1321 = vmatpush3.bf16.msra.mxu0 %v1318_v8  ;;  %1325 = vmatpush3.bf16.msra.mxu1 %v1318_v8 }
  0xcb   : > { %527 = vadd.xlane.f32.xlu1 %v526_v46  ;;  %482 = vadd.xlane.f32.xlu0 %v481_v62  ;;  %v296_v63 = vpop.xlane.xlu0 %295  ;;  %v344_v3 = vpop.xlane.xlu1 %343 }
  0xcc   : > { %v369_v6 = vmul.f32 0.03125, %v296_v63  ;;  %v385_v12 = vmul.f32 0.03125, %v344_v3  ;;  %v432_v14 = vmul.f32 %v1745_v58, %v1745_v58  ;;  %v448_v40 = vmul.f32 %v1748_v24, %v1748_v24 }
  0xce   : > { %v1757_v41 = vsub.f32 %v1565_v44, %v369_v6  ;;  %v1760_v28 = vsub.f32 %v1568_v45, %v385_v12  ;;  %v484_v18 = vsel %vm260_vm0, %v432_v14, 0.0  ;;  %v532_v23 = vsel %vm260_vm0, %v448_v40, 0.0 }
  0xcf   : > { %530 = vadd.xlane.f32.xlu1 %v529_v4  ;;  %485 = vadd.xlane.f32.xlu0 %v484_v18  ;;  %v299_v19 = vpop.xlane.xlu0 %298  ;;  %v347_v22 = vpop.xlane.xlu1 %346 }
  0xd0   : > { %v370_v0 = vmul.f32 0.03125, %v299_v19  ;;  %v386_v16 = vmul.f32 0.03125, %v347_v22  ;;  %v433_v30 = vmul.f32 %v1757_v41, %v1757_v41  ;;  %v449_v44 = vmul.f32 %v1760_v28, %v1760_v28 }
  0xd2   : > { %v1769_v32 = vsub.f32 %v1575_v48, %v370_v0  ;;  %v1772_v45 = vsub.f32 %v1578_v49, %v386_v16  ;;  %v487_v33 = vsel %vm260_vm0, %v433_v30, 0.0  ;;  %v535_v39 = vsel %vm260_vm0, %v449_v44, 0.0 }
  0xd3   : > { %533 = vadd.xlane.f32.xlu1 %v532_v23  ;;  %488 = vadd.xlane.f32.xlu0 %v487_v33  ;;  %v302_v31 = vpop.xlane.xlu0 %301  ;;  %v350_v34 = vpop.xlane.xlu1 %349 }
  0xd4   : > { %v371_v42 = vmul.f32 0.03125, %v302_v31  ;;  %v387_v20 = vmul.f32 0.03125, %v350_v34  ;;  %v434_v46 = vmul.f32 %v1769_v32, %v1769_v32  ;;  %v450_v48 = vmul.f32 %v1772_v45, %v1772_v45 }
  0xd6   : > { %v1781_v47 = vsub.f32 %v1585_v52, %v371_v42  ;;  %v1784_v49 = vsub.f32 %v1588_v53, %v387_v20  ;;  %v490_v50 = vsel %vm260_vm0, %v434_v46, 0.0  ;;  %v538_v37 = vsel %vm260_vm0, %v450_v48, 0.0 }
  0xd7   : > { %536 = vadd.xlane.f32.xlu1 %v535_v39  ;;  %491 = vadd.xlane.f32.xlu0 %v490_v50  ;;  %v305_v51 = vpop.xlane.xlu0 %304  ;;  %v353_v36 = vpop.xlane.xlu1 %352 }
  0xd8   : > { %v372_v54 = vmul.f32 0.03125, %v305_v51  ;;  %v388_v8 = vmul.f32 0.03125, %v353_v36  ;;  %v435_v62 = vmul.f32 %v1781_v47, %v1781_v47  ;;  %v451_v52 = vmul.f32 %v1784_v49, %v1784_v49 }
  0xda   : > { %v1793_v63 = vsub.f32 %v1595_v56, %v372_v54  ;;  %v1796_v53 = vsub.f32 %v1598_v57, %v388_v8  ;;  %v493_v3 = vsel %vm260_vm0, %v435_v62, 0.0  ;;  %v541_v12 = vsel %vm260_vm0, %v451_v52, 0.0 }
  0xdb   : > { %539 = vadd.xlane.f32.xlu1 %v538_v37  ;;  %494 = vadd.xlane.f32.xlu0 %v493_v3  ;;  %v308_v4 = vpop.xlane.xlu0 %307  ;;  %v356_v6 = vpop.xlane.xlu1 %355 }
  0xdc   : > { %v373_v14 = vmul.f32 0.03125, %v308_v4  ;;  %v389_v40 = vmul.f32 0.03125, %v356_v6  ;;  %v436_v18 = vmul.f32 %v1793_v63, %v1793_v63  ;;  %v452_v56 = vmul.f32 %v1796_v53, %v1796_v53 }
  0xde   : > { %v1805_v19 = vsub.f32 %v1605_v60, %v373_v14  ;;  %v1808_v57 = vsub.f32 %v1608_v61, %v389_v40  ;;  %v496_v22 = vsel %vm260_vm0, %v436_v18, 0.0  ;;  %v544_v23 = vsel %vm260_vm0, %v452_v56, 0.0  ;;  %v1821_v14 = vld [vmem:[%s2068_s1] ss:$0 sm:$0xff] }
  0xdf   : > { %542 = vadd.xlane.f32.xlu1 %v541_v12  ;;  %497 = vadd.xlane.f32.xlu0 %v496_v22 }
  0xe0   : > { %v437_v0 = vmul.f32 %v1805_v19, %v1805_v19  ;;  %v453_v16 = vmul.f32 %v1808_v57, %v1808_v57 }
  0xe2   : > { %v499_v30 = vsel %vm260_vm0, %v437_v0, 0.0  ;;  %v547_v60 = vsel %vm260_vm0, %v453_v16, 0.0  ;;  %v1827_v0 = vld [vmem:[%s2069_s2] ss:$0 sm:$0xff] }
  0xe3   : > { %545 = vadd.xlane.f32.xlu1 %v544_v23  ;;  %500 = vadd.xlane.f32.xlu0 %v499_v30 }
  0xe7   : > { %548 = vadd.xlane.f32.xlu1 %v547_v60 }
 0x134   : > { %v456_v61 = vpop.xlane.xlu0 %455 }
 0x135   : > { %v550_v44 = vmul.f32 0.03125, %v456_v61 }
 0x137   : > { %v582_v33 = vadd.f32 1e-05, %v550_v44 }
 0x138   : > { %v504_v31 = vpop.xlane.xlu1 %503  ;;  %v459_v34 = vpop.xlane.xlu0 %458 }
 0x139   : > { %1334 = vrsqrt.f32 %v582_v33  ;;  %v566_v39 = vmul.f32 0.03125, %v504_v31  ;;  %v551_v42 = vmul.f32 0.03125, %v459_v34 }
 0x13b   : > { %v598_v20 = vadd.f32 1e-05, %v566_v39  ;;  %v583_v46 = vadd.f32 1e-05, %v551_v42 }
 0x13c   : > { %v507_v48 = vpop.xlane.xlu1 %506  ;;  %v462_v50 = vpop.xlane.xlu0 %461 }
 0x13d   : > { %1336 = vrsqrt.f32 %v598_v20  ;;  %v567_v51 = vmul.f32 0.03125, %v507_v48  ;;  %v552_v36 = vmul.f32 0.03125, %v462_v50 }
 0x13e   : > { %1338 = vrsqrt.f32 %v583_v46 }
 0x13f   : > { %v599_v37 = vadd.f32 1e-05, %v567_v51  ;;  %v584_v54 = vadd.f32 1e-05, %v552_v36 }
 0x140   : > { %v510_v8 = vpop.xlane.xlu1 %509  ;;  %v465_v62 = vpop.xlane.xlu0 %464 }
 0x141   : > { %1340 = vrsqrt.f32 %v599_v37  ;;  %v568_v52 = vmul.f32 0.03125, %v510_v8  ;;  %v553_v3 = vmul.f32 0.03125, %v465_v62 }
 0x142   : > { %1342 = vrsqrt.f32 %v584_v54 }
 0x143   : > { %v1335_v4 = vpop.eup %1334  ;;  %v600_v6 = vadd.f32 1e-05, %v568_v52  ;;  %v585_v12 = vadd.f32 1e-05, %v553_v3 }
 0x144   : > { %v513_v40 = vpop.xlane.xlu1 %512  ;;  %v468_v18 = vpop.xlane.xlu0 %467  ;;  %v646_v56 = vmul.f32 %v1335_v4, %v1615_v10 }
 0x145   : > { %1344 = vrsqrt.f32 %v600_v6  ;;  %v569_v22 = vmul.f32 0.03125, %v513_v40  ;;  %v554_v23 = vmul.f32 0.03125, %v468_v18 }
 0x146   : > { %1346 = vrsqrt.f32 %v585_v12  ;;  %v685_v16 = vmul.f32 %v1821_v14, %v646_v56 }
 0x147   : > { %v1337_v30 = vpop.eup %1336  ;;  %v601_v60 = vadd.f32 1e-05, %v569_v22  ;;  %v586_v61 = vadd.f32 1e-05, %v554_v23 }
 0x148   : > { %v1339_v44 = vpop.eup %1338  ;;  %v516_v33 = vpop.xlane.xlu1 %515  ;;  %v724_v34 = vadd.f32 %v1827_v0, %v685_v16  ;;  %v662_v10 = vmul.f32 %v1337_v30, %v1625_v26 }
 0x149   : > { %v471_v31 = vpop.xlane.xlu0 %470  ;;  %1348 = vrsqrt.f32 %v601_v60  ;;  %v570_v39 = vmul.f32 0.03125, %v516_v33  ;;  %v647_v20 = vmul.f32 %v1339_v44, %v1618_v11 }
 0x14a   : > { %v555_v42 = vmul.f32 0.03125, %v471_v31  ;;  %1350 = vrsqrt.f32 %v586_v61  ;;  %1266 = vmatprep.mubr.msk.f32.mxu0 %vm260_vm0, %v724_v34  ;;  %v701_v46 = vmul.f32 %v1821_v14, %v662_v10 }
 0x14b   : > { %v1341_v48 = vpop.eup %1340  ;;  %v602_v50 = vadd.f32 1e-05, %v570_v39  ;;  %v686_v36 = vmul.f32 %v1821_v14, %v647_v20 }
 0x14c   : > { %v587_v51 = vadd.f32 1e-05, %v555_v42  ;;  %v1343_v37 = vpop.eup %1342  ;;  %v519_v54 = vpop.xlane.xlu1 %518  ;;  %v740_v26 = vadd.f32 %v1827_v0, %v701_v46  ;;  %v663_v62 = vmul.f32 %v1341_v48, %v1628_v27 }
 0x14d   : > { %v474_v8 = vpop.xlane.xlu0 %473  ;;  %1352 = vrsqrt.f32 %v602_v50  ;;  %v571_v52 = vmul.f32 0.03125, %v519_v54  ;;  %v725_v3 = vadd.f32 %v1827_v0, %v686_v36  ;;  %v648_v4 = vmul.f32 %v1343_v37, %v1637_v2 }
 0x14e   : > { %v556_v11 = vmul.f32 0.03125, %v474_v8  ;;  %1354 = vrsqrt.f32 %v587_v51  ;;  %1290 = vmatprep.mubr.msk.f32.mxu1 %vm260_vm0, %v740_v26  ;;  %v702_v6 = vmul.f32 %v1821_v14, %v663_v62 }
 0x14f   : > { %v1345_v12 = vpop.eup %1344  ;;  %v603_v40 = vadd.f32 1e-05, %v571_v52  ;;  %1267 = vmatmul.mubr.msk.f32.vlgmr.msra.gmra.mrb[0].mxu0 %vm260_vm0, %v725_v3  ;;  %v687_v23 = vmul.f32 %v1821_v14, %v648_v4 }
 0x150   : > { %v588_v18 = vadd.f32 1e-05, %v556_v11  ;;  %v1347_v56 = vpop.eup %1346  ;;  %v522_v22 = vpop.xlane.xlu1 %521  ;;  %v741_v16 = vadd.f32 %v1827_v0, %v702_v6  ;;  %v664_v30 = vmul.f32 %v1345_v12, %v1640_v5 }
 0x151   : > { %v477_v27 = vpop.xlane.xlu0 %476  ;;  %1356 = vrsqrt.f32 %v603_v40  ;;  %v572_v60 = vmul.f32 0.03125, %v522_v22  ;;  %v649_v2 = vmul.f32 %v1347_v56, %v1649_v55  ;;  %v726_v44 = vadd.f32 %v1827_v0, %v687_v23 }
 0x152   : > { %v557_v61 = vmul.f32 0.03125, %v477_v27  ;;  %1358 = vrsqrt.f32 %v588_v18  ;;  %1291 = vmatmul.mubr.msk.f32.vlgmr.msra.gmra.mrb[0].mxu1 %vm260_vm0, %v741_v16  ;;  %v703_v33 = vmul.f32 %v1821_v14, %v664_v30 }
 0x153   : > { %v1349_v31 = vpop.eup %1348  ;;  %v604_v34 = vadd.f32 1e-05, %v572_v60  ;;  %v688_v39 = vmul.f32 %v1821_v14, %v649_v2  ;;  %1269 = vmatprep.mubr.msk.f32.mxu0 %vm260_vm0, %v726_v44 }
 0x154   : > { %v589_v10 = vadd.f32 1e-05, %v557_v61  ;;  %v1351_v42 = vpop.eup %1350  ;;  %v525_v5 = vpop.xlane.xlu1 %524  ;;  %v742_v46 = vadd.f32 %v1827_v0, %v703_v33  ;;  %v665_v55 = vmul.f32 %v1349_v31, %v1652_v9 }
 0x155   : > { %v480_v20 = vpop.xlane.xlu0 %479  ;;  %1360 = vrsqrt.f32 %v604_v34  ;;  %v573_v48 = vmul.f32 0.03125, %v525_v5  ;;  %v727_v51 = vadd.f32 %v1827_v0, %v688_v39  ;;  %v650_v36 = vmul.f32 %v1351_v42, %v1661_v7 }
 0x156   : > { %v558_v50 = vmul.f32 0.03125, %v480_v20  ;;  %1362 = vrsqrt.f32 %v589_v10  ;;  %1293 = vmatprep.mubr.msk.f32.mxu1 %vm260_vm0, %v742_v46  ;;  %v704_v37 = vmul.f32 %v1821_v14, %v665_v55 }
 0x157   : > { %v1353_v54 = vpop.eup %1352  ;;  %v605_v8 = vadd.f32 1e-05, %v573_v48  ;;  %1270 = vmatmul.mubr.msk.f32.gmra.mrb[2].mxu0 %vm260_vm0, %v727_v51  ;;  %v689_v11 = vmul.f32 %v1821_v14, %v650_v36 }
 0x158   : > { %v590_v26 = vadd.f32 1e-05, %v558_v50  ;;  %v1355_v62 = vpop.eup %1354  ;;  %v528_v52 = vpop.xlane.xlu1 %527  ;;  %v743_v3 = vadd.f32 %v1827_v0, %v704_v37  ;;  %v666_v4 = vmul.f32 %v1353_v54, %v1664_v13 }
 0x159   : > { %v483_v9 = vpop.xlane.xlu0 %482  ;;  %1364 = vrsqrt.f32 %v605_v8  ;;  %v574_v6 = vmul.f32 0.03125, %v528_v52  ;;  %v651_v7 = vmul.f32 %v1355_v62, %v1673_v1  ;;  %v728_v40 = vadd.f32 %v1827_v0, %v689_v11 }
 0x15a   : > { %v559_v12 = vmul.f32 0.03125, %v483_v9  ;;  %1366 = vrsqrt.f32 %v590_v26  ;;  %1294 = vmatmul.mubr.msk.f32.gmra.mrb[2].mxu1 %vm260_vm0, %v743_v3  ;;  %v705_v18 = vmul.f32 %v1821_v14, %v666_v4 }
 0x15b   : > { %v1357_v56 = vpop.eup %1356  ;;  %v606_v22 = vadd.f32 1e-05, %v574_v6  ;;  %v690_v23 = vmul.f32 %v1821_v14, %v651_v7  ;;  %1272 = vmatprep.mubr.msk.f32.mxu0 %vm260_vm0, %v728_v40 }
 0x15c   : > { %v591_v27 = vadd.f32 1e-05, %v559_v12  ;;  %v1359_v16 = vpop.eup %1358  ;;  %v531_v13 = vpop.xlane.xlu1 %530  ;;  %v744_v60 = vadd.f32 %v1827_v0, %v705_v18  ;;  %v667_v1 = vmul.f32 %v1357_v56, %v1676_v17 }
 0x15d   : > { %v486_v30 = vpop.xlane.xlu0 %485  ;;  %1368 = vrsqrt.f32 %v606_v22  ;;  %v575_v61 = vmul.f32 0.03125, %v531_v13  ;;  %v729_v44 = vadd.f32 %v1827_v0, %v690_v23  ;;  %v652_v33 = vmul.f32 %v1359_v16, %v1685_v43 }
 0x15e   : > { %v560_v2 = vmul.f32 0.03125, %v486_v30  ;;  %1370 = vrsqrt.f32 %v591_v27  ;;  %1296 = vmatprep.mubr.msk.f32.mxu1 %vm260_vm0, %v744_v60  ;;  %v706_v31 = vmul.f32 %v1821_v14, %v667_v1 }
 0x15f   : > { %v1361_v34 = vpop.eup %1360  ;;  %v607_v10 = vadd.f32 1e-05, %v575_v61  ;;  %1273 = vmatmul.mubr.msk.f32.gmra.mrb[4].mxu0 %vm260_vm0, %v729_v44  ;;  %v691_v20 = vmul.f32 %v1821_v14, %v652_v33 }
 0x160   : > { %v592_v39 = vadd.f32 1e-05, %v560_v2  ;;  %v1363_v42 = vpop.eup %1362  ;;  %v534_v5 = vpop.xlane.xlu1 %533  ;;  %v745_v46 = vadd.f32 %v1827_v0, %v706_v31  ;;  %v668_v55 = vmul.f32 %v1361_v34, %v1688_v21 }
 0x161   : > { %v489_v17 = vpop.xlane.xlu0 %488  ;;  %1372 = vrsqrt.f32 %v607_v10  ;;  %v576_v48 = vmul.f32 0.03125, %v534_v5  ;;  %v653_v43 = vmul.f32 %v1363_v42, %v1697_v59  ;;  %v730_v51 = vadd.f32 %v1827_v0, %v691_v20 }
 0x162   : > { %v561_v50 = vmul.f32 0.03125, %v489_v17  ;;  %1374 = vrsqrt.f32 %v592_v39  ;;  %1297 = vmatmul.mubr.msk.f32.gmra.mrb[4].mxu1 %vm260_vm0, %v745_v46  ;;  %v707_v36 = vmul.f32 %v1821_v14, %v668_v55 }
 0x163   : > { %v1365_v37 = vpop.eup %1364  ;;  %v608_v54 = vadd.f32 1e-05, %v576_v48  ;;  %v692_v26 = vmul.f32 %v1821_v14, %v653_v43  ;;  %1275 = vmatprep.mubr.msk.f32.mxu0 %vm260_vm0, %v730_v51 }
 0x164   : > { %v593_v8 = vadd.f32 1e-05, %v561_v50  ;;  %v1367_v62 = vpop.eup %1366  ;;  %v537_v21 = vpop.xlane.xlu1 %536  ;;  %v746_v9 = vadd.f32 %v1827_v0, %v707_v36  ;;  %v669_v59 = vmul.f32 %v1365_v37, %v1700_v25 }
 0x165   : > { %v492_v52 = vpop.xlane.xlu0 %491  ;;  %1376 = vrsqrt.f32 %v608_v54  ;;  %v577_v11 = vmul.f32 0.03125, %v537_v21  ;;  %v731_v4 = vadd.f32 %v1827_v0, %v692_v26  ;;  %v654_v6 = vmul.f32 %v1367_v62, %v1709_v15 }
 0x166   : > { %v562_v3 = vmul.f32 0.03125, %v492_v52  ;;  %1378 = vrsqrt.f32 %v593_v8  ;;  %1299 = vmatprep.mubr.msk.f32.mxu1 %vm260_vm0, %v746_v9  ;;  %v708_v12 = vmul.f32 %v1821_v14, %v669_v59 }
 0x167   : > { %v1369_v7 = vpop.eup %1368  ;;  %v609_v40 = vadd.f32 1e-05, %v577_v11  ;;  %1276 = vmatmul.mubr.msk.f32.gmra.mrb[6].mxu0 %vm260_vm0, %v731_v4  ;;  %v693_v27 = vmul.f32 %v1821_v14, %v654_v6 }
 0x168   : > { %v594_v18 = vadd.f32 1e-05, %v562_v3  ;;  %v1371_v56 = vpop.eup %1370  ;;  %v540_v22 = vpop.xlane.xlu1 %539  ;;  %v747_v23 = vadd.f32 %v1827_v0, %v708_v12  ;;  %v670_v16 = vmul.f32 %v1369_v7, %v1712_v29 }
 0x169   : > { %v495_v25 = vpop.xlane.xlu0 %494  ;;  %1380 = vrsqrt.f32 %v609_v40  ;;  %v578_v13 = vmul.f32 0.03125, %v540_v22  ;;  %v655_v15 = vmul.f32 %v1371_v56, %v1727_v35  ;;  %v732_v60 = vadd.f32 %v1827_v0, %v693_v27 }
 0x16a   : > { %v563_v30 = vmul.f32 0.03125, %v495_v25  ;;  %1382 = vrsqrt.f32 %v594_v18  ;;  %1300 = vmatmul.mubr.msk.f32.gmra.mrb[6].mxu1 %vm260_vm0, %v747_v23  ;;  %v709_v1 = vmul.f32 %v1821_v14, %v670_v16 }
 0x16b   : > { %v1373_v61 = vpop.eup %1372  ;;  %v610_v2 = vadd.f32 1e-05, %v578_v13  ;;  %v694_v33 = vmul.f32 %v1821_v14, %v655_v15  ;;  %1278 = vmatprep.mubr.msk.f32.mxu0 %vm260_vm0, %v732_v60 }
 0x16c   : > { %v595_v44 = vadd.f32 1e-05, %v563_v30  ;;  %v1375_v31 = vpop.eup %1374  ;;  %v543_v29 = vpop.xlane.xlu1 %542  ;;  %v748_v10 = vadd.f32 %v1827_v0, %v709_v1  ;;  %v671_v35 = vmul.f32 %v1373_v61, %v1730_v38 }
 0x16d   : > { %v498_v34 = vpop.xlane.xlu0 %497  ;;  %1384 = vrsqrt.f32 %v610_v2  ;;  %v579_v39 = vmul.f32 0.03125, %v543_v29  ;;  %v733_v5 = vadd.f32 %v1827_v0, %v694_v33  ;;  %v656_v17 = vmul.f32 %v1375_v31, %v1745_v58 }
 0x16e   : > { %v564_v42 = vmul.f32 0.03125, %v498_v34  ;;  %1386 = vrsqrt.f32 %v595_v44  ;;  %1302 = vmatprep.mubr.msk.f32.mxu1 %vm260_vm0, %v748_v10  ;;  %v710_v20 = vmul.f32 %v1821_v14, %v671_v35 }
 0x16f   : > { %v1377_v46 = vpop.eup %1376  ;;  %v611_v55 = vadd.f32 1e-05, %v579_v39  ;;  %1279 = vmatmul.mubr.msk.f32.gmra.mrb[8].mxu0 %vm260_vm0, %v733_v5  ;;  %v695_v51 = vmul.f32 %v1821_v14, %v656_v17  ;;  %v1959_v5 = vld [vmem:[%s2071_s4] ss:$0 sm:$0xff] }
 0x170   : > { %v596_v48 = vadd.f32 1e-05, %v564_v42  ;;  %v1379_v50 = vpop.eup %1378  ;;  %v546_v43 = vpop.xlane.xlu1 %545  ;;  %v749_v36 = vadd.f32 %v1827_v0, %v710_v20  ;;  %v672_v37 = vmul.f32 %v1377_v46, %v1748_v24 }
 0x171   : > { %v501_v38 = vpop.xlane.xlu0 %500  ;;  %1388 = vrsqrt.f32 %v611_v55  ;;  %v580_v54 = vmul.f32 0.03125, %v546_v43  ;;  %v657_v58 = vmul.f32 %v1379_v50, %v1757_v41  ;;  %v734_v26 = vadd.f32 %v1827_v0, %v695_v51 }
 0x172   : > { %v565_v8 = vmul.f32 0.03125, %v501_v38  ;;  %1390 = vrsqrt.f32 %v596_v48  ;;  %1303 = vmatmul.mubr.msk.f32.gmra.mrb[8].mxu1 %vm260_vm0, %v749_v36  ;;  %v711_v62 = vmul.f32 %v1821_v14, %v672_v37 }
 0x173   : > { %v1381_v21 = vpop.eup %1380  ;;  %v612_v52 = vadd.f32 1e-05, %v580_v54  ;;  %v696_v59 = vmul.f32 %v1821_v14, %v657_v58  ;;  %1281 = vmatprep.mubr.msk.f32.mxu0 %vm260_vm0, %v734_v26 }
 0x174   : > { %v597_v9 = vadd.f32 1e-05, %v565_v8  ;;  %v1383_v11 = vpop.eup %1382  ;;  %v549_v24 = vpop.xlane.xlu1 %548  ;;  %v750_v3 = vadd.f32 %v1827_v0, %v711_v62  ;;  %v673_v41 = vmul.f32 %v1381_v21, %v1760_v28 }
 0x175   : > { %1392 = vrsqrt.f32 %v612_v52  ;;  %v581_v4 = vmul.f32 0.03125, %v549_v24  ;;  %v735_v6 = vadd.f32 %v1827_v0, %v696_v59  ;;  %v658_v12 = vmul.f32 %v1383_v11, %v1769_v32 }
 0x176   : > { %1394 = vrsqrt.f32 %v597_v9  ;;  %1305 = vmatprep.mubr.msk.f32.mxu1 %vm260_vm0, %v750_v3  ;;  %v712_v7 = vmul.f32 %v1821_v14, %v673_v41 }
 0x177   : > { %v1385_v40 = vpop.eup %1384  ;;  %v613_v18 = vadd.f32 1e-05, %v581_v4  ;;  %1282 = vmatmul.mubr.msk.f32.gmra.mrb[10].mxu0 %vm260_vm0, %v735_v6  ;;  %v697_v56 = vmul.f32 %v1821_v14, %v658_v12 }
 0x178   : > { %v1387_v22 = vpop.eup %1386  ;;  %v751_v28 = vadd.f32 %v1827_v0, %v712_v7  ;;  %v674_v25 = vmul.f32 %v1385_v40, %v1772_v45 }
 0x179   : > { %1396 = vrsqrt.f32 %v613_v18  ;;  %v736_v27 = vadd.f32 %v1827_v0, %v697_v56  ;;  %v659_v32 = vmul.f32 %v1387_v22, %v1781_v47 }
 0x17a   : > { %1306 = vmatmul.mubr.msk.f32.gmra.mrb[10].mxu1 %vm260_vm0, %v751_v28  ;;  %v713_v23 = vmul.f32 %v1821_v14, %v674_v25 }
 0x17b   : > { %v1389_v16 = vpop.eup %1388  ;;  %1284 = vmatprep.mubr.msk.f32.mxu0 %vm260_vm0, %v736_v27  ;;  %v698_v13 = vmul.f32 %v1821_v14, %v659_v32 }
 0x17c   : > { %v1391_v30 = vpop.eup %1390  ;;  %v752_v15 = vadd.f32 %v1827_v0, %v713_v23  ;;  %v675_v60 = vmul.f32 %v1389_v16, %v1784_v49 }
 0x17d   : > { %v737_v45 = vadd.f32 %v1827_v0, %v698_v13  ;;  %v660_v1 = vmul.f32 %v1391_v30, %v1793_v63 }
 0x17e   : > { %1308 = vmatprep.mubr.msk.f32.mxu1 %vm260_vm0, %v752_v15  ;;  %v714_v47 = vmul.f32 %v1821_v14, %v675_v60 }
 0x17f   : > { %v1393_v61 = vpop.eup %1392  ;;  %1285 = vmatmul.mubr.msk.f32.gmra.mrb[12].mxu0 %vm260_vm0, %v737_v45  ;;  %v699_v2 = vmul.f32 %v1821_v14, %v660_v1 }
 0x180   : > { %v1395_v44 = vpop.eup %1394  ;;  %v753_v33 = vadd.f32 %v1827_v0, %v714_v47  ;;  %v676_v31 = vmul.f32 %v1393_v61, %v1796_v53 }
 0x181   : > { %v738_v49 = vadd.f32 %v1827_v0, %v699_v2  ;;  %v661_v29 = vmul.f32 %v1395_v44, %v1805_v19 }
 0x182   : > { %1309 = vmatmul.mubr.msk.f32.gmra.mrb[12].mxu1 %vm260_vm0, %v753_v33  ;;  %v715_v63 = vmul.f32 %v1821_v14, %v676_v31 }
 0x183   : > { %v1397_v34 = vpop.eup %1396  ;;  %1287 = vmatprep.mubr.msk.f32.mxu0 %vm260_vm0, %v738_v49  ;;  %v700_v10 = vmul.f32 %v1821_v14, %v661_v29 }
 0x184   : > { %v754_v35 = vadd.f32 %v1827_v0, %v715_v63  ;;  %v677_v39 = vmul.f32 %v1397_v34, %v1808_v57 }
 0x185   : > { %v739_v53 = vadd.f32 %v1827_v0, %v700_v10 }
 0x186   : > { %1311 = vmatprep.mubr.msk.f32.mxu1 %vm260_vm0, %v754_v35  ;;  %v716_v42 = vmul.f32 %v1821_v14, %v677_v39 }
 0x187   : > { %1288 = vmatmul.mubr.msk.f32.gmra.mrb[14].mxu0 %vm260_vm0, %v739_v53 }
 0x188   : > { %v755_v19 = vadd.f32 %v1827_v0, %v716_v42 }
 0x18a   : > { %1312 = vmatmul.mubr.msk.f32.gmra.mrb[14].mxu1 %vm260_vm0, %v755_v19 }
 0x222   : > { %v1268_v57 = vpop.f32.mrb[0].mxu0 }
 0x223   : > { %v935_v14 = vadd.f32 %v1268_v57, %v1959_v5  ;;  %v929_v0 = vpop.f32.mrb[1].mxu0 }
 0x224   : > { %v930_v17 = vadd.f32 %v1959_v5, %v929_v0 }
 0x225   : > { %1089 = vst.msk [vmem:[%s1966_s16 + $0x8] sm:$0xff] %vm260_vm0, %v935_v14  ;;  %v1292_v20 = vpop.f32.mrb[0].mxu1 }
 0x226   : > { %1088 = vst.msk [vmem:[%s1966_s16] sm:$0xff] %vm260_vm0, %v930_v17  ;;  %v1015_v46 = vadd.f32 %v1292_v20, %v1959_v5  ;;  %v1009_v55 = vpop.f32.mrb[1].mxu1 }
 0x227   : > { %v1010_v48 = vadd.f32 %v1959_v5, %v1009_v55 }
 0x228   : > { %1105 = vst.msk [vmem:[%s1966_s16 + $0x88] sm:$0xff] %vm260_vm0, %v1015_v46 }
 0x229   : > { %1104 = vst.msk [vmem:[%s1966_s16 + $0x80] sm:$0xff] %vm260_vm0, %v1010_v48 }
 0x22a   : > { %v1271_v50 = vpop.f32.mrb[2].mxu0 }
 0x22b   : > { %v945_v43 = vadd.f32 %v1271_v50, %v1959_v5  ;;  %v939_v38 = vpop.f32.mrb[3].mxu0 }
 0x22c   : > { %v940_v51 = vadd.f32 %v1959_v5, %v939_v38 }
 0x22d   : > { %1091 = vst.msk [vmem:[%s1966_s16 + $0x18] sm:$0xff] %vm260_vm0, %v945_v43  ;;  %v1295_v36 = vpop.f32.mrb[2].mxu1 }
 0x22e   : > { %1090 = vst.msk [vmem:[%s1966_s16 + $0x10] sm:$0xff] %vm260_vm0, %v940_v51  ;;  %v1025_v37 = vadd.f32 %v1295_v36, %v1959_v5  ;;  %v1019_v54 = vpop.f32.mrb[3].mxu1 }
 0x22f   : > { %v1020_v8 = vadd.f32 %v1959_v5, %v1019_v54 }
 0x230   : > { %1107 = vst.msk [vmem:[%s1966_s16 + $0x98] sm:$0xff] %vm260_vm0, %v1025_v37 }
 0x231   : > { %1106 = vst.msk [vmem:[%s1966_s16 + $0x90] sm:$0xff] %vm260_vm0, %v1020_v8 }
 0x232   : > { %v1274_v58 = vpop.f32.mrb[4].mxu0 }
 0x233   : > { %v955_v26 = vadd.f32 %v1274_v58, %v1959_v5  ;;  %v949_v62 = vpop.f32.mrb[5].mxu0 }
 0x234   : > { %v950_v21 = vadd.f32 %v1959_v5, %v949_v62 }
 0x235   : > { %1093 = vst.msk [vmem:[%s1966_s16 + $0x28] sm:$0xff] %vm260_vm0, %v955_v26  ;;  %v1298_v52 = vpop.f32.mrb[4].mxu1 }
 0x236   : > { %1092 = vst.msk [vmem:[%s1966_s16 + $0x20] sm:$0xff] %vm260_vm0, %v950_v21  ;;  %v1035_v9 = vadd.f32 %v1298_v52, %v1959_v5  ;;  %v1029_v59 = vpop.f32.mrb[5].mxu1 }
 0x237   : > { %v1030_v11 = vadd.f32 %v1959_v5, %v1029_v59 }
 0x238   : > { %1109 = vst.msk [vmem:[%s1966_s16 + $0xa8] sm:$0xff] %vm260_vm0, %v1035_v9 }
 0x239   : > { %1108 = vst.msk [vmem:[%s1966_s16 + $0xa0] sm:$0xff] %vm260_vm0, %v1030_v11 }
 0x23a   : > { %v1277_v24 = vpop.f32.mrb[6].mxu0 }
 0x23b   : > { %v965_v3 = vadd.f32 %v1277_v24, %v1959_v5  ;;  %v959_v41 = vpop.f32.mrb[7].mxu0 }
 0x23c   : > { %v960_v4 = vadd.f32 %v1959_v5, %v959_v41 }
 0x23d   : > { %1095 = vst.msk [vmem:[%s1966_s16 + $0x38] sm:$0xff] %vm260_vm0, %v965_v3  ;;  %v1301_v6 = vpop.f32.mrb[6].mxu1 }
 0x23e   : > { %1094 = vst.msk [vmem:[%s1966_s16 + $0x30] sm:$0xff] %vm260_vm0, %v960_v4  ;;  %v1045_v12 = vadd.f32 %v1301_v6, %v1959_v5  ;;  %v1039_v7 = vpop.f32.mrb[7].mxu1 }
 0x23f   : > { %v1040_v40 = vadd.f32 %v1959_v5, %v1039_v7 }
 0x240   : > { %1111 = vst.msk [vmem:[%s1966_s16 + $0xb8] sm:$0xff] %vm260_vm0, %v1045_v12 }
 0x241   : > { %1110 = vst.msk [vmem:[%s1966_s16 + $0xb0] sm:$0xff] %vm260_vm0, %v1040_v40 }
 0x242   : > { %v1280_v18 = vpop.f32.mrb[8].mxu0 }
 0x243   : > { %v975_v56 = vadd.f32 %v1280_v18, %v1959_v5  ;;  %v969_v22 = vpop.f32.mrb[9].mxu0 }
 0x244   : > { %v970_v28 = vadd.f32 %v1959_v5, %v969_v22 }
 0x245   : > { %1097 = vst.msk [vmem:[%s1966_s16 + $0x48] sm:$0xff] %vm260_vm0, %v975_v56  ;;  %v1304_v25 = vpop.f32.mrb[8].mxu1 }
 0x246   : > { %1096 = vst.msk [vmem:[%s1966_s16 + $0x40] sm:$0xff] %vm260_vm0, %v970_v28  ;;  %v1055_v27 = vadd.f32 %v1304_v25, %v1959_v5  ;;  %v1049_v32 = vpop.f32.mrb[9].mxu1 }
 0x247   : > { %v1050_v23 = vadd.f32 %v1959_v5, %v1049_v32 }
 0x248   : > { %1113 = vst.msk [vmem:[%s1966_s16 + $0xc8] sm:$0xff] %vm260_vm0, %v1055_v27 }
 0x249   : > { %1112 = vst.msk [vmem:[%s1966_s16 + $0xc0] sm:$0xff] %vm260_vm0, %v1050_v23 }
 0x24a   : > { %v1283_v16 = vpop.f32.mrb[10].mxu0 }
 0x24b   : > { %v985_v13 = vadd.f32 %v1283_v16, %v1959_v5  ;;  %v979_v30 = vpop.f32.mrb[11].mxu0 }
 0x24c   : > { %v980_v15 = vadd.f32 %v1959_v5, %v979_v30 }
 0x24d   : > { %1099 = vst.msk [vmem:[%s1966_s16 + $0x58] sm:$0xff] %vm260_vm0, %v985_v13  ;;  %v1307_v60 = vpop.f32.mrb[10].mxu1 }
 0x24e   : > { %1098 = vst.msk [vmem:[%s1966_s16 + $0x50] sm:$0xff] %vm260_vm0, %v980_v15  ;;  %v1065_v45 = vadd.f32 %v1307_v60, %v1959_v5  ;;  %v1059_v1 = vpop.f32.mrb[11].mxu1 }
 0x24f   : > { %v1060_v47 = vadd.f32 %v1959_v5, %v1059_v1 }
 0x250   : > { %1115 = vst.msk [vmem:[%s1966_s16 + $0xd8] sm:$0xff] %vm260_vm0, %v1065_v45 }
 0x251   : > { %1114 = vst.msk [vmem:[%s1966_s16 + $0xd0] sm:$0xff] %vm260_vm0, %v1060_v47 }
 0x252   : > { %v1286_v61 = vpop.f32.mrb[12].mxu0 }
 0x253   : > { %v995_v2 = vadd.f32 %v1286_v61, %v1959_v5  ;;  %v989_v44 = vpop.f32.mrb[13].mxu0 }
 0x254   : > { %v990_v33 = vadd.f32 %v1959_v5, %v989_v44 }
 0x255   : > { %1101 = vst.msk [vmem:[%s1966_s16 + $0x68] sm:$0xff] %vm260_vm0, %v995_v2  ;;  %v1310_v31 = vpop.f32.mrb[12].mxu1 }
 0x256   : > { %1100 = vst.msk [vmem:[%s1966_s16 + $0x60] sm:$0xff] %vm260_vm0, %v990_v33  ;;  %v1075_v49 = vadd.f32 %v1310_v31, %v1959_v5  ;;  %v1069_v29 = vpop.f32.mrb[13].mxu1 }
 0x257   : > { %v1070_v63 = vadd.f32 %v1959_v5, %v1069_v29 }
 0x258   : > { %1117 = vst.msk [vmem:[%s1966_s16 + $0xe8] sm:$0xff] %vm260_vm0, %v1075_v49 }
 0x259   : > { %1116 = vst.msk [vmem:[%s1966_s16 + $0xe0] sm:$0xff] %vm260_vm0, %v1070_v63 }
 0x25a   : > { %v1289_v34 = vpop.f32.mrb[14].mxu0 }
 0x25b   : > { %v1005_v10 = vadd.f32 %v1289_v34, %v1959_v5  ;;  %v999_v35 = vpop.f32.mrb[15].mxu0 }
 0x25c   : > { %v1000_v39 = vadd.f32 %v1959_v5, %v999_v35 }
 0x25d   : > { %1103 = vst.msk [vmem:[%s1966_s16 + $0x78] sm:$0xff] %vm260_vm0, %v1005_v10  ;;  %v1313_v53 = vpop.f32.mrb[14].mxu1 }
 0x25e   : > { %1102 = vst.msk [vmem:[%s1966_s16 + $0x70] sm:$0xff] %vm260_vm0, %v1000_v39  ;;  %v1085_v42 = vadd.f32 %v1313_v53, %v1959_v5  ;;  %v1079_v19 = vpop.f32.mrb[15].mxu1 }
 0x25f   : > { %v1080_v57 = vadd.f32 %v1959_v5, %v1079_v19 }
 0x260   : > { %1119 = vst.msk [vmem:[%s1966_s16 + $0xf8] sm:$0xff] %vm260_vm0, %v1085_v42 }
 0x261   : > { %1118 = vst.msk [vmem:[%s1966_s16 + $0xf0] sm:$0xff] %vm260_vm0, %v1080_v57 }
 0x262 PF: > { %s15_s18 = sadd.s32 1, %s1404_s18  }
 0x263   : > { %p12_p4 = scmp.ge.s32.totalorder %s15_s18, 4  }
 0x265   :  { %14 = sbr.rel (!%p12_p4) target bundleno = 1 (0x1), region = 70 }

// kernel: spatial_incep_attention.9
= control target key start
LH: loop header
LB: loop body
LE: loop exit
PB: predicated region body
PF: predicated region fallthrough
CT: control target
= control target key end

     0   :  { %s1118_s12 = smov 0   ;;  %s1120_s13 = smov 0   ;;  %s1416_s0 = inlined_call_operand.vmem [shape: f32[512,32], index: 0, kind: input, shape index: {}]   ;;  %s1417_s1 = inlined_call_operand.vmem [shape: f32[32,32], index: 1, kind: input, shape index: {}]   ;;  %s1418_s2 = inlined_call_operand.vmem [shape: f32[1,32], index: 2, kind: input, shape index: {}]   ;;  %s1419_s3 = inlined_call_operand.vmem [shape: f32[512,32], index: 3, kind: output, shape index: {}]  }
   0x1   :  { %s1122_s14 = smov 0  }
   0x2 LB: > { %s25_s15 = sadd.s32 1, %s1091_s13  ;;  %p904_p0 = scmp.ge.s32.totalorder %s1095_s14, 1  ;;  %s1095_s14 = sphi %s1122_s14, %s13_s14   ;;  %s1091_s13 = sphi %s1120_s13, %s1422_s13   ;;  %s1087_s12 = sphi %s1118_s12, %s1421_s12  }
   0x3   : > { %p27_p1 = scmp.ge.s32.totalorder %s25_s15, 2  ;;  %p166_p2 = scmp.lt.s32.totalorder %s1095_s14, 3 }
   0x5   : > { %s1424_s15 = smov (%p27_p1, %s25_s15), 0  ;;  %p167_p3 = pnand %p904_p0, %p166_p2 }
   0x6   : > { %v320_v0 = vld [vmem:[%s1417_s1] sm:$0xff] (!%p167_p3)  ;;  %v321_v1 = vld [vmem:[%s1417_s1 + $0x8] sm:$0xff] (!%p167_p3)  ;;  %v322_v2 = vld [vmem:[%s1417_s1 + $0x10] sm:$0xff] (!%p167_p3)  ;;  %s905_s22 = sshll.u32 (!%p167_p3), %s1087_s12, 5  ;;  %vm223_vm0 = vcmask (!%p167_p3), 261120   ;;  %v1097_v5 = vmov (!%p167_p3), 0.0  }
   0x7   : > { %170 = sbr.rel (%p167_p3) target bundleno = 274 (0x112), region = 32  ;;  %v1036_v3 = vpack.c.bf16 (!%p167_p3), %v321_v1, %v320_v0  ;;  %v323_v4 = vld [vmem:[%s1417_s1 + $0x18] sm:$0xff] (!%p167_p3)  ;;  %p1153_p4 = scmp.lt.s32.totalorder (!%p167_p3), %s905_s22, 63  ;;  %225 = vst.msk [vmem:[#allocation2 + $0x8] sm:$0xff] (!%p167_p3), %vm223_vm0, %v1097_v5  ;;  %224 = vst.msk [vmem:[#allocation2] sm:$0xff] (!%p167_p3), %vm223_vm0, %v1097_v5 }
   0x8   : > { %226 = vst.msk [vmem:[#allocation2 + $0x10] sm:$0xff] (!%p167_p3), %vm223_vm0, %v1097_v5  ;;  %227 = vst.msk [vmem:[#allocation2 + $0x18] sm:$0xff] (!%p167_p3), %vm223_vm0, %v1097_v5  ;;  %v1040_v6 = vpack.c.bf16 (!%p167_p3), %v323_v4, %v322_v2 }
   0x9   : > { %228 = vst.msk [vmem:[#allocation2 + $0x20] sm:$0xff] (!%p167_p3), %vm223_vm0, %v1097_v5  ;;  %229 = vst.msk [vmem:[#allocation2 + $0x28] sm:$0xff] (!%p167_p3), %vm223_vm0, %v1097_v5  ;;  %1037 = vmatprep.subr.bf16.mxu0 (!%p167_p3), %v1036_v3  ;;  %1044 = vmatprep.subr.bf16.mxu1 (!%p167_p3), %v1036_v3 }
   0xa   : > { %230 = vst.msk [vmem:[#allocation2 + $0x30] sm:$0xff] (!%p167_p3), %vm223_vm0, %v1097_v5  ;;  %231 = vst.msk [vmem:[#allocation2 + $0x38] sm:$0xff] (!%p167_p3), %vm223_vm0, %v1097_v5  ;;  %1039 = vmatpush3.bf16.msra.mxu0 (!%p167_p3), %v1036_v3  ;;  %1046 = vmatpush3.bf16.msra.mxu1 (!%p167_p3), %v1036_v3  ;;  %v1276_v3 = vld [vmem:[%s1418_s2] ss:$0 sm:$0xff] (!%p167_p3) }
   0xb   : > { %232 = vst.msk [vmem:[#allocation2 + $0x40] sm:$0xff] (!%p167_p3), %vm223_vm0, %v1097_v5  ;;  %233 = vst.msk [vmem:[#allocation2 + $0x48] sm:$0xff] (!%p167_p3), %vm223_vm0, %v1097_v5  ;;  %1041 = vmatprep.subr.bf16.mxu0 (!%p167_p3), %v1040_v6  ;;  %1045 = vmatprep.subr.bf16.mxu1 (!%p167_p3), %v1040_v6 }
   0xc   : > { %234 = vst.msk [vmem:[#allocation2 + $0x50] sm:$0xff] (!%p167_p3), %vm223_vm0, %v1097_v5  ;;  %235 = vst.msk [vmem:[#allocation2 + $0x58] sm:$0xff] (!%p167_p3), %vm223_vm0, %v1097_v5 }
   0xd   : > { %236 = vst.msk [vmem:[#allocation2 + $0x60] sm:$0xff] (!%p167_p3), %vm223_vm0, %v1097_v5  ;;  %237 = vst.msk [vmem:[#allocation2 + $0x68] sm:$0xff] (!%p167_p3), %vm223_vm0, %v1097_v5 }
   0xe   : > { %238 = vst.msk [vmem:[#allocation2 + $0x70] sm:$0xff] %vm223_vm0, %v1097_v5  ;;  %239 = vst.msk [vmem:[#allocation2 + $0x78] sm:$0xff] %vm223_vm0, %v1097_v5  ;;  %s1426_s22 = smov (!%p1153_p4, %s905_s22), 63  ;;  %1043 = vmatpush3.bf16.msra.mxu0 %v1040_v6  ;;  %1047 = vmatpush3.bf16.msra.mxu1 %v1040_v6  ;;  %v257_v39 = vld [vmem:[#allocation2 + $0x8] sm:$0xff]  ;;  %v256_v41 = vld [vmem:[#allocation2] sm:$0xff] }
   0xf   : > { %240 = vst.msk [vmem:[#allocation2 + $0x80] sm:$0xff] %vm223_vm0, %v1097_v5  ;;  %241 = vst.msk [vmem:[#allocation2 + $0x88] sm:$0xff] %vm223_vm0, %v1097_v5  ;;  %s906_s26 = sshll.u32 %s1426_s22, 3  ;;  %v259_v51 = vld [vmem:[#allocation2 + $0x18] sm:$0xff]  ;;  %v258_v53 = vld [vmem:[#allocation2 + $0x10] sm:$0xff] }
  0x10   : > { %242 = vst.msk [vmem:[#allocation2 + $0x90] sm:$0xff] %vm223_vm0, %v1097_v5  ;;  %243 = vst.msk [vmem:[#allocation2 + $0x98] sm:$0xff] %vm223_vm0, %v1097_v5  ;;  %s1201_s29 = scalar_lea.vmem %s1416_s0, %s906_s26  ;;  %v261_v63 = vld [vmem:[#allocation2 + $0x28] sm:$0xff]  ;;  %v260_v1 = vld [vmem:[#allocation2 + $0x20] sm:$0xff]  ;;  %s1285_s7 = scalar_lea.vmem %s1419_s3, %s906_s26 }
  0x11   : > { %244 = vst.msk [vmem:[#allocation2 + $0xa0] sm:$0xff] %vm223_vm0, %v1097_v5  ;;  %245 = vst.msk [vmem:[#allocation2 + $0xa8] sm:$0xff] %vm223_vm0, %v1097_v5  ;;  %v288_v7 = vld [vmem:[%s1201_s29] sm:$0xff]  ;;  %v289_v9 = vld [vmem:[%s1201_s29 + $0x8] sm:$0xff] }
  0x12   : > { %246 = vst.msk [vmem:[#allocation2 + $0xb0] sm:$0xff] %vm223_vm0, %v1097_v5  ;;  %247 = vst.msk [vmem:[#allocation2 + $0xb8] sm:$0xff] %vm223_vm0, %v1097_v5  ;;  %v304_v8 = vld [vmem:[%s1201_s29 + $0x80] sm:$0xff]  ;;  %v305_v10 = vld [vmem:[%s1201_s29 + $0x88] sm:$0xff]  ;;  %988 = vmatprep.mubr.msk.f32.mxu0 %vm223_vm0, %v288_v7 }
  0x13   : > { %248 = vst.msk [vmem:[#allocation2 + $0xc0] sm:$0xff] %vm223_vm0, %v1097_v5  ;;  %249 = vst.msk [vmem:[#allocation2 + $0xc8] sm:$0xff] %vm223_vm0, %v1097_v5  ;;  %1012 = vmatprep.mubr.msk.f32.mxu1 %vm223_vm0, %v304_v8  ;;  %v290_v11 = vld [vmem:[%s1201_s29 + $0x10] sm:$0xff]  ;;  %989 = vmatmul.mubr.msk.f32.vlgmr.msra.gmra.mrb[0].mxu0 %vm223_vm0, %v289_v9  ;;  %v291_v13 = vld [vmem:[%s1201_s29 + $0x18] sm:$0xff] }
  0x14   : > { %250 = vst.msk [vmem:[#allocation2 + $0xd0] sm:$0xff] %vm223_vm0, %v1097_v5  ;;  %251 = vst.msk [vmem:[#allocation2 + $0xd8] sm:$0xff] %vm223_vm0, %v1097_v5  ;;  %v306_v12 = vld [vmem:[%s1201_s29 + $0x90] sm:$0xff]  ;;  %1013 = vmatmul.mubr.msk.f32.vlgmr.msra.gmra.mrb[0].mxu1 %vm223_vm0, %v305_v10  ;;  %991 = vmatprep.mubr.msk.f32.mxu0 %vm223_vm0, %v290_v11  ;;  %v307_v14 = vld [vmem:[%s1201_s29 + $0x98] sm:$0xff] }
  0x15   : > { %252 = vst.msk [vmem:[#allocation2 + $0xe0] sm:$0xff] %vm223_vm0, %v1097_v5  ;;  %253 = vst.msk [vmem:[#allocation2 + $0xe8] sm:$0xff] %vm223_vm0, %v1097_v5  ;;  %1015 = vmatprep.mubr.msk.f32.mxu1 %vm223_vm0, %v306_v12  ;;  %v292_v15 = vld [vmem:[%s1201_s29 + $0x20] sm:$0xff]  ;;  %v293_v17 = vld [vmem:[%s1201_s29 + $0x28] sm:$0xff] }
  0x16   : > { %254 = vst.msk [vmem:[#allocation2 + $0xf0] sm:$0xff] %vm223_vm0, %v1097_v5  ;;  %255 = vst.msk [vmem:[#allocation2 + $0xf8] sm:$0xff] %vm223_vm0, %v1097_v5  ;;  %v308_v16 = vld [vmem:[%s1201_s29 + $0xa0] sm:$0xff]  ;;  %v309_v18 = vld [vmem:[%s1201_s29 + $0xa8] sm:$0xff] }
  0x17   : > { %992 = vmatmul.mubr.msk.f32.gmra.mrb[2].mxu0 %vm223_vm0, %v291_v13  ;;  %v294_v19 = vld [vmem:[%s1201_s29 + $0x30] sm:$0xff]  ;;  %v295_v21 = vld [vmem:[%s1201_s29 + $0x38] sm:$0xff]  ;;  %v296_v23 = vld [vmem:[%s1201_s29 + $0x40] sm:$0xff] }
  0x18   : > { %1016 = vmatmul.mubr.msk.f32.gmra.mrb[2].mxu1 %vm223_vm0, %v307_v14  ;;  %994 = vmatprep.mubr.msk.f32.mxu0 %vm223_vm0, %v292_v15  ;;  %v310_v20 = vld [vmem:[%s1201_s29 + $0xb0] sm:$0xff]  ;;  %v311_v22 = vld [vmem:[%s1201_s29 + $0xb8] sm:$0xff]  ;;  %v312_v24 = vld [vmem:[%s1201_s29 + $0xc0] sm:$0xff] }
  0x19   : > { %1018 = vmatprep.mubr.msk.f32.mxu1 %vm223_vm0, %v308_v16  ;;  %v297_v25 = vld [vmem:[%s1201_s29 + $0x48] sm:$0xff]  ;;  %v298_v27 = vld [vmem:[%s1201_s29 + $0x50] sm:$0xff]  ;;  %v299_v29 = vld [vmem:[%s1201_s29 + $0x58] sm:$0xff] }
  0x1a   : > { %v313_v26 = vld [vmem:[%s1201_s29 + $0xc8] sm:$0xff]  ;;  %v314_v28 = vld [vmem:[%s1201_s29 + $0xd0] sm:$0xff]  ;;  %v315_v30 = vld [vmem:[%s1201_s29 + $0xd8] sm:$0xff] }
  0x1b   : > { %995 = vmatmul.mubr.msk.f32.gmra.mrb[4].mxu0 %vm223_vm0, %v293_v17  ;;  %v300_v31 = vld [vmem:[%s1201_s29 + $0x60] sm:$0xff]  ;;  %v301_v33 = vld [vmem:[%s1201_s29 + $0x68] sm:$0xff]  ;;  %v302_v35 = vld [vmem:[%s1201_s29 + $0x70] sm:$0xff] }
  0x1c   : > { %1019 = vmatmul.mubr.msk.f32.gmra.mrb[4].mxu1 %vm223_vm0, %v309_v18  ;;  %997 = vmatprep.mubr.msk.f32.mxu0 %vm223_vm0, %v294_v19  ;;  %v316_v32 = vld [vmem:[%s1201_s29 + $0xe0] sm:$0xff]  ;;  %v317_v34 = vld [vmem:[%s1201_s29 + $0xe8] sm:$0xff]  ;;  %v318_v36 = vld [vmem:[%s1201_s29 + $0xf0] sm:$0xff] }
  0x1d   : > { %1021 = vmatprep.mubr.msk.f32.mxu1 %vm223_vm0, %v310_v20  ;;  %v303_v37 = vld [vmem:[%s1201_s29 + $0x78] sm:$0xff]  ;;  %v273_v40 = vld [vmem:[#allocation2 + $0x88] sm:$0xff]  ;;  %v272_v42 = vld [vmem:[#allocation2 + $0x80] sm:$0xff] }
  0x1e   : > { %v319_v38 = vld [vmem:[%s1201_s29 + $0xf8] sm:$0xff]  ;;  %v274_v54 = vld [vmem:[#allocation2 + $0x90] sm:$0xff]  ;;  %v277_v0 = vld [vmem:[#allocation2 + $0xa8] sm:$0xff] }
  0x1f   : > { %998 = vmatmul.mubr.msk.f32.gmra.mrb[6].mxu0 %vm223_vm0, %v295_v21  ;;  %v275_v52 = vld [vmem:[#allocation2 + $0x98] sm:$0xff]  ;;  %v276_v2 = vld [vmem:[#allocation2 + $0xa0] sm:$0xff]  ;;  %v262_v16 = vld [vmem:[#allocation2 + $0x30] sm:$0xff] }
  0x20   : > { %1022 = vmatmul.mubr.msk.f32.gmra.mrb[6].mxu1 %vm223_vm0, %v311_v22  ;;  %1000 = vmatprep.mubr.msk.f32.mxu0 %vm223_vm0, %v296_v23  ;;  %v263_v10 = vld [vmem:[#allocation2 + $0x38] sm:$0xff]  ;;  %v278_v21 = vld [vmem:[#allocation2 + $0xb0] sm:$0xff] }
  0x21   : > { %1024 = vmatprep.mubr.msk.f32.mxu1 %vm223_vm0, %v312_v24  ;;  %v279_v11 = vld [vmem:[#allocation2 + $0xb8] sm:$0xff] }
  0x23   : > { %1001 = vmatmul.mubr.msk.f32.gmra.mrb[8].mxu0 %vm223_vm0, %v297_v25 }
  0x24   : > { %1025 = vmatmul.mubr.msk.f32.gmra.mrb[8].mxu1 %vm223_vm0, %v313_v26  ;;  %1003 = vmatprep.mubr.msk.f32.mxu0 %vm223_vm0, %v298_v27 }
  0x25   : > { %1027 = vmatprep.mubr.msk.f32.mxu1 %vm223_vm0, %v314_v28 }
  0x27   : > { %1004 = vmatmul.mubr.msk.f32.gmra.mrb[10].mxu0 %vm223_vm0, %v299_v29 }
  0x28   : > { %1028 = vmatmul.mubr.msk.f32.gmra.mrb[10].mxu1 %vm223_vm0, %v315_v30  ;;  %1006 = vmatprep.mubr.msk.f32.mxu0 %vm223_vm0, %v300_v31  ;;  %v265_v30 = vld [vmem:[#allocation2 + $0x48] sm:$0xff] }
  0x29   : > { %1030 = vmatprep.mubr.msk.f32.mxu1 %vm223_vm0, %v316_v32  ;;  %v281_v31 = vld [vmem:[#allocation2 + $0xc8] sm:$0xff] }
  0x2b   : > { %1007 = vmatmul.mubr.msk.f32.gmra.mrb[12].mxu0 %vm223_vm0, %v301_v33 }
  0x2c   : > { %1031 = vmatmul.mubr.msk.f32.gmra.mrb[12].mxu1 %vm223_vm0, %v317_v34  ;;  %1009 = vmatprep.mubr.msk.f32.mxu0 %vm223_vm0, %v302_v35 }
  0x2d   : > { %1033 = vmatprep.mubr.msk.f32.mxu1 %vm223_vm0, %v318_v36  ;;  %v264_v36 = vld [vmem:[#allocation2 + $0x40] sm:$0xff] }
  0x2f   : > { %1010 = vmatmul.mubr.msk.f32.gmra.mrb[14].mxu0 %vm223_vm0, %v303_v37 }
  0x30   : > { %1034 = vmatmul.mubr.msk.f32.gmra.mrb[14].mxu1 %vm223_vm0, %v319_v38 }
  0xe6   : > { %v990_v43 = vpop.f32.mrb[0].mxu0 }
  0xe7   : > { %v1014_v44 = vpop.f32.mrb[0].mxu1  ;;  %v647_v45 = vadd.f32 %v990_v43, %v257_v39  ;;  %v487_v47 = vpop.f32.mrb[1].mxu0 }
  0xe8   : > { %v663_v46 = vadd.f32 %v1014_v44, %v273_v40  ;;  %v567_v48 = vpop.f32.mrb[1].mxu1  ;;  %v646_v49 = vadd.f32 %v487_v47, %v256_v41  ;;  %v280_v41 = vld [vmem:[#allocation2 + $0xc0] sm:$0xff] }
  0xe9   : > { %v662_v50 = vadd.f32 %v567_v48, %v272_v42  ;;  %679 = vst.msk [vmem:[#allocation2 + $0x8] sm:$0xff] %vm223_vm0, %v647_v45 }
  0xea   : > { %695 = vst.msk [vmem:[#allocation2 + $0x88] sm:$0xff] %vm223_vm0, %v663_v46  ;;  %678 = vst.msk [vmem:[#allocation2] sm:$0xff] %vm223_vm0, %v646_v49  ;;  %v993_v55 = vpop.f32.mrb[2].mxu0 }
  0xeb   : > { %694 = vst.msk [vmem:[#allocation2 + $0x80] sm:$0xff] %vm223_vm0, %v662_v50  ;;  %v1017_v56 = vpop.f32.mrb[2].mxu1  ;;  %v649_v57 = vadd.f32 %v993_v55, %v259_v51  ;;  %v497_v59 = vpop.f32.mrb[3].mxu0  ;;  %v267_v50 = vld [vmem:[#allocation2 + $0x58] sm:$0xff] }
  0xec   : > { %v665_v58 = vadd.f32 %v1017_v56, %v275_v52  ;;  %v577_v60 = vpop.f32.mrb[3].mxu1  ;;  %v648_v61 = vadd.f32 %v497_v59, %v258_v53  ;;  %v283_v51 = vld [vmem:[#allocation2 + $0xd8] sm:$0xff]  ;;  %v266_v56 = vld [vmem:[#allocation2 + $0x50] sm:$0xff] }
  0xed   : > { %v664_v62 = vadd.f32 %v577_v60, %v274_v54  ;;  %681 = vst.msk [vmem:[#allocation2 + $0x18] sm:$0xff] %vm223_vm0, %v649_v57 }
  0xee   : > { %697 = vst.msk [vmem:[#allocation2 + $0x98] sm:$0xff] %vm223_vm0, %v665_v58  ;;  %680 = vst.msk [vmem:[#allocation2 + $0x10] sm:$0xff] %vm223_vm0, %v648_v61  ;;  %v996_v4 = vpop.f32.mrb[4].mxu0  ;;  %v282_v61 = vld [vmem:[#allocation2 + $0xd0] sm:$0xff] }
  0xef   : > { %696 = vst.msk [vmem:[#allocation2 + $0x90] sm:$0xff] %vm223_vm0, %v664_v62  ;;  %v1020_v5 = vpop.f32.mrb[4].mxu1  ;;  %v651_v6 = vadd.f32 %v996_v4, %v261_v63  ;;  %v507_v8 = vpop.f32.mrb[5].mxu0 }
  0xf0   : > { %v667_v7 = vadd.f32 %v1020_v5, %v277_v0  ;;  %v587_v9 = vpop.f32.mrb[5].mxu1  ;;  %v714_v12 = vld [vmem:[#allocation2 + $0x8] sm:$0xff]  ;;  %v650_v14 = vadd.f32 %v507_v8, %v260_v1 }
  0xf1   : > { %v730_v13 = vld [vmem:[#allocation2 + $0x88] sm:$0xff]  ;;  %v666_v15 = vadd.f32 %v587_v9, %v276_v2  ;;  %v753_v17 = vadd.f32 %v1276_v3, %v714_v12  ;;  %v713_v19 = vld [vmem:[#allocation2] sm:$0xff]  ;;  %683 = vst.msk [vmem:[#allocation2 + $0x28] sm:$0xff] %vm223_vm0, %v651_v6 }
  0xf2   : > { %v769_v18 = vadd.f32 %v1276_v3, %v730_v13  ;;  %v729_v20 = vld [vmem:[#allocation2 + $0x80] sm:$0xff]  ;;  %699 = vst.msk [vmem:[#allocation2 + $0xa8] sm:$0xff] %vm223_vm0, %v667_v7  ;;  %v752_v22 = vadd.f32 %v1276_v3, %v713_v19  ;;  %682 = vst.msk [vmem:[#allocation2 + $0x20] sm:$0xff] %vm223_vm0, %v650_v14  ;;  %v999_v24 = vpop.f32.mrb[6].mxu0  ;;  %v269_v7 = vld [vmem:[#allocation2 + $0x68] sm:$0xff] }
  0xf3   : > { %v768_v23 = vadd.f32 %v1276_v3, %v729_v20  ;;  %698 = vst.msk [vmem:[#allocation2 + $0xa0] sm:$0xff] %vm223_vm0, %v666_v15  ;;  %v1023_v25 = vpop.f32.mrb[6].mxu1  ;;  %785 = vst.msk [vmem:[%s1285_s7 + $0x8] sm:$0xff] %vm223_vm0, %v753_v17  ;;  %v653_v26 = vadd.f32 %v999_v24, %v263_v10  ;;  %v517_v28 = vpop.f32.mrb[7].mxu0  ;;  %v285_v8 = vld [vmem:[#allocation2 + $0xe8] sm:$0xff]  ;;  %v268_v13 = vld [vmem:[#allocation2 + $0x60] sm:$0xff] }
  0xf4   : > { %801 = vst.msk [vmem:[%s1285_s7 + $0x88] sm:$0xff] %vm223_vm0, %v769_v18  ;;  %v669_v27 = vadd.f32 %v1023_v25, %v279_v11  ;;  %v597_v29 = vpop.f32.mrb[7].mxu1  ;;  %784 = vst.msk [vmem:[%s1285_s7] sm:$0xff] %vm223_vm0, %v752_v22  ;;  %v716_v32 = vld [vmem:[#allocation2 + $0x18] sm:$0xff]  ;;  %v652_v34 = vadd.f32 %v517_v28, %v262_v16  ;;  %v284_v18 = vld [vmem:[#allocation2 + $0xe0] sm:$0xff] }
  0xf5   : > { %800 = vst.msk [vmem:[%s1285_s7 + $0x80] sm:$0xff] %vm223_vm0, %v768_v23  ;;  %v732_v33 = vld [vmem:[#allocation2 + $0x98] sm:$0xff]  ;;  %v668_v35 = vadd.f32 %v597_v29, %v278_v21  ;;  %v755_v37 = vadd.f32 %v1276_v3, %v716_v32  ;;  %v715_v39 = vld [vmem:[#allocation2 + $0x10] sm:$0xff]  ;;  %685 = vst.msk [vmem:[#allocation2 + $0x38] sm:$0xff] %vm223_vm0, %v653_v26 }
  0xf6   : > { %v771_v38 = vadd.f32 %v1276_v3, %v732_v33  ;;  %v731_v40 = vld [vmem:[#allocation2 + $0x90] sm:$0xff]  ;;  %701 = vst.msk [vmem:[#allocation2 + $0xb8] sm:$0xff] %vm223_vm0, %v669_v27  ;;  %v754_v42 = vadd.f32 %v1276_v3, %v715_v39  ;;  %684 = vst.msk [vmem:[#allocation2 + $0x30] sm:$0xff] %vm223_vm0, %v652_v34  ;;  %v1002_v44 = vpop.f32.mrb[8].mxu0  ;;  %v271_v27 = vld [vmem:[#allocation2 + $0x78] sm:$0xff] }
  0xf7   : > { %v770_v43 = vadd.f32 %v1276_v3, %v731_v40  ;;  %700 = vst.msk [vmem:[#allocation2 + $0xb0] sm:$0xff] %vm223_vm0, %v668_v35  ;;  %v1026_v45 = vpop.f32.mrb[8].mxu1  ;;  %787 = vst.msk [vmem:[%s1285_s7 + $0x18] sm:$0xff] %vm223_vm0, %v755_v37  ;;  %v655_v46 = vadd.f32 %v1002_v44, %v265_v30  ;;  %v527_v48 = vpop.f32.mrb[9].mxu0  ;;  %v287_v28 = vld [vmem:[#allocation2 + $0xf8] sm:$0xff]  ;;  %v270_v33 = vld [vmem:[#allocation2 + $0x70] sm:$0xff] }
  0xf8   : > { %803 = vst.msk [vmem:[%s1285_s7 + $0x98] sm:$0xff] %vm223_vm0, %v771_v38  ;;  %v671_v47 = vadd.f32 %v1026_v45, %v281_v31  ;;  %v607_v49 = vpop.f32.mrb[9].mxu1  ;;  %786 = vst.msk [vmem:[%s1285_s7 + $0x10] sm:$0xff] %vm223_vm0, %v754_v42  ;;  %v718_v52 = vld [vmem:[#allocation2 + $0x28] sm:$0xff]  ;;  %v654_v54 = vadd.f32 %v527_v48, %v264_v36  ;;  %v286_v38 = vld [vmem:[#allocation2 + $0xf0] sm:$0xff] }
  0xf9   : > { %802 = vst.msk [vmem:[%s1285_s7 + $0x90] sm:$0xff] %vm223_vm0, %v770_v43  ;;  %v734_v53 = vld [vmem:[#allocation2 + $0xa8] sm:$0xff]  ;;  %v670_v55 = vadd.f32 %v607_v49, %v280_v41  ;;  %v757_v57 = vadd.f32 %v1276_v3, %v718_v52  ;;  %v717_v59 = vld [vmem:[#allocation2 + $0x20] sm:$0xff]  ;;  %687 = vst.msk [vmem:[#allocation2 + $0x48] sm:$0xff] %vm223_vm0, %v655_v46 }
  0xfa   : > { %v773_v58 = vadd.f32 %v1276_v3, %v734_v53  ;;  %v733_v60 = vld [vmem:[#allocation2 + $0xa0] sm:$0xff]  ;;  %703 = vst.msk [vmem:[#allocation2 + $0xc8] sm:$0xff] %vm223_vm0, %v671_v47  ;;  %v756_v62 = vadd.f32 %v1276_v3, %v717_v59  ;;  %686 = vst.msk [vmem:[#allocation2 + $0x40] sm:$0xff] %vm223_vm0, %v654_v54  ;;  %v1005_v0 = vpop.f32.mrb[10].mxu0 }
  0xfb   : > { %v772_v63 = vadd.f32 %v1276_v3, %v733_v60  ;;  %702 = vst.msk [vmem:[#allocation2 + $0xc0] sm:$0xff] %vm223_vm0, %v670_v55  ;;  %v1029_v1 = vpop.f32.mrb[10].mxu1  ;;  %789 = vst.msk [vmem:[%s1285_s7 + $0x28] sm:$0xff] %vm223_vm0, %v757_v57  ;;  %v657_v2 = vadd.f32 %v1005_v0, %v267_v50  ;;  %v537_v5 = vpop.f32.mrb[11].mxu0 }
  0xfc   : > { %805 = vst.msk [vmem:[%s1285_s7 + $0xa8] sm:$0xff] %vm223_vm0, %v773_v58  ;;  %v673_v4 = vadd.f32 %v1029_v1, %v283_v51  ;;  %v617_v6 = vpop.f32.mrb[11].mxu1  ;;  %788 = vst.msk [vmem:[%s1285_s7 + $0x20] sm:$0xff] %vm223_vm0, %v756_v62  ;;  %v720_v9 = vld [vmem:[#allocation2 + $0x38] sm:$0xff]  ;;  %v656_v11 = vadd.f32 %v537_v5, %v266_v56 }
  0xfd   : > { %804 = vst.msk [vmem:[%s1285_s7 + $0xa0] sm:$0xff] %vm223_vm0, %v772_v63  ;;  %v736_v10 = vld [vmem:[#allocation2 + $0xb8] sm:$0xff]  ;;  %v672_v12 = vadd.f32 %v617_v6, %v282_v61  ;;  %v759_v14 = vadd.f32 %v1276_v3, %v720_v9  ;;  %v719_v16 = vld [vmem:[#allocation2 + $0x30] sm:$0xff]  ;;  %689 = vst.msk [vmem:[#allocation2 + $0x58] sm:$0xff] %vm223_vm0, %v657_v2 }
  0xfe   : > { %v775_v15 = vadd.f32 %v1276_v3, %v736_v10  ;;  %v735_v17 = vld [vmem:[#allocation2 + $0xb0] sm:$0xff]  ;;  %705 = vst.msk [vmem:[#allocation2 + $0xd8] sm:$0xff] %vm223_vm0, %v673_v4  ;;  %v758_v19 = vadd.f32 %v1276_v3, %v719_v16  ;;  %688 = vst.msk [vmem:[#allocation2 + $0x50] sm:$0xff] %vm223_vm0, %v656_v11  ;;  %v1008_v21 = vpop.f32.mrb[12].mxu0 }
  0xff   : > { %v774_v20 = vadd.f32 %v1276_v3, %v735_v17  ;;  %704 = vst.msk [vmem:[#allocation2 + $0xd0] sm:$0xff] %vm223_vm0, %v672_v12  ;;  %v1032_v22 = vpop.f32.mrb[12].mxu1  ;;  %791 = vst.msk [vmem:[%s1285_s7 + $0x38] sm:$0xff] %vm223_vm0, %v759_v14  ;;  %v659_v23 = vadd.f32 %v1008_v21, %v269_v7  ;;  %v547_v25 = vpop.f32.mrb[13].mxu0 }
 0x100   : > { %807 = vst.msk [vmem:[%s1285_s7 + $0xb8] sm:$0xff] %vm223_vm0, %v775_v15  ;;  %v675_v24 = vadd.f32 %v1032_v22, %v285_v8  ;;  %v627_v26 = vpop.f32.mrb[13].mxu1  ;;  %790 = vst.msk [vmem:[%s1285_s7 + $0x30] sm:$0xff] %vm223_vm0, %v758_v19  ;;  %v722_v29 = vld [vmem:[#allocation2 + $0x48] sm:$0xff]  ;;  %v658_v31 = vadd.f32 %v547_v25, %v268_v13 }
 0x101   : > { %806 = vst.msk [vmem:[%s1285_s7 + $0xb0] sm:$0xff] %vm223_vm0, %v774_v20  ;;  %v738_v30 = vld [vmem:[#allocation2 + $0xc8] sm:$0xff]  ;;  %v674_v32 = vadd.f32 %v627_v26, %v284_v18  ;;  %v761_v34 = vadd.f32 %v1276_v3, %v722_v29  ;;  %v721_v36 = vld [vmem:[#allocation2 + $0x40] sm:$0xff]  ;;  %691 = vst.msk [vmem:[#allocation2 + $0x68] sm:$0xff] %vm223_vm0, %v659_v23 }
 0x102   : > { %v777_v35 = vadd.f32 %v1276_v3, %v738_v30  ;;  %v737_v37 = vld [vmem:[#allocation2 + $0xc0] sm:$0xff]  ;;  %707 = vst.msk [vmem:[#allocation2 + $0xe8] sm:$0xff] %vm223_vm0, %v675_v24  ;;  %v760_v39 = vadd.f32 %v1276_v3, %v721_v36  ;;  %690 = vst.msk [vmem:[#allocation2 + $0x60] sm:$0xff] %vm223_vm0, %v658_v31  ;;  %v1011_v41 = vpop.f32.mrb[14].mxu0 }
 0x103   : > { %v776_v40 = vadd.f32 %v1276_v3, %v737_v37  ;;  %706 = vst.msk [vmem:[#allocation2 + $0xe0] sm:$0xff] %vm223_vm0, %v674_v32  ;;  %v1035_v42 = vpop.f32.mrb[14].mxu1  ;;  %793 = vst.msk [vmem:[%s1285_s7 + $0x48] sm:$0xff] %vm223_vm0, %v761_v34  ;;  %v661_v43 = vadd.f32 %v1011_v41, %v271_v27  ;;  %v557_v45 = vpop.f32.mrb[15].mxu0 }
 0x104   : > { %809 = vst.msk [vmem:[%s1285_s7 + $0xc8] sm:$0xff] %vm223_vm0, %v777_v35  ;;  %v677_v44 = vadd.f32 %v1035_v42, %v287_v28  ;;  %v637_v46 = vpop.f32.mrb[15].mxu1  ;;  %792 = vst.msk [vmem:[%s1285_s7 + $0x40] sm:$0xff] %vm223_vm0, %v760_v39  ;;  %v724_v47 = vld [vmem:[#allocation2 + $0x58] sm:$0xff]  ;;  %v660_v49 = vadd.f32 %v557_v45, %v270_v33 }
 0x105   : > { %808 = vst.msk [vmem:[%s1285_s7 + $0xc0] sm:$0xff] %vm223_vm0, %v776_v40  ;;  %v740_v48 = vld [vmem:[#allocation2 + $0xd8] sm:$0xff]  ;;  %v676_v50 = vadd.f32 %v637_v46, %v286_v38  ;;  %v763_v51 = vadd.f32 %v1276_v3, %v724_v47  ;;  %v723_v53 = vld [vmem:[#allocation2 + $0x50] sm:$0xff]  ;;  %693 = vst.msk [vmem:[#allocation2 + $0x78] sm:$0xff] %vm223_vm0, %v661_v43 }
 0x106   : > { %v779_v52 = vadd.f32 %v1276_v3, %v740_v48  ;;  %v739_v54 = vld [vmem:[#allocation2 + $0xd0] sm:$0xff]  ;;  %709 = vst.msk [vmem:[#allocation2 + $0xf8] sm:$0xff] %vm223_vm0, %v677_v44  ;;  %v762_v55 = vadd.f32 %v1276_v3, %v723_v53  ;;  %692 = vst.msk [vmem:[#allocation2 + $0x70] sm:$0xff] %vm223_vm0, %v660_v49 }
 0x107   : > { %v778_v56 = vadd.f32 %v1276_v3, %v739_v54  ;;  %708 = vst.msk [vmem:[#allocation2 + $0xf0] sm:$0xff] %vm223_vm0, %v676_v50  ;;  %795 = vst.msk [vmem:[%s1285_s7 + $0x58] sm:$0xff] %vm223_vm0, %v763_v51 }
 0x108   : > { %811 = vst.msk [vmem:[%s1285_s7 + $0xd8] sm:$0xff] %vm223_vm0, %v779_v52  ;;  %794 = vst.msk [vmem:[%s1285_s7 + $0x50] sm:$0xff] %vm223_vm0, %v762_v55  ;;  %v726_v57 = vld [vmem:[#allocation2 + $0x68] sm:$0xff] }
 0x109   : > { %810 = vst.msk [vmem:[%s1285_s7 + $0xd0] sm:$0xff] %vm223_vm0, %v778_v56  ;;  %v742_v58 = vld [vmem:[#allocation2 + $0xe8] sm:$0xff]  ;;  %v765_v59 = vadd.f32 %v1276_v3, %v726_v57  ;;  %v725_v61 = vld [vmem:[#allocation2 + $0x60] sm:$0xff] }
 0x10a   : > { %v781_v60 = vadd.f32 %v1276_v3, %v742_v58  ;;  %v741_v62 = vld [vmem:[#allocation2 + $0xe0] sm:$0xff]  ;;  %v764_v63 = vadd.f32 %v1276_v3, %v725_v61 }
 0x10b   : > { %v780_v0 = vadd.f32 %v1276_v3, %v741_v62  ;;  %797 = vst.msk [vmem:[%s1285_s7 + $0x68] sm:$0xff] %vm223_vm0, %v765_v59 }
 0x10c   : > { %813 = vst.msk [vmem:[%s1285_s7 + $0xe8] sm:$0xff] %vm223_vm0, %v781_v60  ;;  %796 = vst.msk [vmem:[%s1285_s7 + $0x60] sm:$0xff] %vm223_vm0, %v764_v63  ;;  %v728_v1 = vld [vmem:[#allocation2 + $0x78] sm:$0xff] }
 0x10d   : > { %812 = vst.msk [vmem:[%s1285_s7 + $0xe0] sm:$0xff] %vm223_vm0, %v780_v0  ;;  %v744_v2 = vld [vmem:[#allocation2 + $0xf8] sm:$0xff]  ;;  %v767_v4 = vadd.f32 %v1276_v3, %v728_v1  ;;  %v727_v6 = vld [vmem:[#allocation2 + $0x70] sm:$0xff] }
 0x10e   : > { %v783_v5 = vadd.f32 %v1276_v3, %v744_v2  ;;  %v743_v7 = vld [vmem:[#allocation2 + $0xf0] sm:$0xff]  ;;  %v766_v8 = vadd.f32 %v1276_v3, %v727_v6 }
 0x10f   : > { %v782_v9 = vadd.f32 %v1276_v3, %v743_v7  ;;  %799 = vst.msk [vmem:[%s1285_s7 + $0x78] sm:$0xff] %vm223_vm0, %v767_v4 }
 0x110   : > { %815 = vst.msk [vmem:[%s1285_s7 + $0xf8] sm:$0xff] %vm223_vm0, %v783_v5  ;;  %798 = vst.msk [vmem:[%s1285_s7 + $0x70] sm:$0xff] %vm223_vm0, %v766_v8 }
 0x111   : > { %814 = vst.msk [vmem:[%s1285_s7 + $0xf0] sm:$0xff] %vm223_vm0, %v782_v9 }
 0x112 PF: > { %s13_s14 = sadd.s32 1, %s1095_s14   ;;  %s1421_s12 = smov %s1091_s13 }
 0x113   : > { %p10_p5 = scmp.ge.s32.totalorder %s13_s14, 4   ;;  %s1422_s13 = smov %s1424_s15 }
 0x115   :  { %12 = sbr.rel (!%p10_p5) target bundleno = 2 (0x2), region = 73 }

// kernel: spatial_incep_attention.8
= control target key start
LH: loop header
LB: loop body
LE: loop exit
PB: predicated region body
PF: predicated region fallthrough
CT: control target
= control target key end

     0   :  { %8 = vsyncpa [#allocation3], 0  ;;  %s3555_s12 = smov 0   ;;  %s4908_s0 = inlined_call_operand.vmem [shape: f32[2], index: 0, kind: input, shape index: {}]   ;;  %s4909_s1 = inlined_call_operand.vmem [shape: f32[2,256,32], index: 1, kind: input, shape index: {}]   ;;  %s4910_s2 = inlined_call_operand.vmem [shape: f32[2,22,64], index: 2, kind: input, shape index: {}]   ;;  %s4911_s3 = inlined_call_operand.vmem [shape: f32[2,256,32], index: 3, kind: output, shape index: {}]  }
   0x1 LB: > { %s2676_s13 = sadd.s32 4294967295, %s3528_s12   ;;  %p2678_p0 = scmp.ge.s32.totalorder %s3528_s12, 1  ;;  %s3528_s12 = sphi %s3555_s12, %s14_s12  }
   0x2   : > { %p118_p1 = scmp.lt.s32.totalorder %s3528_s12, 3  ;;  %s131_s16 = sshll.u32 %s4908_s0, 4  ;;  %s132_s16 = int_to_ptr.vmem [resolvable:$true] %s131_s16 }
   0x3   : > { %p3214_p3 = scmp.eq.s32.totalorder %s2676_s13, 0  ;;  %s3503_s18 = scalar_lea.vmem %s132_s16, 16 }
   0x4   : > { %p3566_p2 = pnand %p2678_p0, %p118_p1  ;;  %p3504_p6 = scmp.ne.s32.totalorder %s132_s16, %s3503_s18 }
   0x5   : > { %p3511_p10 = scmp.lt.s32.totalorder %s132_s16, %s132_s16  ;;  %p3512_p11 = scmp.lt.s32.totalorder %s3503_s18, %s3503_s18 }
   0x6   : > { %p3210_p4 = pneg %p3566_p2 }
   0x7   : > { %p3513_p12 = por %p3512_p11, %p3511_p10 }
   0x8   : > { %p3211_p5 = pnand %p3214_p3, %p3210_p4 }
   0xa   : > { %p3505_p7 = pneg %p3211_p5 }
   0xc   : > { %p3506_p8 = pnand %p3505_p7, %p3504_p6 }
   0xe   : > { %p3507_p9 = pneg %p3506_p8 }
  0x10   : > { %p3514_p13 = pnand %p3513_p12, %p3507_p9 }
  0x12   : > { %3517 = shalt.err (!%p3514_p13)
}
  0x13   : > { %s3530_s19 = smov [#allocation2]   ;;  %160 = sbr.rel (%p3566_p2) target bundleno = 1632 (0x660), region = 32 }
  0x14   : > { %3213 = dma.vmem_to_smem (!%p3211_p5), %s132_s16, 16, %s3530_s19, [#allocation3]  }
  0x1a   : > { %3523 = dma.done.wait (%p3214_p3), [#allocation3], 16  }
  0x1b   : > { %3525 = vsyncadd (%p3214_p3), [#allocation3], 4294967280 }
  0x1c   : > { %166 = sfence }
  0x1d   : > { %p190_p0 = scmp.lt.s32.totalorder %s2676_s13, 1  ;;  %s240_s20 = sld [smem:[#allocation2]]  ;;  %vm274_vm0 = vcmask 130048   ;;  %v4931_v4 = vmov 0  ;;  %vm605_vm2 = vcmask 179200   ;;  %vm1062_vm3 = vcmask 1045504  }
  0x1e   : > { %vm3606_vm1 = vmpackc.low %vm274_vm0, %vm274_vm0  ;;  %s3531_s29 = smov 96   ;;  %s2756_s30 = sld [smem:[#allocation2 + $0x1]]  ;;  %vm2564_vm4 = vcmask 261120  }
  0x1f   : > { %s5000_s13 = smov (!%p190_p0, %s2676_s13), 1  ;;  %v4932_v4 = vsel %vm3606_vm1, 4294967295, %v4931_v4  ;;  %s3532_s4 = smov 112  }
  0x20   : > { %s2827_s21 = sshll.u32 %s5000_s13, 8  ;;  %s3205_s22 = smul.u32 24, %s5000_s13  ;;  %4933 = vst [vmem:[#allocation5_spill] sm:$0xff] %v4932_v4 }
  0x21   : > { %s3586_s25 = scalar_lea.vmem %s4909_s1, %s2827_s21  ;;  %s3533_s5 = smov 80  }
  0x22   : > { %s3591_s28 = scalar_lea.vmem %s4910_s2, %s3205_s22  ;;  %v3594_v0 = vld [vmem:[%s3586_s25] sm:$0xff]  ;;  %v3625_v8 = vld [vmem:[%s3586_s25 + $0x8] sm:$0xff]  ;;  %v3628_v9 = vld [vmem:[%s3586_s25 + $0x10] sm:$0xff]  ;;  %s3534_s6 = smov 16  }
  0x23   : > { %v3596_v1 = vstv %s240_s20  ;;  %v3599_v2 = vld [vmem:[%s3591_s28] sm:$0xff]  ;;  %v3602_v3 = vld [vmem:[%s3591_s28 + $0x8] sm:$0xff]  ;;  %v3615_v7 = vld [vmem:[%s3591_s28 + $0x10] sm:$0x3f]  ;;  %s4775_s9 = scalar_lea.vmem %s4911_s3, %s2827_s21 }
  0x24   : > { %v242_v5 = vmul.f32 %v3596_v1, %v3594_v0  ;;  %v3185_v6 = vpack.c.bf16 %v3602_v3, %v3599_v2  ;;  %v243_v10 = vmul.f32 %v3596_v1, %v3625_v8  ;;  %v244_v11 = vmul.f32 %v3596_v1, %v3628_v9  ;;  %v3637_v12 = vld [vmem:[%s3586_s25 + $0x18] sm:$0xff]  ;;  %v3640_v13 = vld [vmem:[%s3586_s25 + $0x20] sm:$0xff]  ;;  %v3649_v16 = vld [vmem:[%s3586_s25 + $0x28] sm:$0xff] }
  0x25   : > { %v245_v14 = vmul.f32 %v3596_v1, %v3637_v12  ;;  %v246_v15 = vmul.f32 %v3596_v1, %v3640_v13  ;;  %v3652_v17 = vld [vmem:[%s3586_s25 + $0x30] sm:$0xff]  ;;  %v247_v18 = vmul.f32 %v3596_v1, %v3649_v16  ;;  %v3661_v20 = vld [vmem:[%s3586_s25 + $0x38] sm:$0xff]  ;;  %v3664_v21 = vld [vmem:[%s3586_s25 + $0x40] sm:$0xff] }
  0x26   : > { %2975 = vmatprep.mubr.msk.f32.mxu0 %vm274_vm0, %v242_v5  ;;  %3187 = vmatprep.subr.msk.bf16.mxu0 %vm3606_vm1, %v3185_v6  ;;  %v248_v19 = vmul.f32 %v3596_v1, %v3652_v17  ;;  %v249_v22 = vmul.f32 %v3596_v1, %v3661_v20  ;;  %v250_v23 = vmul.f32 %v3596_v1, %v3664_v21  ;;  %v3673_v24 = vld [vmem:[%s3586_s25 + $0x48] sm:$0xff]  ;;  %v3676_v25 = vld [vmem:[%s3586_s25 + $0x50] sm:$0xff]  ;;  %v3685_v28 = vld [vmem:[%s3586_s25 + $0x58] sm:$0xff] }
  0x27   : > { %3190 = vmatpush3.bf16.xpose.msk.msra.mxu0 %vm3606_vm1, %v3185_v6  ;;  %v251_v26 = vmul.f32 %v3596_v1, %v3673_v24  ;;  %v252_v27 = vmul.f32 %v3596_v1, %v3676_v25  ;;  %v3688_v29 = vld [vmem:[%s3586_s25 + $0x60] sm:$0xff]  ;;  %v253_v30 = vmul.f32 %v3596_v1, %v3685_v28  ;;  %v3697_v32 = vld [vmem:[%s3586_s25 + $0x68] sm:$0xff]  ;;  %v3700_v33 = vld [vmem:[%s3586_s25 + $0x70] sm:$0xff] }
  0x28   : > { %2973 = vmatprep.subr.msk.mxu0 %vm274_vm0, %v3615_v7  ;;  %v254_v31 = vmul.f32 %v3596_v1, %v3688_v29  ;;  %v255_v34 = vmul.f32 %v3596_v1, %v3697_v32  ;;  %v256_v35 = vmul.f32 %v3596_v1, %v3700_v33  ;;  %v3709_v36 = vld [vmem:[%s3586_s25 + $0x78] sm:$0xff]  ;;  %v3712_v37 = vld [vmem:[%s3586_s25 + $0x80] sm:$0xff]  ;;  %v3721_v40 = vld [vmem:[%s3586_s25 + $0x88] sm:$0xff] }
  0x29   : > { %4934 = vst [vmem:[#allocation6_spill] sm:$0xff] %v3709_v36  ;;  %v257_v38 = vmul.f32 %v3596_v1, %v3709_v36  ;;  %v258_v39 = vmul.f32 %v3596_v1, %v3712_v37  ;;  %4935 = vst [vmem:[#allocation7_spill] sm:$0xff] %v3721_v40  ;;  %v3724_v41 = vld [vmem:[%s3586_s25 + $0x90] sm:$0xff]  ;;  %v259_v42 = vmul.f32 %v3596_v1, %v3721_v40  ;;  %v3733_v44 = vld [vmem:[%s3586_s25 + $0x98] sm:$0xff] }
  0x2a   : > { %4936 = vst [vmem:[#allocation8_spill] sm:$0xff] %v3724_v41  ;;  %v260_v43 = vmul.f32 %v3596_v1, %v3724_v41  ;;  %4937 = vst [vmem:[#allocation9_spill] sm:$0xff] %v3733_v44  ;;  %v3736_v45 = vld [vmem:[%s3586_s25 + $0xa0] sm:$0xff]  ;;  %v261_v46 = vmul.f32 %v3596_v1, %v3733_v44  ;;  %v3745_v48 = vld [vmem:[%s3586_s25 + $0xa8] sm:$0xff] }
  0x2b   : > { %4938 = vst [vmem:[#allocation10_spill] sm:$0xff] %v3736_v45  ;;  %v262_v47 = vmul.f32 %v3596_v1, %v3736_v45  ;;  %4939 = vst [vmem:[#allocation11_spill] sm:$0xff] %v3745_v48  ;;  %v3748_v49 = vld [vmem:[%s3586_s25 + $0xb0] sm:$0xff]  ;;  %v263_v50 = vmul.f32 %v3596_v1, %v3745_v48  ;;  %v3757_v52 = vld [vmem:[%s3586_s25 + $0xb8] sm:$0xff] }
  0x2c   : > { %4940 = vst [vmem:[#allocation12_spill] sm:$0xff] %v3748_v49  ;;  %v264_v51 = vmul.f32 %v3596_v1, %v3748_v49  ;;  %4941 = vst [vmem:[#allocation13_spill] sm:$0xff] %v3757_v52  ;;  %v3760_v53 = vld [vmem:[%s3586_s25 + $0xc0] sm:$0xff]  ;;  %v265_v54 = vmul.f32 %v3596_v1, %v3757_v52  ;;  %v3769_v56 = vld [vmem:[%s3586_s25 + $0xc8] sm:$0xff] }
  0x2d   : > { %4942 = vst [vmem:[#allocation14_spill] sm:$0xff] %v3760_v53  ;;  %v266_v55 = vmul.f32 %v3596_v1, %v3760_v53  ;;  %4943 = vst [vmem:[#allocation15_spill] sm:$0xff] %v3769_v56  ;;  %v3772_v57 = vld [vmem:[%s3586_s25 + $0xd0] sm:$0xff]  ;;  %v267_v58 = vmul.f32 %v3596_v1, %v3769_v56  ;;  %v3781_v60 = vld [vmem:[%s3586_s25 + $0xd8] sm:$0xff] }
  0x2e   : > { %4944 = vst [vmem:[#allocation16_spill] sm:$0xff] %v3772_v57  ;;  %v268_v59 = vmul.f32 %v3596_v1, %v3772_v57  ;;  %4945 = vst [vmem:[#allocation17_spill] sm:$0xff] %v3781_v60  ;;  %v3784_v61 = vld [vmem:[%s3586_s25 + $0xe0] sm:$0xff]  ;;  %v269_v62 = vmul.f32 %v3596_v1, %v3781_v60  ;;  %v3793_v5 = vld [vmem:[%s3586_s25 + $0xe8] sm:$0xff] }
  0x2f   : > { %2974 = vmatpush3.xpose.msk.msra.mxu0 %vm274_vm0, %v3615_v7  ;;  %4946 = vst [vmem:[#allocation18_spill] sm:$0xff] %v3784_v61  ;;  %v270_v63 = vmul.f32 %v3596_v1, %v3784_v61  ;;  %4947 = vst [vmem:[#allocation19_spill] sm:$0xff] %v3793_v5  ;;  %v3796_v6 = vld [vmem:[%s3586_s25 + $0xf0] sm:$0xff] }
  0x30   : > { %4948 = vst [vmem:[#allocation20_spill] sm:$0xff] %v3796_v6 }
  0x32   : > { %2976 = vmatmul.mubr.msk.f32.vlgmr.msra.gmra.mrb[0].mxu0 %vm274_vm0, %v243_v10  ;;  %v271_v10 = vmul.f32 %v3596_v1, %v3793_v5 }
  0x33   : > { %2978 = vmatprep.mubr.msk.f32.mxu0 %vm274_vm0, %v244_v11  ;;  %v272_v11 = vmul.f32 %v3596_v1, %v3796_v6 }
  0x36   : > { %2979 = vmatmul.mubr.msk.f32.gmra.mrb[2].mxu0 %vm274_vm0, %v245_v14  ;;  %v3805_v14 = vld [vmem:[%s3586_s25 + $0xf8] sm:$0xff] }
  0x37   : > { %2981 = vmatprep.mubr.msk.f32.mxu0 %vm274_vm0, %v246_v15  ;;  %4949 = vst [vmem:[#allocation21_spill] sm:$0xff] %v3805_v14  ;;  %v273_v15 = vmul.f32 %v3596_v1, %v3805_v14 }
  0x3a   : > { %2982 = vmatmul.mubr.msk.f32.gmra.mrb[4].mxu0 %vm274_vm0, %v247_v18 }
  0x3b   : > { %2984 = vmatprep.mubr.msk.f32.mxu0 %vm274_vm0, %v248_v19 }
  0x3e   : > { %2985 = vmatmul.mubr.msk.f32.gmra.mrb[6].mxu0 %vm274_vm0, %v249_v22 }
  0x3f   : > { %2987 = vmatprep.mubr.msk.f32.mxu0 %vm274_vm0, %v250_v23 }
  0x42   : > { %2988 = vmatmul.mubr.msk.f32.gmra.mrb[8].mxu0 %vm274_vm0, %v251_v26 }
  0x43   : > { %2990 = vmatprep.mubr.msk.f32.mxu0 %vm274_vm0, %v252_v27 }
  0x46   : > { %2991 = vmatmul.mubr.msk.f32.gmra.mrb[10].mxu0 %vm274_vm0, %v253_v30 }
  0x47   : > { %2993 = vmatprep.mubr.msk.f32.mxu0 %vm274_vm0, %v254_v31 }
  0x4a   : > { %2994 = vmatmul.mubr.msk.f32.gmra.mrb[12].mxu0 %vm274_vm0, %v255_v34 }
  0x4b   : > { %2996 = vmatprep.mubr.msk.f32.mxu0 %vm274_vm0, %v256_v35 }
  0x4e   : > { %2997 = vmatmul.mubr.msk.f32.gmra.mrb[14].mxu0 %vm274_vm0, %v257_v38 }
  0x4f   : > { %2999 = vmatprep.mubr.msk.f32.mxu0 %vm274_vm0, %v258_v39 }
  0x52   : > { %3000 = vmatmul.mubr.msk.f32.gmra.mrb[16].mxu0 %vm274_vm0, %v259_v42 }
  0x53   : > { %3002 = vmatprep.mubr.msk.f32.mxu0 %vm274_vm0, %v260_v43 }
  0x56   : > { %3003 = vmatmul.mubr.msk.f32.gmra.mrb[18].mxu0 %vm274_vm0, %v261_v46 }
  0x57   : > { %3005 = vmatprep.mubr.msk.f32.mxu0 %vm274_vm0, %v262_v47 }
  0x5a   : > { %3006 = vmatmul.mubr.msk.f32.gmra.mrb[20].mxu0 %vm274_vm0, %v263_v50 }
  0x5b   : > { %3008 = vmatprep.mubr.msk.f32.mxu0 %vm274_vm0, %v264_v51 }
  0x5e   : > { %3009 = vmatmul.mubr.msk.f32.gmra.mrb[22].mxu0 %vm274_vm0, %v265_v54 }
  0x5f   : > { %3011 = vmatprep.mubr.msk.f32.mxu0 %vm274_vm0, %v266_v55 }
  0x62   : > { %3012 = vmatmul.mubr.msk.f32.gmra.mrb[24].mxu0 %vm274_vm0, %v267_v58 }
  0x63   : > { %3014 = vmatprep.mubr.msk.f32.mxu0 %vm274_vm0, %v268_v59 }
  0x66   : > { %3015 = vmatmul.mubr.msk.f32.gmra.mrb[26].mxu0 %vm274_vm0, %v269_v62 }
  0x67   : > { %3017 = vmatprep.mubr.msk.f32.mxu0 %vm274_vm0, %v270_v63 }
  0x6a   : > { %3018 = vmatmul.mubr.msk.f32.gmra.mrb[28].mxu0 %vm274_vm0, %v271_v10 }
  0x6b   : > { %3020 = vmatprep.mubr.msk.f32.mxu0 %vm274_vm0, %v272_v11 }
  0x6e   : > { %3021 = vmatmul.mubr.msk.f32.gmra.mrb[30].mxu0 %vm274_vm0, %v273_v15 }
 0x105   : > { %v3812_v18 = vpop.f32.mrb[0].mxu0 }
 0x106   : > { %v3814_v19 = vpop.f32.mrb[1].mxu0  ;;  %v609_v22 = vsel %vm605_vm2, %v3812_v18, -inf }
 0x107   : > { %610 = vmax.xlane.f32.xlu0 %v609_v22  ;;  %v606_v1 = vsel %vm605_vm2, %v3814_v19, -inf }
 0x109   : > { %v3818_v23 = vpop.f32.mrb[2].mxu0 }
 0x10a   : > { %v3820_v26 = vpop.f32.mrb[3].mxu0  ;;  %v615_v27 = vsel %vm605_vm2, %v3818_v23, -inf }
 0x10b   : > { %607 = vmax.xlane.f32.xlu0 %v606_v1  ;;  %616 = vmax.xlane.f32.xlu1 %v615_v27  ;;  %v612_v34 = vsel %vm605_vm2, %v3820_v26, -inf }
 0x10d   : > { %v3826_v30 = vpop.f32.mrb[4].mxu0 }
 0x10e   : > { %v3828_v31 = vpop.f32.mrb[5].mxu0  ;;  %v621_v38 = vsel %vm605_vm2, %v3826_v30, -inf }
 0x10f   : > { %613 = vmax.xlane.f32.xlu1 %v612_v34  ;;  %v618_v35 = vsel %vm605_vm2, %v3828_v31, -inf }
 0x110   : > { %619 = vmax.xlane.f32.xlu0 %v618_v35 }
 0x111   : > { %v3836_v39 = vpop.f32.mrb[6].mxu0 }
 0x112   : > { %v3838_v42 = vpop.f32.mrb[7].mxu0  ;;  %v627_v46 = vsel %vm605_vm2, %v3836_v39, -inf }
 0x113   : > { %622 = vmax.xlane.f32.xlu1 %v621_v38  ;;  %v624_v43 = vsel %vm605_vm2, %v3838_v42, -inf }
 0x114   : > { %625 = vmax.xlane.f32.xlu0 %v624_v43 }
 0x115   : > { %v3844_v47 = vpop.f32.mrb[8].mxu0 }
 0x116   : > { %v3846_v50 = vpop.f32.mrb[9].mxu0  ;;  %v633_v54 = vsel %vm605_vm2, %v3844_v47, -inf }
 0x117   : > { %628 = vmax.xlane.f32.xlu1 %v627_v46  ;;  %v630_v51 = vsel %vm605_vm2, %v3846_v50, -inf }
 0x118   : > { %631 = vmax.xlane.f32.xlu0 %v630_v51 }
 0x119   : > { %v3852_v55 = vpop.f32.mrb[10].mxu0 }
 0x11a   : > { %v3854_v58 = vpop.f32.mrb[11].mxu0  ;;  %v639_v62 = vsel %vm605_vm2, %v3852_v55, -inf }
 0x11b   : > { %634 = vmax.xlane.f32.xlu1 %v633_v54  ;;  %v636_v59 = vsel %vm605_vm2, %v3854_v58, -inf }
 0x11c   : > { %637 = vmax.xlane.f32.xlu0 %v636_v59 }
 0x11d   : > { %v3860_v63 = vpop.f32.mrb[12].mxu0 }
 0x11e   : > { %v3862_v10 = vpop.f32.mrb[13].mxu0  ;;  %v645_v15 = vsel %vm605_vm2, %v3860_v63, -inf }
 0x11f   : > { %640 = vmax.xlane.f32.xlu1 %v639_v62  ;;  %v642_v11 = vsel %vm605_vm2, %v3862_v10, -inf }
 0x120   : > { %643 = vmax.xlane.f32.xlu0 %v642_v11 }
 0x121   : > { %v3868_v22 = vpop.f32.mrb[14].mxu0 }
 0x122   : > { %v3870_v1 = vpop.f32.mrb[15].mxu0  ;;  %v651_v34 = vsel %vm605_vm2, %v3868_v22, -inf }
 0x123   : > { %646 = vmax.xlane.f32.xlu1 %v645_v15  ;;  %v648_v27 = vsel %vm605_vm2, %v3870_v1, -inf }
 0x124   : > { %649 = vmax.xlane.f32.xlu0 %v648_v27 }
 0x125   : > { %v3876_v35 = vpop.f32.mrb[16].mxu0 }
 0x126   : > { %v3878_v38 = vpop.f32.mrb[17].mxu0  ;;  %v657_v46 = vsel %vm605_vm2, %v3876_v35, -inf }
 0x127   : > { %652 = vmax.xlane.f32.xlu1 %v651_v34  ;;  %v654_v43 = vsel %vm605_vm2, %v3878_v38, -inf }
 0x128   : > { %655 = vmax.xlane.f32.xlu0 %v654_v43 }
 0x129   : > { %v3884_v51 = vpop.f32.mrb[18].mxu0 }
 0x12a   : > { %v3886_v54 = vpop.f32.mrb[19].mxu0  ;;  %v663_v62 = vsel %vm605_vm2, %v3884_v51, -inf }
 0x12b   : > { %658 = vmax.xlane.f32.xlu1 %v657_v46  ;;  %v660_v59 = vsel %vm605_vm2, %v3886_v54, -inf }
 0x12c   : > { %661 = vmax.xlane.f32.xlu0 %v660_v59 }
 0x12d   : > { %v3892_v11 = vpop.f32.mrb[20].mxu0 }
 0x12e   : > { %v3894_v15 = vpop.f32.mrb[21].mxu0  ;;  %v669_v34 = vsel %vm605_vm2, %v3892_v11, -inf }
 0x12f   : > { %664 = vmax.xlane.f32.xlu1 %v663_v62  ;;  %v666_v27 = vsel %vm605_vm2, %v3894_v15, -inf }
 0x130   : > { %667 = vmax.xlane.f32.xlu0 %v666_v27 }
 0x131   : > { %v3900_v43 = vpop.f32.mrb[22].mxu0 }
 0x132   : > { %v3902_v46 = vpop.f32.mrb[23].mxu0  ;;  %v675_v4 = vsel %vm605_vm2, %v3900_v43, -inf }
 0x133   : > { %670 = vmax.xlane.f32.xlu1 %v669_v34  ;;  %v672_v59 = vsel %vm605_vm2, %v3902_v46, -inf }
 0x134   : > { %673 = vmax.xlane.f32.xlu0 %v672_v59 }
 0x135   : > { %v3908_v62 = vpop.f32.mrb[24].mxu0 }
 0x136   : > { %v3910_v14 = vpop.f32.mrb[25].mxu0  ;;  %v681_v5 = vsel %vm605_vm2, %v3908_v62, -inf }
 0x137   : > { %676 = vmax.xlane.f32.xlu1 %v675_v4  ;;  %v678_v27 = vsel %vm605_vm2, %v3910_v14, -inf }
 0x138   : > { %679 = vmax.xlane.f32.xlu0 %v678_v27 }
 0x139   : > { %v3916_v34 = vpop.f32.mrb[26].mxu0 }
 0x13a   : > { %v3918_v60 = vpop.f32.mrb[27].mxu0  ;;  %v687_v6 = vsel %vm605_vm2, %v3916_v34, -inf }
 0x13b   : > { %682 = vmax.xlane.f32.xlu1 %v681_v5  ;;  %v684_v59 = vsel %vm605_vm2, %v3918_v60, -inf }
 0x13c   : > { %685 = vmax.xlane.f32.xlu0 %v684_v59 }
 0x13d   : > { %v3924_v4 = vpop.f32.mrb[28].mxu0 }
 0x13e   : > { %v3926_v56 = vpop.f32.mrb[29].mxu0  ;;  %v693_v61 = vsel %vm605_vm2, %v3924_v4, -inf }
 0x13f   : > { %688 = vmax.xlane.f32.xlu1 %v687_v6  ;;  %v690_v27 = vsel %vm605_vm2, %v3926_v56, -inf  ;;  %v3942_v6 = vpack.i.bf16 %v3602_v3, %v3599_v2 }
 0x140   : > { %691 = vmax.xlane.f32.xlu0 %v690_v27 }
 0x141   : > { %v3932_v5 = vpop.f32.mrb[30].mxu0 }
 0x142   : > { %v3934_v52 = vpop.f32.mrb[31].mxu0  ;;  %v699_v57 = vsel %vm605_vm2, %v3932_v5, -inf }
 0x143   : > { %694 = vmax.xlane.f32.xlu1 %v693_v61  ;;  %v696_v59 = vsel %vm605_vm2, %v3934_v52, -inf }
 0x144   : > { %697 = vmax.xlane.f32.xlu0 %v696_v59 }
 0x147   : > { %700 = vmax.xlane.f32.xlu1 %v699_v57 }
 0x158   : > { %3230 = vrot.lane.b32.xlu1 %v3942_v6, %s3531_s29 }
 0x15a   : > { %962 = vrot.lane.b32.xlu0 %v3615_v7, %s3531_s29 }
 0x194   : > { %v611_v27 = vpop.xlane.xlu0 %610 }
 0x195   : > { %v703_v61 = vsub.f32 %v3812_v18, %v611_v27 }
 0x197   : > { %v736_v48 = vmul.f32 1.442695, %v703_v61 }
 0x198   : > { %v608_v53 = vpop.xlane.xlu0 %607  ;;  %v617_v44 = vpop.xlane.xlu1 %616 }
 0x199   : > { %3244 = vpow2.f32 %v736_v48  ;;  %v702_v59 = vsub.f32 %v3814_v19, %v608_v53  ;;  %v705_v57 = vsub.f32 %v3818_v23, %v617_v44 }
 0x19b   : > { %v734_v49 = vmul.f32 1.442695, %v702_v59  ;;  %v740_v40 = vmul.f32 1.442695, %v705_v57 }
 0x19c   : > { %v614_v2 = vpop.xlane.xlu1 %613 }
 0x19d   : > { %3246 = vpow2.f32 %v734_v49  ;;  %v704_v3 = vsub.f32 %v3820_v26, %v614_v2  ;;  %v620_v45 = vpop.xlane.xlu0 %619 }
 0x19e   : > { %3248 = vpow2.f32 %v740_v40  ;;  %v706_v36 = vsub.f32 %v3828_v31, %v620_v45 }
 0x19f   : > { %v738_v41 = vmul.f32 1.442695, %v704_v3 }
 0x1a0   : > { %v742_v18 = vmul.f32 1.442695, %v706_v36  ;;  %v623_v27 = vpop.xlane.xlu1 %622 }
 0x1a1   : > { %3250 = vpow2.f32 %v738_v41  ;;  %v707_v48 = vsub.f32 %v3826_v30, %v623_v27  ;;  %v626_v61 = vpop.xlane.xlu0 %625 }
 0x1a2   : > { %v708_v53 = vsub.f32 %v3838_v42, %v626_v61  ;;  %3252 = vpow2.f32 %v742_v18 }
 0x1a3   : > { %v3953_v44 = vpop.eup %3244  ;;  %v744_v19 = vmul.f32 1.442695, %v707_v48 }
 0x1a4   : > { %v746_v49 = vmul.f32 1.442695, %v708_v53  ;;  %v629_v23 = vpop.xlane.xlu1 %628  ;;  %v801_v40 = vsel %vm605_vm2, %v3953_v44, 0.0 }
 0x1a5   : > { %3254 = vpow2.f32 %v744_v19  ;;  %v709_v45 = vsub.f32 %v3836_v39, %v629_v23  ;;  %v632_v36 = vpop.xlane.xlu0 %631  ;;  %802 = vadd.xlane.f32.xlu1 %v801_v40 }
 0x1a6   : > { %v710_v41 = vsub.f32 %v3846_v50, %v632_v36  ;;  %3256 = vpow2.f32 %v746_v49 }
 0x1a7   : > { %v3959_v26 = vpop.eup %3246  ;;  %v748_v30 = vmul.f32 1.442695, %v709_v45 }
 0x1a8   : > { %v3961_v31 = vpop.eup %3248  ;;  %v750_v42 = vmul.f32 1.442695, %v710_v41  ;;  %v635_v59 = vpop.xlane.xlu1 %634  ;;  %v798_v57 = vsel %vm605_vm2, %v3959_v26, 0.0 }
 0x1a9   : > { %3258 = vpow2.f32 %v748_v30  ;;  %v711_v2 = vsub.f32 %v3844_v47, %v635_v59  ;;  %v638_v3 = vpop.xlane.xlu0 %637  ;;  %v807_v39 = vsel %vm605_vm2, %v3961_v31, 0.0  ;;  %799 = vadd.xlane.f32.xlu0 %v798_v57 }
 0x1aa   : > { %808 = vadd.xlane.f32.xlu1 %v807_v39  ;;  %3260 = vpow2.f32 %v750_v42  ;;  %v712_v27 = vsub.f32 %v3854_v58, %v638_v3 }
 0x1ab   : > { %v3968_v50 = vpop.eup %3250  ;;  %v752_v18 = vmul.f32 1.442695, %v711_v2 }
 0x1ac   : > { %v641_v48 = vpop.xlane.xlu1 %640  ;;  %v804_v61 = vsel %vm605_vm2, %v3968_v50, 0.0  ;;  %v3973_v53 = vpop.eup %3252  ;;  %v754_v23 = vmul.f32 1.442695, %v712_v27 }
 0x1ad   : > { %3262 = vpow2.f32 %v752_v18  ;;  %v713_v47 = vsub.f32 %v3852_v55, %v641_v48  ;;  %v644_v19 = vpop.xlane.xlu0 %643  ;;  %805 = vadd.xlane.f32.xlu0 %v804_v61  ;;  %v810_v58 = vsel %vm605_vm2, %v3973_v53, 0.0 }
 0x1ae   : > { %v714_v57 = vsub.f32 %v3862_v10, %v644_v19 }
 0x1af   : > { %v3976_v49 = vpop.eup %3254  ;;  %v756_v40 = vmul.f32 1.442695, %v713_v47 }
 0x1b0   : > { %v647_v45 = vpop.xlane.xlu1 %646  ;;  %v813_v36 = vsel %vm605_vm2, %v3976_v49, 0.0  ;;  %v3982_v41 = vpop.eup %3256  ;;  %v758_v10 = vmul.f32 1.442695, %v714_v57 }
 0x1b1   : > { %3264 = vpow2.f32 %v756_v40  ;;  %v715_v30 = vsub.f32 %v3860_v63, %v647_v45  ;;  %v650_v42 = vpop.xlane.xlu0 %649  ;;  %814 = vadd.xlane.f32.xlu1 %v813_v36  ;;  %811 = vadd.xlane.f32.xlu0 %v810_v58  ;;  %v816_v27 = vsel %vm605_vm2, %v3982_v41, 0.0 }
 0x1b2   : > { %v716_v55 = vsub.f32 %v3870_v1, %v650_v42  ;;  %3266 = vpow2.f32 %v754_v23 }
 0x1b3   : > { %v3986_v59 = vpop.eup %3258  ;;  %v760_v2 = vmul.f32 1.442695, %v715_v30 }
 0x1b4   : > { %v762_v3 = vmul.f32 1.442695, %v716_v55  ;;  %v653_v39 = vpop.xlane.xlu1 %652  ;;  %v819_v18 = vsel %vm605_vm2, %v3986_v59, 0.0  ;;  %v3993_v63 = vpop.eup %3260 }
 0x1b5   : > { %v656_v48 = vpop.xlane.xlu0 %655  ;;  %820 = vadd.xlane.f32.xlu1 %v819_v18  ;;  %817 = vadd.xlane.f32.xlu0 %v816_v27  ;;  %v717_v1 = vsub.f32 %v3868_v22, %v653_v39  ;;  %v822_v40 = vsel %vm605_vm2, %v3993_v63, 0.0 }
 0x1b6   : > { %3268 = vpow2.f32 %v762_v3  ;;  %v718_v47 = vsub.f32 %v3878_v38, %v656_v48 }
 0x1b7   : > { %v3996_v61 = vpop.eup %3262  ;;  %3270 = vpow2.f32 %v760_v2  ;;  %v764_v58 = vmul.f32 1.442695, %v717_v1 }
 0x1b8   : > { %v659_v19 = vpop.xlane.xlu1 %658  ;;  %v825_v23 = vsel %vm605_vm2, %v3996_v61, 0.0  ;;  %3272 = vpow2.f32 %v758_v10  ;;  %v766_v30 = vmul.f32 1.442695, %v718_v47 }
 0x1b9   : > { %v719_v45 = vsub.f32 %v3876_v35, %v659_v19  ;;  %v662_v36 = vpop.xlane.xlu0 %661  ;;  %826 = vadd.xlane.f32.xlu1 %v825_v23  ;;  %823 = vadd.xlane.f32.xlu0 %v822_v40 }
 0x1ba   : > { %v720_v35 = vsub.f32 %v3886_v54, %v662_v36 }
 0x1bb   : > { %v4004_v22 = vpop.eup %3264  ;;  %v768_v42 = vmul.f32 1.442695, %v719_v45 }
 0x1bc   : > { %v665_v55 = vpop.xlane.xlu1 %664  ;;  %v831_v38 = vsel %vm605_vm2, %v4004_v22, 0.0  ;;  %v4008_v57 = vpop.eup %3266  ;;  %v770_v23 = vmul.f32 1.442695, %v720_v35 }
 0x1bd   : > { %3274 = vpow2.f32 %v768_v42  ;;  %v721_v2 = vsub.f32 %v3884_v51, %v665_v55  ;;  %v668_v3 = vpop.xlane.xlu0 %667  ;;  %832 = vadd.xlane.f32.xlu0 %v831_v38  ;;  %v828_v10 = vsel %vm605_vm2, %v4008_v57, 0.0 }
 0x1be   : > { %3276 = vpow2.f32 %v764_v58  ;;  %v722_v39 = vsub.f32 %v3894_v15, %v668_v3 }
 0x1bf   : > { %3278 = vpow2.f32 %v766_v30  ;;  %v772_v18 = vmul.f32 1.442695, %v721_v2 }
 0x1c0   : > { %v4013_v27 = vpop.eup %3268  ;;  %v774_v48 = vmul.f32 1.442695, %v722_v39  ;;  %v671_v1 = vpop.xlane.xlu1 %670 }
 0x1c1   : > { %v4017_v47 = vpop.eup %3270  ;;  %v674_v19 = vpop.xlane.xlu0 %673  ;;  %829 = vadd.xlane.f32.xlu0 %v828_v10  ;;  %v840_v51 = vsel %vm605_vm2, %v4013_v27, 0.0  ;;  %3280 = vpow2.f32 %v772_v18  ;;  %v723_v54 = vsub.f32 %v3892_v11, %v671_v1 }
 0x1c2   : > { %v724_v15 = vsub.f32 %v3902_v46, %v674_v19  ;;  %841 = vadd.xlane.f32.xlu1 %v840_v51  ;;  %3282 = vpow2.f32 %v774_v48  ;;  %v837_v36 = vsel %vm605_vm2, %v4017_v47, 0.0  ;;  %v4025_v58 = vpop.eup %3272 }
 0x1c3   : > { %3284 = vpow2.f32 %v770_v23  ;;  %v776_v42 = vmul.f32 1.442695, %v723_v54  ;;  %v834_v39 = vsel %vm605_vm2, %v4025_v58, 0.0 }
 0x1c4   : > { %v778_v40 = vmul.f32 1.442695, %v724_v15  ;;  %v677_v45 = vpop.xlane.xlu1 %676 }
 0x1c5   : > { %v680_v30 = vpop.xlane.xlu0 %679  ;;  %838 = vadd.xlane.f32.xlu0 %v837_v36  ;;  %v725_v55 = vsub.f32 %v3900_v43, %v677_v45 }
 0x1c6   : > { %v726_v38 = vsub.f32 %v3910_v14, %v680_v30  ;;  %3286 = vpow2.f32 %v778_v40 }
 0x1c7   : > { %v4029_v11 = vpop.eup %3274  ;;  %3288 = vpow2.f32 %v776_v42  ;;  %v780_v14 = vmul.f32 1.442695, %v725_v55 }
 0x1c8   : > { %v4031_v46 = vpop.eup %3276  ;;  %v782_v2 = vmul.f32 1.442695, %v726_v38  ;;  %v683_v3 = vpop.xlane.xlu1 %682  ;;  %v849_v35 = vsel %vm605_vm2, %v4029_v11, 0.0 }
 0x1c9   : > { %v4037_v18 = vpop.eup %3278  ;;  %v686_v48 = vpop.xlane.xlu0 %685  ;;  %850 = vadd.xlane.f32.xlu1 %v849_v35  ;;  %835 = vadd.xlane.f32.xlu0 %v834_v39  ;;  %v727_v43 = vsub.f32 %v3908_v62, %v683_v3  ;;  %v843_v54 = vsel %vm605_vm2, %v4031_v46, 0.0 }
 0x1ca   : > { %v728_v1 = vsub.f32 %v3918_v60, %v686_v48  ;;  %3290 = vpow2.f32 %v782_v2  ;;  %v846_v23 = vsel %vm605_vm2, %v4037_v18, 0.0 }
 0x1cb   : > { %v4041_v10 = vpop.eup %3280  ;;  %3292 = vpow2.f32 %v780_v14  ;;  %v784_v62 = vmul.f32 1.442695, %v727_v43 }
 0x1cc   : > { %v786_v19 = vmul.f32 1.442695, %v728_v1  ;;  %v689_v51 = vpop.xlane.xlu1 %688  ;;  %v4047_v15 = vpop.eup %3282  ;;  %v855_v55 = vsel %vm605_vm2, %v4041_v10, 0.0 }
 0x1cd   : > { %v692_v40 = vpop.xlane.xlu0 %691  ;;  %847 = vadd.xlane.f32.xlu1 %v846_v23  ;;  %844 = vadd.xlane.f32.xlu0 %v843_v54  ;;  %v729_v60 = vsub.f32 %v3916_v34, %v689_v51  ;;  %v4051_v36 = vpop.eup %3284  ;;  %v858_v38 = vsel %vm605_vm2, %v4047_v15, 0.0 }
 0x1ce   : > { %v730_v45 = vsub.f32 %v3926_v56, %v692_v40  ;;  %3294 = vpow2.f32 %v786_v19  ;;  %v852_v43 = vsel %vm605_vm2, %v4051_v36, 0.0 }
 0x1cf   : > { %3296 = vpow2.f32 %v784_v62  ;;  %v788_v34 = vmul.f32 1.442695, %v729_v60 }
 0x1d0   : > { %v790_v30 = vmul.f32 1.442695, %v730_v45  ;;  %v695_v42 = vpop.xlane.xlu1 %694  ;;  %v4057_v2 = vpop.eup %3286 }
 0x1d1   : > { %856 = vadd.xlane.f32.xlu1 %v855_v55  ;;  %859 = vadd.xlane.f32.xlu0 %v858_v38  ;;  %v698_v3 = vpop.xlane.xlu0 %697  ;;  %v731_v35 = vsub.f32 %v3924_v4, %v695_v42  ;;  %v4061_v39 = vpop.eup %3288  ;;  %v864_v1 = vsel %vm605_vm2, %v4057_v2, 0.0 }
 0x1d2   : > { %v732_v56 = vsub.f32 %v3934_v52, %v698_v3  ;;  %3298 = vpow2.f32 %v790_v30  ;;  %v861_v23 = vsel %vm605_vm2, %v4061_v39, 0.0 }
 0x1d3   : > { %3300 = vpow2.f32 %v788_v34  ;;  %v792_v51 = vmul.f32 1.442695, %v731_v35 }
 0x1d4   : > { %v794_v48 = vmul.f32 1.442695, %v732_v56  ;;  %v701_v14 = vpop.xlane.xlu1 %700  ;;  %v4067_v19 = vpop.eup %3290 }
 0x1d5   : > { %853 = vadd.xlane.f32.xlu1 %v852_v43  ;;  %865 = vadd.xlane.f32.xlu0 %v864_v1  ;;  %v733_v52 = vsub.f32 %v3932_v5, %v701_v14  ;;  %v4070_v4 = vpop.eup %3292  ;;  %v870_v54 = vsel %vm605_vm2, %v4067_v19, 0.0  ;;  %v963_v34 = vpop.permute.xlu0 %962 }
 0x1d6   : > { %3302 = vpow2.f32 %v794_v48  ;;  %v867_v5 = vsel %vm605_vm2, %v4070_v4, 0.0 }
 0x1d7   : > { %3304 = vpow2.f32 %v792_v51  ;;  %v796_v30 = vmul.f32 1.442695, %v733_v52 }
 0x1d8   : > { %v3231_v40 = vpop.permute.xlu1 %3230  ;;  %v4076_v62 = vpop.eup %3294 }
 0x1d9   : > { %862 = vadd.xlane.f32.xlu1 %v861_v23  ;;  %871 = vadd.xlane.f32.xlu0 %v870_v54  ;;  %v3233_v60 = vunpack.i.h.bf16 %v3231_v40  ;;  %v3232_v45 = vunpack.i.l.bf16 %v3231_v40  ;;  %v4078_v55 = vpop.eup %3296  ;;  %v876_v38 = vsel %vm605_vm2, %v4076_v62, 0.0  ;;  %3306 = vpow2.f32 %v796_v30 }
 0x1da   : > { %v873_v35 = vsel %vm605_vm2, %v4078_v55, 0.0  ;;  %v4108_v40 = vstv %s2756_s30 }
 0x1db   : > { %v3191_v42 = vpack.c.bf16 %v3233_v60, %v3232_v45  ;;  %v1294_v60 = vmul.f32 %v4108_v40, %v3628_v9  ;;  %v1292_v45 = vmul.f32 %v4108_v40, %v3594_v0  ;;  %v1296_v30 = vmul.f32 %v4108_v40, %v3640_v13 }
 0x1dc   : > { %v4084_v3 = vpop.eup %3298  ;;  %v1298_v9 = vmul.f32 %v4108_v40, %v3652_v17  ;;  %v1295_v0 = vmul.f32 %v4108_v40, %v3637_v12  ;;  %v1302_v13 = vmul.f32 %v4108_v40, %v3676_v25  ;;  %v1299_v12 = vmul.f32 %v4108_v40, %v3661_v20 }
 0x1dd   : > { %868 = vadd.xlane.f32.xlu1 %v867_v5  ;;  %877 = vadd.xlane.f32.xlu0 %v876_v38  ;;  %v4086_v56 = vpop.eup %3300  ;;  %v882_v48 = vsel %vm605_vm2, %v4084_v3, 0.0  ;;  %v1304_v17 = vmul.f32 %v4108_v40, %v3688_v29  ;;  %v1303_v20 = vmul.f32 %v4108_v40, %v3685_v28  ;;  %v1308_v25 = vmul.f32 %v4108_v40, %v3712_v37  ;;  %v4950_v29 = vld [vmem:[#allocation8_spill] sm:$0xff]  ;;  %v4952_v5 = vld [vmem:[#allocation10_spill] sm:$0xff]  ;;  %v4953_v38 = vld [vmem:[#allocation7_spill] sm:$0xff] }
 0x1de   : > { %3192 = vmatprep.subr.bf16.mxu1 %v3191_v42  ;;  %v879_v43 = vsel %vm605_vm2, %v4086_v56, 0.0  ;;  %v1312_v37 = vmul.f32 %v4108_v40, %v4952_v5 }
 0x1df   : > { %3194 = vmatpush3.bf16.msra.mxu1 %v3191_v42  ;;  %v1293_v42 = vmul.f32 %v4108_v40, %v3625_v8  ;;  %v1297_v8 = vmul.f32 %v4108_v40, %v3649_v16  ;;  %v1301_v16 = vmul.f32 %v4108_v40, %v3673_v24  ;;  %v1305_v24 = vmul.f32 %v4108_v40, %v3697_v32 }
 0x1e0   : > { %3027 = vmatprep.subr.msk.mxu1 %vm1062_vm3, %v963_v34  ;;  %v4093_v14 = vpop.eup %3302  ;;  %v1309_v32 = vmul.f32 %v4108_v40, %v4953_v38 }
 0x1e1   : > { %874 = vadd.xlane.f32.xlu1 %v873_v35  ;;  %883 = vadd.xlane.f32.xlu0 %v882_v48  ;;  %v888_v1 = vsel %vm605_vm2, %v4093_v14, 0.0  ;;  %v4100_v51 = vpop.eup %3304  ;;  %v4955_v48 = vld [vmem:[#allocation9_spill] sm:$0xff] }
 0x1e2   : > { %v885_v52 = vsel %vm605_vm2, %v4100_v51, 0.0 }
 0x1e3   : > { %3028 = vmatpush3.msk.msra.mxu1 %vm1062_vm3, %v963_v34  ;;  %v4104_v23 = vpop.eup %3306  ;;  %v4954_v34 = vld [vmem:[#allocation12_spill] sm:$0xff] }
 0x1e4   : > { %v891_v54 = vsel %vm605_vm2, %v4104_v23, 0.0  ;;  %v1314_v35 = vmul.f32 %v4108_v40, %v4954_v34 }
 0x1e5   : > { %880 = vadd.xlane.f32.xlu1 %v879_v43  ;;  %889 = vadd.xlane.f32.xlu0 %v888_v1  ;;  %v1311_v43 = vmul.f32 %v4108_v40, %v4955_v48  ;;  %v4956_v1 = vld [vmem:[#allocation14_spill] sm:$0xff] }
 0x1e9   : > { %886 = vadd.xlane.f32.xlu1 %v885_v52  ;;  %v1316_v52 = vmul.f32 %v4108_v40, %v4956_v1 }
 0x1ed   : > { %892 = vadd.xlane.f32.xlu1 %v891_v54  ;;  %v4957_v54 = vld [vmem:[#allocation11_spill] sm:$0xff] }
 0x1fb   : > { %3235 = vrot.lane.b32.xlu0 %v3942_v6, %s3532_s4  ;;  %v4951_v6 = vld [vmem:[#allocation6_spill] sm:$0xff] }
 0x1fc   : > { %v1307_v28 = vmul.f32 %v4108_v40, %v4951_v6 }
 0x1fe   : > { %1424 = vrot.lane.b32.xlu1 %v3615_v7, %s3532_s4  ;;  %v1300_v7 = vmul.f32 %v4108_v40, %v3664_v21  ;;  %v1306_v21 = vmul.f32 %v4108_v40, %v3700_v33  ;;  %v1310_v33 = vmul.f32 %v4108_v40, %v4950_v29 }
 0x1ff   : > { %1360 = vrot.lane.b32.xlu0 %v1294_v60, %s3532_s4  ;;  %v1313_v60 = vmul.f32 %v4108_v40, %v4957_v54 }
 0x202   : > { %1356 = vrot.lane.b32.xlu1 %v1292_v45, %s3532_s4  ;;  %v4958_v45 = vld [vmem:[#allocation16_spill] sm:$0xff] }
 0x203   : > { %1364 = vrot.lane.b32.xlu0 %v1296_v30, %s3532_s4  ;;  %v1318_v30 = vmul.f32 %v4108_v40, %v4958_v45 }
 0x206   : > { %1358 = vrot.lane.b32.xlu1 %v1293_v42, %s3532_s4  ;;  %v4959_v42 = vld [vmem:[#allocation13_spill] sm:$0xff] }
 0x207   : > { %1368 = vrot.lane.b32.xlu0 %v1298_v9, %s3532_s4  ;;  %v1315_v9 = vmul.f32 %v4108_v40, %v4959_v42 }
 0x20a   : > { %1362 = vrot.lane.b32.xlu1 %v1295_v0, %s3532_s4  ;;  %v4960_v0 = vld [vmem:[#allocation18_spill] sm:$0xff] }
 0x20b   : > { %1372 = vrot.lane.b32.xlu0 %v1300_v7, %s3532_s4  ;;  %v1320_v7 = vmul.f32 %v4108_v40, %v4960_v0 }
 0x20e   : > { %1366 = vrot.lane.b32.xlu1 %v1297_v8, %s3532_s4 }
 0x20f   : > { %1376 = vrot.lane.b32.xlu0 %v1302_v13, %s3532_s4  ;;  %v4961_v13 = vld [vmem:[#allocation15_spill] sm:$0xff] }
 0x212   : > { %1370 = vrot.lane.b32.xlu1 %v1299_v12, %s3532_s4  ;;  %v1317_v12 = vmul.f32 %v4108_v40, %v4961_v13 }
 0x213   : > { %1380 = vrot.lane.b32.xlu0 %v1304_v17, %s3532_s4  ;;  %v4962_v17 = vld [vmem:[#allocation20_spill] sm:$0xff] }
 0x216   : > { %1374 = vrot.lane.b32.xlu1 %v1301_v16, %s3532_s4  ;;  %v1322_v16 = vmul.f32 %v4108_v40, %v4962_v17 }
 0x217   : > { %1384 = vrot.lane.b32.xlu0 %v1306_v21, %s3532_s4 }
 0x21a   : > { %1378 = vrot.lane.b32.xlu1 %v1303_v20, %s3532_s4  ;;  %v4963_v20 = vld [vmem:[#allocation17_spill] sm:$0xff] }
 0x21b   : > { %1388 = vrot.lane.b32.xlu0 %v1308_v25, %s3532_s4  ;;  %v1319_v25 = vmul.f32 %v4108_v40, %v4963_v20 }
 0x21e   : > { %1382 = vrot.lane.b32.xlu1 %v1305_v24, %s3532_s4 }
 0x21f   : > { %1392 = vrot.lane.b32.xlu0 %v1310_v33, %s3532_s4  ;;  %v4964_v33 = vld [vmem:[#allocation19_spill] sm:$0xff] }
 0x220   : > { %v1321_v6 = vmul.f32 %v4108_v40, %v4964_v33 }
 0x222   : > { %1386 = vrot.lane.b32.xlu1 %v1307_v28, %s3532_s4 }
 0x223   : > { %1396 = vrot.lane.b32.xlu0 %v1312_v37, %s3532_s4  ;;  %v4965_v37 = vld [vmem:[#allocation21_spill] sm:$0xff] }
 0x224   : > { %v1323_v38 = vmul.f32 %v4108_v40, %v4965_v37 }
 0x226   : > { %1390 = vrot.lane.b32.xlu1 %v1309_v32, %s3532_s4 }
 0x227   : > { %1400 = vrot.lane.b32.xlu0 %v1314_v35, %s3532_s4 }
 0x22a   : > { %1394 = vrot.lane.b32.xlu1 %v1311_v43, %s3532_s4 }
 0x22b   : > { %1404 = vrot.lane.b32.xlu0 %v1316_v52, %s3532_s4 }
 0x22e   : > { %1398 = vrot.lane.b32.xlu1 %v1313_v60, %s3532_s4 }
 0x22f   : > { %1408 = vrot.lane.b32.xlu0 %v1318_v30, %s3532_s4 }
 0x232   : > { %v803_v8 = vpop.xlane.xlu1 %802  ;;  %1402 = vrot.lane.b32.xlu1 %v1315_v9, %s3532_s4 }
 0x233   : > { %1412 = vrot.lane.b32.xlu0 %v1320_v7, %s3532_s4  ;;  %3308 = vrcp.f32 %v803_v8 }
 0x236   : > { %v800_v21 = vpop.xlane.xlu0 %799  ;;  %1406 = vrot.lane.b32.xlu1 %v1317_v12, %s3532_s4 }
 0x237   : > { %v809_v24 = vpop.xlane.xlu1 %808  ;;  %3310 = vrcp.f32 %v800_v21  ;;  %1416 = vrot.lane.b32.xlu0 %v1322_v16, %s3532_s4 }
 0x238   : > { %3312 = vrcp.f32 %v809_v24 }
 0x23a   : > { %v806_v29 = vpop.xlane.xlu0 %805  ;;  %1410 = vrot.lane.b32.xlu1 %v1319_v25, %s3532_s4 }
 0x23b   : > { %3314 = vrcp.f32 %v806_v29 }
 0x23d   : > { %v3309_v32 = vpop.eup %3308 }
 0x23e   : > { %v815_v28 = vpop.xlane.xlu1 %814  ;;  %v812_v5 = vpop.xlane.xlu0 %811  ;;  %1414 = vrot.lane.b32.xlu1 %v1321_v6, %s3532_s4  ;;  %v927_v1 = vmul.f32 %v3309_v32, %v3953_v44 }
 0x23f   : > { %3316 = vrcp.f32 %v815_v28 }
 0x240   : > { %3318 = vrcp.f32 %v812_v5 }
 0x241   : > { %v3311_v34 = vpop.eup %3310 }
 0x242   : > { %v821_v35 = vpop.xlane.xlu1 %820  ;;  %v818_v48 = vpop.xlane.xlu0 %817  ;;  %v926_v43 = vmul.f32 %v3311_v34, %v3959_v26  ;;  %1418 = vrot.lane.b32.xlu1 %v1323_v38, %s3532_s4 }
 0x243   : > { %3320 = vrcp.f32 %v821_v35  ;;  %v3313_v52 = vpop.eup %3312 }
 0x244   : > { %3322 = vrcp.f32 %v818_v48  ;;  %3029 = vmatprep.mubr.msk.f32.mxu1 %vm605_vm2, %v926_v43  ;;  %v929_v30 = vmul.f32 %v3313_v52, %v3961_v31 }
 0x245   : > { %v3315_v54 = vpop.eup %3314  ;;  %3030 = vmatmul.mubr.msk.f32.vlgmr.msra.gmra.mrb[0].mxu1 %vm605_vm2, %v927_v1 }
 0x246   : > { %v827_v40 = vpop.xlane.xlu1 %826  ;;  %v824_v60 = vpop.xlane.xlu0 %823  ;;  %v928_v45 = vmul.f32 %v3315_v54, %v3968_v50 }
 0x247   : > { %3324 = vrcp.f32 %v827_v40 }
 0x248   : > { %3326 = vrcp.f32 %v824_v60  ;;  %3032 = vmatprep.mubr.msk.f32.mxu1 %vm605_vm2, %v928_v45 }
 0x249   : > { %v3317_v26 = vpop.eup %3316  ;;  %3033 = vmatmul.mubr.msk.f32.gmra.mrb[2].mxu1 %vm605_vm2, %v929_v30 }
 0x24a   : > { %v3319_v44 = vpop.eup %3318  ;;  %v833_v42 = vpop.xlane.xlu0 %832  ;;  %v931_v9 = vmul.f32 %v3317_v26, %v3976_v49 }
 0x24b   : > { %v930_v0 = vmul.f32 %v3319_v44, %v3973_v53  ;;  %3328 = vrcp.f32 %v833_v42 }
 0x24d   : > { %v3321_v7 = vpop.eup %3320  ;;  %3035 = vmatprep.mubr.msk.f32.mxu1 %vm605_vm2, %v930_v0 }
 0x24e   : > { %v3323_v8 = vpop.eup %3322  ;;  %3036 = vmatmul.mubr.msk.f32.gmra.mrb[4].mxu1 %vm605_vm2, %v931_v9  ;;  %v830_v31 = vpop.xlane.xlu0 %829  ;;  %v933_v50 = vmul.f32 %v3321_v7, %v3986_v59 }
 0x24f   : > { %3330 = vrcp.f32 %v830_v31  ;;  %v932_v13 = vmul.f32 %v3323_v8, %v3982_v41  ;;  %v842_v49 = vpop.xlane.xlu1 %841 }
 0x250   : > { %3332 = vrcp.f32 %v842_v49 }
 0x251   : > { %v3325_v12 = vpop.eup %3324  ;;  %3038 = vmatprep.mubr.msk.f32.mxu1 %vm605_vm2, %v932_v13 }
 0x252   : > { %v3327_v17 = vpop.eup %3326  ;;  %3039 = vmatmul.mubr.msk.f32.gmra.mrb[6].mxu1 %vm605_vm2, %v933_v50  ;;  %v839_v53 = vpop.xlane.xlu0 %838  ;;  %v935_v16 = vmul.f32 %v3325_v12, %v3996_v61 }
 0x253   : > { %v934_v21 = vmul.f32 %v3327_v17, %v3993_v63  ;;  %3334 = vrcp.f32 %v839_v53 }
 0x255   : > { %3041 = vmatprep.mubr.msk.f32.mxu1 %vm605_vm2, %v934_v21  ;;  %v3329_v41 = vpop.eup %3328 }
 0x256   : > { %3042 = vmatmul.mubr.msk.f32.gmra.mrb[8].mxu1 %vm605_vm2, %v935_v16  ;;  %v851_v59 = vpop.xlane.xlu1 %850  ;;  %v836_v20 = vpop.xlane.xlu0 %835  ;;  %v937_v61 = vmul.f32 %v3329_v41, %v4004_v22 }
 0x257   : > { %3336 = vrcp.f32 %v836_v20 }
 0x259   : > { %v3331_v25 = vpop.eup %3330 }
 0x25a   : > { %v848_v24 = vpop.xlane.xlu1 %847  ;;  %v845_v29 = vpop.xlane.xlu0 %844  ;;  %v936_v33 = vmul.f32 %v3331_v25, %v4008_v57 }
 0x25b   : > { %3338 = vrcp.f32 %v848_v24  ;;  %v3333_v28 = vpop.eup %3332 }
 0x25c   : > { %3340 = vrcp.f32 %v845_v29  ;;  %3044 = vmatprep.mubr.msk.f32.mxu1 %vm605_vm2, %v936_v33  ;;  %v940_v35 = vmul.f32 %v3333_v28, %v4013_v27 }
 0x25d   : > { %3045 = vmatmul.mubr.msk.f32.gmra.mrb[10].mxu1 %vm605_vm2, %v937_v61  ;;  %3342 = vrcp.f32 %v851_v59  ;;  %v3335_v5 = vpop.eup %3334 }
 0x25e   : > { %v857_v63 = vpop.xlane.xlu1 %856  ;;  %v860_v6 = vpop.xlane.xlu0 %859  ;;  %v939_v22 = vmul.f32 %v3335_v5, %v4017_v47 }
 0x25f   : > { %3344 = vrcp.f32 %v857_v63 }
 0x261   : > { %v3337_v37 = vpop.eup %3336 }
 0x262   : > { %v854_v38 = vpop.xlane.xlu1 %853  ;;  %v866_v32 = vpop.xlane.xlu0 %865  ;;  %v938_v57 = vmul.f32 %v3337_v37, %v4025_v58 }
 0x263   : > { %3346 = vrcp.f32 %v854_v38 }
 0x264   : > { %3348 = vrcp.f32 %v860_v6  ;;  %3047 = vmatprep.mubr.msk.f32.mxu1 %vm605_vm2, %v938_v57 }
 0x265   : > { %v3339_v34 = vpop.eup %3338  ;;  %3048 = vmatmul.mubr.msk.f32.gmra.mrb[12].mxu1 %vm605_vm2, %v939_v22 }
 0x266   : > { %v3341_v48 = vpop.eup %3340  ;;  %v863_v43 = vpop.xlane.xlu1 %862  ;;  %3050 = vmatprep.mubr.msk.f32.mxu1 %vm605_vm2, %v940_v35  ;;  %v942_v54 = vmul.f32 %v3339_v34, %v4037_v18 }
 0x267   : > { %v872_v1 = vpop.xlane.xlu0 %871  ;;  %3350 = vrcp.f32 %v863_v43  ;;  %v941_v52 = vmul.f32 %v3341_v48, %v4031_v46  ;;  %v3343_v58 = vpop.eup %3342 }
 0x268   : > { %3352 = vrcp.f32 %v866_v32  ;;  %v943_v60 = vmul.f32 %v3343_v58, %v4029_v11 }
 0x269   : > { %3051 = vmatmul.mubr.msk.f32.gmra.mrb[14].mxu1 %vm605_vm2, %v941_v52  ;;  %v3345_v27 = vpop.eup %3344 }
 0x26a   : > { %v869_v47 = vpop.xlane.xlu1 %868  ;;  %3053 = vmatprep.mubr.msk.f32.mxu1 %vm605_vm2, %v942_v54  ;;  %v945_v18 = vmul.f32 %v3345_v27, %v4041_v10 }
 0x26b   : > { %v878_v40 = vpop.xlane.xlu0 %877  ;;  %3354 = vrcp.f32 %v869_v47 }
 0x26c   : > { %3356 = vrcp.f32 %v872_v1 }
 0x26d   : > { %v3347_v45 = vpop.eup %3346  ;;  %3054 = vmatmul.mubr.msk.f32.gmra.mrb[16].mxu1 %vm605_vm2, %v943_v60 }
 0x26e   : > { %v3349_v30 = vpop.eup %3348  ;;  %v875_v46 = vpop.xlane.xlu1 %874  ;;  %v944_v44 = vmul.f32 %v3347_v45, %v4051_v36 }
 0x26f   : > { %v884_v26 = vpop.xlane.xlu0 %883  ;;  %3358 = vrcp.f32 %v875_v46  ;;  %v946_v9 = vmul.f32 %v3349_v30, %v4047_v15 }
 0x270   : > { %3360 = vrcp.f32 %v878_v40  ;;  %3056 = vmatprep.mubr.msk.f32.mxu1 %vm605_vm2, %v944_v44 }
 0x271   : > { %v3351_v42 = vpop.eup %3350  ;;  %3057 = vmatmul.mubr.msk.f32.gmra.mrb[18].mxu1 %vm605_vm2, %v945_v18 }
 0x272   : > { %v3353_v0 = vpop.eup %3352  ;;  %v881_v11 = vpop.xlane.xlu1 %880  ;;  %v947_v8 = vmul.f32 %v3351_v42, %v4061_v39  ;;  %3059 = vmatprep.mubr.msk.f32.mxu1 %vm605_vm2, %v946_v9 }
 0x273   : > { %v890_v7 = vpop.xlane.xlu0 %889  ;;  %3362 = vrcp.f32 %v881_v11  ;;  %v948_v31 = vmul.f32 %v3353_v0, %v4057_v2 }
 0x274   : > { %3364 = vrcp.f32 %v884_v26 }
 0x275   : > { %v3355_v36 = vpop.eup %3354  ;;  %3060 = vmatmul.mubr.msk.f32.gmra.mrb[20].mxu1 %vm605_vm2, %v947_v8 }
 0x276   : > { %v3357_v50 = vpop.eup %3356  ;;  %v887_v10 = vpop.xlane.xlu1 %886  ;;  %v949_v15 = vmul.f32 %v3355_v36, %v4070_v4  ;;  %3062 = vmatprep.mubr.msk.f32.mxu1 %vm605_vm2, %v948_v31 }
 0x277   : > { %v3236_v13 = vpop.permute.xlu0 %3235  ;;  %3366 = vrcp.f32 %v887_v10  ;;  %v950_v53 = vmul.f32 %v3357_v50, %v4067_v19 }
 0x278   : > { %v3238_v12 = vunpack.i.h.bf16 %v3236_v13  ;;  %v3237_v17 = vunpack.i.l.bf16 %v3236_v13  ;;  %3368 = vrcp.f32 %v890_v7 }
 0x279   : > { %v3359_v39 = vpop.eup %3358  ;;  %3063 = vmatmul.mubr.msk.f32.gmra.mrb[22].mxu1 %vm605_vm2, %v949_v15 }
 0x27a   : > { %v3195_v49 = vpack.c.bf16 %v3238_v12, %v3237_v17  ;;  %v3361_v16 = vpop.eup %3360  ;;  %v893_v2 = vpop.xlane.xlu1 %892  ;;  %v951_v21 = vmul.f32 %v3359_v39, %v4078_v55  ;;  %3065 = vmatprep.mubr.msk.f32.mxu1 %vm605_vm2, %v950_v53 }
 0x27b   : > { %v1361_v59 = vpop.permute.xlu0 %1360  ;;  %3370 = vrcp.f32 %v893_v2  ;;  %v952_v41 = vmul.f32 %v3361_v16, %v4076_v62 }
 0x27c   : > { %3197 = vmatprep.subr.msk.bf16.mxu1 %vm3606_vm1, %v3195_v49 }
 0x27d   : > { %3200 = vmatpush3.bf16.xpose.msk.msra.mxu1 %vm3606_vm1, %v3195_v49  ;;  %v3363_v20 = vpop.eup %3362 }
 0x27e   : > { %v3365_v19 = vpop.eup %3364  ;;  %3066 = vmatmul.mubr.msk.f32.gmra.mrb[24].mxu1 %vm605_vm2, %v951_v21  ;;  %v953_v25 = vmul.f32 %v3363_v20, %v4086_v56  ;;  %v1425_v24 = vpop.permute.xlu1 %1424 }
 0x27f   : > { %v1365_v55 = vpop.permute.xlu0 %1364  ;;  %3068 = vmatprep.mubr.msk.f32.mxu1 %vm605_vm2, %v952_v41  ;;  %3081 = vmatprep.subr.msk.mxu1 %vm274_vm0, %v1425_v24  ;;  %v954_v33 = vmul.f32 %v3365_v19, %v4084_v3 }
 0x281   : > { %v3367_v29 = vpop.eup %3366 }
 0x282   : > { %v3369_v61 = vpop.eup %3368  ;;  %3069 = vmatmul.mubr.msk.f32.gmra.mrb[26].mxu1 %vm605_vm2, %v953_v25  ;;  %v955_v63 = vmul.f32 %v3367_v29, %v4100_v51  ;;  %v1357_v62 = vpop.permute.xlu1 %1356 }
 0x283   : > { %v1369_v6 = vpop.permute.xlu0 %1368  ;;  %3071 = vmatprep.mubr.msk.f32.mxu1 %vm605_vm2, %v954_v33  ;;  %v956_v28 = vmul.f32 %v3369_v61, %v4093_v14 }
 0x285   : > { %3082 = vmatpush3.xpose.msk.msra.mxu1 %vm274_vm0, %v1425_v24  ;;  %v3371_v56 = vpop.eup %3370 }
 0x286   : > { %3072 = vmatmul.mubr.msk.f32.gmra.mrb[28].mxu1 %vm605_vm2, %v955_v63  ;;  %v957_v5 = vmul.f32 %v3371_v56, %v4104_v23  ;;  %v1359_v37 = vpop.permute.xlu1 %1358 }
 0x287   : > { %v1373_v3 = vpop.permute.xlu0 %1372  ;;  %3074 = vmatprep.mubr.msk.f32.mxu1 %vm605_vm2, %v956_v28 }
 0x28a   : > { %3075 = vmatmul.mubr.msk.f32.gmra.mrb[30].mxu1 %vm605_vm2, %v957_v5  ;;  %v1363_v51 = vpop.permute.xlu1 %1362 }
 0x28b   : > { %v1377_v38 = vpop.permute.xlu0 %1376  ;;  %3083 = vmatprep.mubr.msk.f32.mxu1 %vm274_vm0, %v1357_v62 }
 0x28e   : > { %3084 = vmatmul.mubr.msk.f32.vlgmr.msra.gmra.mrb[32].mxu1 %vm274_vm0, %v1359_v37  ;;  %v1367_v32 = vpop.permute.xlu1 %1366 }
 0x28f   : > { %v1381_v57 = vpop.permute.xlu0 %1380  ;;  %3086 = vmatprep.mubr.msk.f32.mxu1 %vm274_vm0, %v1361_v59 }
 0x292   : > { %3087 = vmatmul.mubr.msk.f32.gmra.mrb[34].mxu1 %vm274_vm0, %v1363_v51  ;;  %v1371_v14 = vpop.permute.xlu1 %1370 }
 0x293   : > { %3089 = vmatprep.mubr.msk.f32.mxu1 %vm274_vm0, %v1365_v55  ;;  %v1385_v23 = vpop.permute.xlu0 %1384 }
 0x296   : > { %3090 = vmatmul.mubr.msk.f32.gmra.mrb[36].mxu1 %vm274_vm0, %v1367_v32  ;;  %v1375_v22 = vpop.permute.xlu1 %1374 }
 0x297   : > { %3092 = vmatprep.mubr.msk.f32.mxu1 %vm274_vm0, %v1369_v6  ;;  %v1389_v35 = vpop.permute.xlu0 %1388 }
 0x29a   : > { %3093 = vmatmul.mubr.msk.f32.gmra.mrb[38].mxu1 %vm274_vm0, %v1371_v14  ;;  %v1379_v34 = vpop.permute.xlu1 %1378 }
 0x29b   : > { %3095 = vmatprep.mubr.msk.f32.mxu1 %vm274_vm0, %v1373_v3  ;;  %v1393_v43 = vpop.permute.xlu0 %1392 }
 0x29e   : > { %3096 = vmatmul.mubr.msk.f32.gmra.mrb[40].mxu1 %vm274_vm0, %v1375_v22  ;;  %v1383_v48 = vpop.permute.xlu1 %1382 }
 0x29f   : > { %3098 = vmatprep.mubr.msk.f32.mxu1 %vm274_vm0, %v1377_v38  ;;  %v1397_v58 = vpop.permute.xlu0 %1396 }
 0x2a2   : > { %3099 = vmatmul.mubr.msk.f32.gmra.mrb[42].mxu1 %vm274_vm0, %v1379_v34  ;;  %v1387_v1 = vpop.permute.xlu1 %1386 }
 0x2a3   : > { %3101 = vmatprep.mubr.msk.f32.mxu1 %vm274_vm0, %v1381_v57  ;;  %v1401_v47 = vpop.permute.xlu0 %1400 }
 0x2a6   : > { %3102 = vmatmul.mubr.msk.f32.gmra.mrb[44].mxu1 %vm274_vm0, %v1383_v48  ;;  %v1391_v52 = vpop.permute.xlu1 %1390 }
 0x2a7   : > { %3104 = vmatprep.mubr.msk.f32.mxu1 %vm274_vm0, %v1385_v23  ;;  %v1405_v60 = vpop.permute.xlu0 %1404 }
 0x2aa   : > { %3105 = vmatmul.mubr.msk.f32.gmra.mrb[46].mxu1 %vm274_vm0, %v1387_v1  ;;  %v1395_v54 = vpop.permute.xlu1 %1394 }
 0x2ab   : > { %3107 = vmatprep.mubr.msk.f32.mxu1 %vm274_vm0, %v1389_v35  ;;  %v1409_v30 = vpop.permute.xlu0 %1408 }
 0x2ae   : > { %3108 = vmatmul.mubr.msk.f32.gmra.mrb[48].mxu1 %vm274_vm0, %v1391_v52  ;;  %v1399_v40 = vpop.permute.xlu1 %1398 }
 0x2af   : > { %3110 = vmatprep.mubr.msk.f32.mxu1 %vm274_vm0, %v1393_v43  ;;  %v1413_v26 = vpop.permute.xlu0 %1412 }
 0x2b2   : > { %3111 = vmatmul.mubr.msk.f32.gmra.mrb[50].mxu1 %vm274_vm0, %v1395_v54  ;;  %v1403_v27 = vpop.permute.xlu1 %1402 }
 0x2b3   : > { %3113 = vmatprep.mubr.msk.f32.mxu1 %vm274_vm0, %v1397_v58  ;;  %v1417_v18 = vpop.permute.xlu0 %1416 }
 0x2b6   : > { %3114 = vmatmul.mubr.msk.f32.gmra.mrb[52].mxu1 %vm274_vm0, %v1399_v40  ;;  %v1407_v45 = vpop.permute.xlu1 %1406 }
 0x2b7   : > { %3116 = vmatprep.mubr.msk.f32.mxu1 %vm274_vm0, %v1401_v47 }
 0x2ba   : > { %3117 = vmatmul.mubr.msk.f32.gmra.mrb[54].mxu1 %vm274_vm0, %v1403_v27  ;;  %v1411_v46 = vpop.permute.xlu1 %1410 }
 0x2bb   : > { %3119 = vmatprep.mubr.msk.f32.mxu1 %vm274_vm0, %v1405_v60 }
 0x2be   : > { %3120 = vmatmul.mubr.msk.f32.gmra.mrb[56].mxu1 %vm274_vm0, %v1407_v45  ;;  %v1415_v44 = vpop.permute.xlu1 %1414 }
 0x2bf   : > { %3122 = vmatprep.mubr.msk.f32.mxu1 %vm274_vm0, %v1409_v30 }
 0x2c2   : > { %3123 = vmatmul.mubr.msk.f32.gmra.mrb[58].mxu1 %vm274_vm0, %v1411_v46  ;;  %v1419_v42 = vpop.permute.xlu1 %1418 }
 0x2c3   : > { %3125 = vmatprep.mubr.msk.f32.mxu1 %vm274_vm0, %v1413_v26 }
 0x2c6   : > { %3126 = vmatmul.mubr.msk.f32.gmra.mrb[60].mxu1 %vm274_vm0, %v1415_v44 }
 0x2c7   : > { %3128 = vmatprep.mubr.msk.f32.mxu1 %vm274_vm0, %v1417_v18 }
 0x2ca   : > { %3129 = vmatmul.mubr.msk.f32.gmra.mrb[62].mxu1 %vm274_vm0, %v1419_v42 }
 0x318   : > { %v4312_v9 = vpop.f32.mrb[0].mxu1 }
 0x319   : > { %v4314_v0 = vpop.f32.mrb[1].mxu1 }
 0x31c   : > { %v4316_v11 = vpop.f32.mrb[2].mxu1 }
 0x31d   : > { %v4318_v7 = vpop.f32.mrb[3].mxu1 }
 0x321   : > { %v4320_v8 = vpop.f32.mrb[4].mxu1 }
 0x322   : > { %v4322_v36 = vpop.f32.mrb[5].mxu1 }
 0x325   : > { %v4324_v31 = vpop.f32.mrb[6].mxu1 }
 0x326   : > { %v4326_v50 = vpop.f32.mrb[7].mxu1 }
 0x329   : > { %v4328_v10 = vpop.f32.mrb[8].mxu1 }
 0x32a   : > { %v4330_v13 = vpop.f32.mrb[9].mxu1 }
 0x330   : > { %v4332_v15 = vpop.f32.mrb[10].mxu1 }
 0x331   : > { %v4334_v12 = vpop.f32.mrb[11].mxu1 }
 0x338   : > { %v4336_v17 = vpop.f32.mrb[12].mxu1 }
 0x339   : > { %v4338_v39 = vpop.f32.mrb[13].mxu1 }
 0x33c   : > { %v4340_v49 = vpop.f32.mrb[14].mxu1 }
 0x33d   : > { %v4342_v53 = vpop.f32.mrb[15].mxu1 }
 0x340   : > { %v4344_v16 = vpop.f32.mrb[16].mxu1 }
 0x341   : > { %4967 = vst [vmem:[#allocation8_spill] sm:$0xff] %v4344_v16  ;;  %v4346_v2 = vpop.f32.mrb[17].mxu1 }
 0x342   : > { %4968 = vst [vmem:[#allocation6_spill] sm:$0xff] %v4346_v2 }
 0x344   : > { %v4348_v21 = vpop.f32.mrb[18].mxu1 }
 0x345   : > { %4969 = vst [vmem:[#allocation10_spill] sm:$0xff] %v4348_v21  ;;  %v4350_v59 = vpop.f32.mrb[19].mxu1 }
 0x346   : > { %4970 = vst [vmem:[#allocation7_spill] sm:$0xff] %v4350_v59 }
 0x348   : > { %v4352_v4 = vpop.f32.mrb[20].mxu1 }
 0x349   : > { %4971 = vst [vmem:[#allocation12_spill] sm:$0xff] %v4352_v4  ;;  %v4354_v20 = vpop.f32.mrb[21].mxu1 }
 0x34a   : > { %4972 = vst [vmem:[#allocation9_spill] sm:$0xff] %v4354_v20 }
 0x34c   : > { %v4356_v41 = vpop.f32.mrb[22].mxu1 }
 0x34d   : > { %4973 = vst [vmem:[#allocation14_spill] sm:$0xff] %v4356_v41  ;;  %v4358_v19 = vpop.f32.mrb[23].mxu1 }
 0x34e   : > { %4974 = vst [vmem:[#allocation11_spill] sm:$0xff] %v4358_v19 }
 0x351   : > { %v4360_v25 = vpop.f32.mrb[24].mxu1 }
 0x352   : > { %4975 = vst [vmem:[#allocation16_spill] sm:$0xff] %v4360_v25  ;;  %v4362_v24 = vpop.f32.mrb[25].mxu1 }
 0x353   : > { %4976 = vst [vmem:[#allocation13_spill] sm:$0xff] %v4362_v24  ;;  %v3501_v24 = vld [vmem:[%s3591_s28 + $0x8] sm:$0xff] }
 0x355   : > { %v4364_v55 = vpop.f32.mrb[26].mxu1 }
 0x356   : > { %4977 = vst [vmem:[#allocation18_spill] sm:$0xff] %v4364_v55  ;;  %v4366_v29 = vpop.f32.mrb[27].mxu1  ;;  %v3500_v55 = vld [vmem:[%s3591_s28] sm:$0xff] }
 0x357   : > { %4978 = vst [vmem:[#allocation15_spill] sm:$0xff] %v4366_v29 }
 0x359   : > { %v4368_v33 = vpop.f32.mrb[28].mxu1 }
 0x35a   : > { %4979 = vst [vmem:[#allocation20_spill] sm:$0xff] %v4368_v33  ;;  %v4370_v61 = vpop.f32.mrb[29].mxu1 }
 0x35b   : > { %4980 = vst [vmem:[#allocation17_spill] sm:$0xff] %v4370_v61 }
 0x35d   : > { %v4372_v63 = vpop.f32.mrb[30].mxu1 }
 0x35e   : > { %4981 = vst [vmem:[#allocation19_spill] sm:$0xff] %v4372_v63  ;;  %v4374_v62 = vpop.f32.mrb[31].mxu1 }
 0x35f   : > { %4982 = vst [vmem:[#allocation21_spill] sm:$0xff] %v4374_v62 }
 0x361   : > { %v4376_v6 = vpop.f32.mrb[32].mxu1 }
 0x362   : > { %v4378_v56 = vpop.f32.mrb[33].mxu1  ;;  %v1724_v28 = vsel %vm605_vm2, %v4376_v6, -inf }
 0x363   : > { %1725 = vmax.xlane.f32.xlu1 %v1724_v28  ;;  %v1721_v5 = vsel %vm605_vm2, %v4378_v56, -inf }
 0x364   : > { %1722 = vmax.xlane.f32.xlu0 %v1721_v5 }
 0x365   : > { %v4384_v37 = vpop.f32.mrb[34].mxu1 }
 0x366   : > { %v1730_v3 = vsel %vm605_vm2, %v4384_v37, -inf  ;;  %v4388_v51 = vpop.f32.mrb[35].mxu1 }
 0x367   : > { %v1727_v14 = vsel %vm605_vm2, %v4388_v51, -inf }
 0x368   : > { %1731 = vmax.xlane.f32.xlu0 %v1730_v3 }
 0x369   : > { %v4390_v38 = vpop.f32.mrb[36].mxu1 }
 0x36a   : > { %v1736_v32 = vsel %vm605_vm2, %v4390_v38, -inf  ;;  %v4394_v57 = vpop.f32.mrb[37].mxu1 }
 0x36b   : > { %1737 = vmax.xlane.f32.xlu1 %v1736_v32  ;;  %v1733_v22 = vsel %vm605_vm2, %v4394_v57, -inf }
 0x36c   : > { %1728 = vmax.xlane.f32.xlu0 %v1727_v14 }
 0x36d   : > { %v4398_v23 = vpop.f32.mrb[38].mxu1 }
 0x36e   : > { %v1742_v34 = vsel %vm605_vm2, %v4398_v23, -inf  ;;  %v4404_v35 = vpop.f32.mrb[39].mxu1 }
 0x36f   : > { %1743 = vmax.xlane.f32.xlu1 %v1742_v34  ;;  %v1739_v43 = vsel %vm605_vm2, %v4404_v35, -inf }
 0x370   : > { %1734 = vmax.xlane.f32.xlu0 %v1733_v22 }
 0x371   : > { %v4406_v48 = vpop.f32.mrb[40].mxu1 }
 0x372   : > { %v1748_v1 = vsel %vm605_vm2, %v4406_v48, -inf  ;;  %v4412_v52 = vpop.f32.mrb[41].mxu1 }
 0x373   : > { %1749 = vmax.xlane.f32.xlu1 %v1748_v1  ;;  %v1745_v54 = vsel %vm605_vm2, %v4412_v52, -inf }
 0x374   : > { %1740 = vmax.xlane.f32.xlu0 %v1739_v43 }
 0x375   : > { %v4414_v58 = vpop.f32.mrb[42].mxu1 }
 0x376   : > { %v1754_v47 = vsel %vm605_vm2, %v4414_v58, -inf  ;;  %v4420_v40 = vpop.f32.mrb[43].mxu1 }
 0x377   : > { %1755 = vmax.xlane.f32.xlu1 %v1754_v47  ;;  %v1751_v60 = vsel %vm605_vm2, %v4420_v40, -inf }
 0x378   : > { %1746 = vmax.xlane.f32.xlu0 %v1745_v54 }
 0x379   : > { %v4422_v27 = vpop.f32.mrb[44].mxu1 }
 0x37a   : > { %v1760_v45 = vsel %vm605_vm2, %v4422_v27, -inf  ;;  %v4428_v30 = vpop.f32.mrb[45].mxu1 }
 0x37b   : > { %1761 = vmax.xlane.f32.xlu1 %v1760_v45  ;;  %v1757_v26 = vsel %vm605_vm2, %v4428_v30, -inf }
 0x37c   : > { %1752 = vmax.xlane.f32.xlu0 %v1751_v60 }
 0x37d   : > { %v4430_v46 = vpop.f32.mrb[46].mxu1 }
 0x37e   : > { %v1766_v44 = vsel %vm605_vm2, %v4430_v46, -inf  ;;  %v4436_v18 = vpop.f32.mrb[47].mxu1 }
 0x37f   : > { %1767 = vmax.xlane.f32.xlu1 %v1766_v44  ;;  %v1763_v28 = vsel %vm605_vm2, %v4436_v18, -inf }
 0x380   : > { %1758 = vmax.xlane.f32.xlu0 %v1757_v26 }
 0x381   : > { %v4438_v42 = vpop.f32.mrb[48].mxu1 }
 0x382   : > { %v1772_v5 = vsel %vm605_vm2, %v4438_v42, -inf  ;;  %v4444_v3 = vpop.f32.mrb[49].mxu1 }
 0x383   : > { %1773 = vmax.xlane.f32.xlu1 %v1772_v5  ;;  %v1769_v14 = vsel %vm605_vm2, %v4444_v3, -inf }
 0x384   : > { %1764 = vmax.xlane.f32.xlu0 %v1763_v28 }
 0x385   : > { %v4446_v32 = vpop.f32.mrb[50].mxu1 }
 0x386   : > { %v1778_v22 = vsel %vm605_vm2, %v4446_v32, -inf  ;;  %v4452_v34 = vpop.f32.mrb[51].mxu1 }
 0x387   : > { %1779 = vmax.xlane.f32.xlu1 %v1778_v22  ;;  %v1775_v1 = vsel %vm605_vm2, %v4452_v34, -inf }
 0x388   : > { %1770 = vmax.xlane.f32.xlu0 %v1769_v14 }
 0x389   : > { %v4454_v43 = vpop.f32.mrb[52].mxu1 }
 0x38a   : > { %v1784_v54 = vsel %vm605_vm2, %v4454_v43, -inf  ;;  %v4460_v47 = vpop.f32.mrb[53].mxu1 }
 0x38b   : > { %1785 = vmax.xlane.f32.xlu1 %v1784_v54  ;;  %v1781_v45 = vsel %vm605_vm2, %v4460_v47, -inf }
 0x38c   : > { %1776 = vmax.xlane.f32.xlu0 %v1775_v1 }
 0x38d   : > { %v4462_v60 = vpop.f32.mrb[54].mxu1 }
 0x38e   : > { %v1790_v26 = vsel %vm605_vm2, %v4462_v60, -inf  ;;  %v4468_v44 = vpop.f32.mrb[55].mxu1 }
 0x38f   : > { %1791 = vmax.xlane.f32.xlu1 %v1790_v26  ;;  %v1787_v5 = vsel %vm605_vm2, %v4468_v44, -inf }
 0x390   : > { %1782 = vmax.xlane.f32.xlu0 %v1781_v45 }
 0x391   : > { %v4470_v28 = vpop.f32.mrb[56].mxu1 }
 0x392   : > { %v1796_v14 = vsel %vm605_vm2, %v4470_v28, -inf  ;;  %v4476_v22 = vpop.f32.mrb[57].mxu1 }
 0x393   : > { %1797 = vmax.xlane.f32.xlu1 %v1796_v14  ;;  %v1793_v54 = vsel %vm605_vm2, %v4476_v22, -inf }
 0x394   : > { %1788 = vmax.xlane.f32.xlu0 %v1787_v5 }
 0x395   : > { %v4478_v1 = vpop.f32.mrb[58].mxu1 }
 0x396   : > { %v1802_v45 = vsel %vm605_vm2, %v4478_v1, -inf  ;;  %v4484_v26 = vpop.f32.mrb[59].mxu1 }
 0x397   : > { %1803 = vmax.xlane.f32.xlu1 %v1802_v45  ;;  %v1799_v14 = vsel %vm605_vm2, %v4484_v26, -inf }
 0x398   : > { %1794 = vmax.xlane.f32.xlu0 %v1793_v54 }
 0x399   : > { %v4486_v62 = vpop.f32.mrb[60].mxu1 }
 0x39a   : > { %v1808_v5 = vsel %vm605_vm2, %v4486_v62, -inf  ;;  %v4492_v63 = vpop.f32.mrb[61].mxu1 }
 0x39b   : > { %1809 = vmax.xlane.f32.xlu1 %v1808_v5  ;;  %v1805_v45 = vsel %vm605_vm2, %v4492_v63, -inf  ;;  %v3239_v5 = vpack.i.bf16 %v3501_v24, %v3500_v55 }
 0x39c   : > { %1800 = vmax.xlane.f32.xlu0 %v1799_v14 }
 0x39d   : > { %v4494_v61 = vpop.f32.mrb[62].mxu1 }
 0x39e   : > { %v1814_v54 = vsel %vm605_vm2, %v4494_v61, -inf  ;;  %v4500_v33 = vpop.f32.mrb[63].mxu1 }
 0x39f   : > { %1815 = vmax.xlane.f32.xlu1 %v1814_v54  ;;  %v1811_v29 = vsel %vm605_vm2, %v4500_v33, -inf }
 0x3a0   : > { %1806 = vmax.xlane.f32.xlu0 %v1805_v45 }
 0x3a4   : > { %1812 = vmax.xlane.f32.xlu0 %v1811_v29 }
 0x3b0   : > { %3240 = vrot.lane.b32.xlu1 %v3239_v5, %s3533_s5 }
 0x3f0   : > { %v1726_v14 = vpop.xlane.xlu1 %1725 }
 0x3f1   : > { %v1818_v25 = vsub.f32 %v4376_v6, %v1726_v14  ;;  %v1723_v19 = vpop.xlane.xlu0 %1722 }
 0x3f2   : > { %v1817_v41 = vsub.f32 %v4378_v56, %v1723_v19 }
 0x3f3   : > { %v1851_v20 = vmul.f32 1.442695, %v1818_v25 }
 0x3f4   : > { %v1849_v4 = vmul.f32 1.442695, %v1817_v41 }
 0x3f5   : > { %3372 = vpow2.f32 %v1851_v20  ;;  %v1732_v45 = vpop.xlane.xlu0 %1731 }
 0x3f6   : > { %3374 = vpow2.f32 %v1849_v4  ;;  %v1820_v54 = vsub.f32 %v4384_v37, %v1732_v45 }
 0x3f8   : > { %v1855_v29 = vmul.f32 1.442695, %v1820_v54  ;;  %v1738_v59 = vpop.xlane.xlu1 %1737 }
 0x3f9   : > { %v1822_v24 = vsub.f32 %v4390_v38, %v1738_v59  ;;  %v1729_v55 = vpop.xlane.xlu0 %1728 }
 0x3fa   : > { %3376 = vpow2.f32 %v1855_v29  ;;  %v1819_v5 = vsub.f32 %v4388_v51, %v1729_v55 }
 0x3fb   : > { %v1859_v21 = vmul.f32 1.442695, %v1822_v24 }
 0x3fc   : > { %v1853_v6 = vmul.f32 1.442695, %v1819_v5  ;;  %v1744_v14 = vpop.xlane.xlu1 %1743 }
 0x3fd   : > { %3378 = vpow2.f32 %v1859_v21  ;;  %v1824_v19 = vsub.f32 %v4398_v23, %v1744_v14  ;;  %v1735_v41 = vpop.xlane.xlu0 %1734 }
 0x3fe   : > { %3380 = vpow2.f32 %v1853_v6  ;;  %v1821_v4 = vsub.f32 %v4394_v57, %v1735_v41 }
 0x3ff   : > { %v4514_v20 = vpop.eup %3372  ;;  %v1863_v25 = vmul.f32 1.442695, %v1824_v19 }
 0x400   : > { %v4516_v56 = vpop.eup %3374  ;;  %v1857_v59 = vmul.f32 1.442695, %v1821_v4  ;;  %v1750_v37 = vpop.xlane.xlu1 %1749  ;;  %v1916_v51 = vsel %vm605_vm2, %v4514_v20, 0.0 }
 0x401   : > { %3382 = vpow2.f32 %v1863_v25  ;;  %v1826_v38 = vsub.f32 %v4406_v48, %v1750_v37  ;;  %v1741_v21 = vpop.xlane.xlu0 %1740  ;;  %1917 = vadd.xlane.f32.xlu1 %v1916_v51  ;;  %v1913_v23 = vsel %vm605_vm2, %v4516_v56, 0.0 }
 0x402   : > { %3384 = vpow2.f32 %v1857_v59  ;;  %v1823_v57 = vsub.f32 %v4404_v35, %v1741_v21  ;;  %1914 = vadd.xlane.f32.xlu0 %v1913_v23 }
 0x403   : > { %v1867_v45 = vmul.f32 1.442695, %v1826_v38 }
 0x404   : > { %v4524_v54 = vpop.eup %3376  ;;  %v1861_v29 = vmul.f32 1.442695, %v1823_v57  ;;  %v1756_v24 = vpop.xlane.xlu1 %1755 }
 0x405   : > { %3386 = vpow2.f32 %v1867_v45  ;;  %v1828_v55 = vsub.f32 %v4414_v58, %v1756_v24  ;;  %v1747_v5 = vpop.xlane.xlu0 %1746  ;;  %v1922_v48 = vsel %vm605_vm2, %v4524_v54, 0.0 }
 0x406   : > { %3388 = vpow2.f32 %v1861_v29  ;;  %v1825_v6 = vsub.f32 %v4412_v52, %v1747_v5  ;;  %1923 = vadd.xlane.f32.xlu1 %v1922_v48 }
 0x407   : > { %v4530_v14 = vpop.eup %3378  ;;  %v1871_v19 = vmul.f32 1.442695, %v1828_v55 }
 0x408   : > { %v4532_v35 = vpop.eup %3380  ;;  %v1865_v41 = vmul.f32 1.442695, %v1825_v6  ;;  %v1762_v4 = vpop.xlane.xlu1 %1761  ;;  %v1928_v25 = vsel %vm605_vm2, %v4530_v14, 0.0 }
 0x409   : > { %v1753_v59 = vpop.xlane.xlu0 %1752  ;;  %v1919_v58 = vsel %vm605_vm2, %v4532_v35, 0.0  ;;  %v1830_v38 = vsub.f32 %v4422_v27, %v1762_v4 }
 0x40a   : > { %3390 = vpow2.f32 %v1865_v41  ;;  %v1827_v37 = vsub.f32 %v4420_v40, %v1753_v59  ;;  %1929 = vadd.xlane.f32.xlu1 %v1928_v25  ;;  %1920 = vadd.xlane.f32.xlu0 %v1919_v58 }
 0x40b   : > { %v4539_v52 = vpop.eup %3382  ;;  %3392 = vpow2.f32 %v1871_v19  ;;  %v1875_v5 = vmul.f32 1.442695, %v1830_v38 }
 0x40c   : > { %v4541_v51 = vpop.eup %3384  ;;  %v1869_v21 = vmul.f32 1.442695, %v1827_v37  ;;  %v4544_v23 = vpop.xlane.xlu1 %1767  ;;  %v1934_v57 = vsel %vm605_vm2, %v4539_v52, 0.0 }
 0x40d   : > { %v1759_v45 = vpop.xlane.xlu0 %1758  ;;  %v1925_v29 = vsel %vm605_vm2, %v4541_v51, 0.0 }
 0x40e   : > { %1935 = vadd.xlane.f32.xlu1 %v1934_v57  ;;  %1926 = vadd.xlane.f32.xlu0 %v1925_v29  ;;  %v1829_v24 = vsub.f32 %v4428_v30, %v1759_v45  ;;  %3394 = vpow2.f32 %v1869_v21 }
 0x40f   : > { %v4550_v40 = vpop.eup %3386  ;;  %3396 = vpow2.f32 %v1875_v5 }
 0x410   : > { %v4553_v55 = vpop.eup %3388  ;;  %v1774_v27 = vpop.xlane.xlu1 %1773  ;;  %v1940_v48 = vsel %vm605_vm2, %v4550_v40, 0.0  ;;  %v1873_v25 = vmul.f32 1.442695, %v1829_v24 }
 0x411   : > { %v1834_v6 = vsub.f32 %v4438_v42, %v1774_v27  ;;  %v1765_v19 = vpop.xlane.xlu0 %1764  ;;  %v1931_v41 = vsel %vm605_vm2, %v4553_v55, 0.0 }
 0x412   : > { %v1831_v4 = vsub.f32 %v4436_v18, %v1765_v19  ;;  %1941 = vadd.xlane.f32.xlu1 %v1940_v48  ;;  %1932 = vadd.xlane.f32.xlu0 %v1931_v41 }
 0x413   : > { %v1883_v59 = vmul.f32 1.442695, %v1834_v6 }
 0x414   : > { %v4561_v30 = vpop.eup %3390  ;;  %v1877_v58 = vmul.f32 1.442695, %v1831_v4  ;;  %v1780_v37 = vpop.xlane.xlu1 %1779 }
 0x415   : > { %v1771_v38 = vpop.xlane.xlu0 %1770  ;;  %v1937_v21 = vsel %vm605_vm2, %v4561_v30, 0.0  ;;  %v4565_v42 = vpop.eup %3392  ;;  %v1836_v48 = vsub.f32 %v4446_v32, %v1780_v37 }
 0x416   : > { %3398 = vpow2.f32 %v1877_v58  ;;  %v1833_v57 = vsub.f32 %v4444_v3, %v1771_v38  ;;  %1938 = vadd.xlane.f32.xlu0 %v1937_v21  ;;  %v1946_v24 = vsel %vm605_vm2, %v4565_v42, 0.0 }
 0x417   : > { %3400 = vpow2.f32 %v1873_v25  ;;  %v1887_v25 = vmul.f32 1.442695, %v1836_v48 }
 0x418   : > { %3402 = vpow2.f32 %v1883_v59  ;;  %v1881_v18 = vmul.f32 1.442695, %v1833_v57  ;;  %v1786_v45 = vpop.xlane.xlu1 %1785  ;;  %v4570_v5 = vpop.eup %3394 }
 0x419   : > { %v1777_v29 = vpop.xlane.xlu0 %1776  ;;  %v1943_v3 = vsel %vm605_vm2, %v4570_v5, 0.0  ;;  %v4576_v41 = vpop.eup %3396  ;;  %v1838_v59 = vsub.f32 %v4454_v43, %v1786_v45 }
 0x41a   : > { %v1835_v27 = vsub.f32 %v4452_v34, %v1777_v29  ;;  %1947 = vadd.xlane.f32.xlu0 %v1946_v24  ;;  %3404 = vpow2.f32 %v1881_v18  ;;  %v1952_v37 = vsel %vm605_vm2, %v4576_v41, 0.0 }
 0x41b   : > { %v1891_v21 = vmul.f32 1.442695, %v1838_v59 }
 0x41c   : > { %v1885_v6 = vmul.f32 1.442695, %v1835_v27  ;;  %v1792_v19 = vpop.xlane.xlu1 %1791 }
 0x41d   : > { %v1840_v57 = vsub.f32 %v4462_v60, %v1792_v19 }
 0x41e   : > { %1944 = vadd.xlane.f32.xlu0 %v1943_v3  ;;  %3406 = vpow2.f32 %v1885_v6 }
 0x41f   : > { %3408 = vpow2.f32 %v1887_v25  ;;  %v1895_v24 = vmul.f32 1.442695, %v1840_v57 }
 0x420   : > { %v4578_v4 = vpop.eup %3398  ;;  %v1798_v58 = vpop.xlane.xlu1 %1797  ;;  %3410 = vpow2.f32 %v1891_v21 }
 0x421   : > { %v4581_v34 = vpop.eup %3400  ;;  %v1955_v32 = vsel %vm605_vm2, %v4578_v4, 0.0  ;;  %v1842_v27 = vsub.f32 %v4470_v28, %v1798_v58  ;;  %3412 = vpow2.f32 %v1895_v24 }
 0x422   : > { %v4587_v38 = vpop.eup %3402  ;;  %1956 = vadd.xlane.f32.xlu1 %v1955_v32  ;;  %1953 = vadd.xlane.f32.xlu0 %v1952_v37  ;;  %v1949_v45 = vsel %vm605_vm2, %v4581_v34, 0.0 }
 0x423   : > { %v1964_v43 = vsel %vm605_vm2, %v4587_v38, 0.0  ;;  %v1899_v19 = vmul.f32 1.442695, %v1842_v27 }
 0x424   : > { %v1804_v18 = vpop.xlane.xlu1 %1803  ;;  %v4594_v29 = vpop.eup %3404 }
 0x425   : > { %v1961_v6 = vsel %vm605_vm2, %v4594_v29, 0.0  ;;  %v1844_v3 = vsub.f32 %v4478_v1, %v1804_v18  ;;  %3414 = vpow2.f32 %v1899_v19 }
 0x426   : > { %1965 = vadd.xlane.f32.xlu1 %v1964_v43  ;;  %1950 = vadd.xlane.f32.xlu0 %v1949_v45 }
 0x427   : > { %v1903_v28 = vmul.f32 1.442695, %v1844_v3  ;;  %v1783_v3 = vpop.xlane.xlu0 %1782 }
 0x428   : > { %v1810_v48 = vpop.xlane.xlu1 %1809  ;;  %v4599_v60 = vpop.eup %3406 }
 0x429   : > { %v1967_v59 = vsel %vm605_vm2, %v4599_v60, 0.0  ;;  %v4604_v32 = vpop.eup %3408  ;;  %v1846_v58 = vsub.f32 %v4486_v62, %v1810_v48  ;;  %3416 = vpow2.f32 %v1903_v28 }
 0x42a   : > { %1962 = vadd.xlane.f32.xlu1 %v1961_v6  ;;  %v1970_v21 = vsel %vm605_vm2, %v4604_v32, 0.0  ;;  %v4609_v45 = vpop.eup %3410 }
 0x42b   : > { %v1907_v18 = vmul.f32 1.442695, %v1846_v58  ;;  %v1976_v27 = vsel %vm605_vm2, %v4609_v45, 0.0  ;;  %v4614_v62 = vpop.eup %3412 }
 0x42c   : > { %v1816_v25 = vpop.xlane.xlu1 %1815  ;;  %v1982_v6 = vsel %vm605_vm2, %v4614_v62, 0.0 }
 0x42d   : > { %v1848_v24 = vsub.f32 %v4494_v61, %v1816_v25  ;;  %3418 = vpow2.f32 %v1907_v18 }
 0x42e   : > { %1968 = vadd.xlane.f32.xlu1 %v1967_v59  ;;  %v3502_v59 = vld [vmem:[%s3591_s28 + $0x10] sm:$0x3f] }
 0x42f   : > { %v1911_v48 = vmul.f32 1.442695, %v1848_v24  ;;  %v4618_v19 = vpop.eup %3414  ;;  %v1837_v24 = vsub.f32 %v4460_v47, %v1783_v3 }
 0x430   : > { %v3241_v37 = vpop.permute.xlu1 %3240  ;;  %v1988_v61 = vsel %vm605_vm2, %v4618_v19, 0.0 }
 0x431   : > { %v3243_v57 = vunpack.i.h.bf16 %v3241_v37  ;;  %v3242_v43 = vunpack.i.l.bf16 %v3241_v37  ;;  %3420 = vpow2.f32 %v1911_v48  ;;  %v1789_v37 = vpop.xlane.xlu0 %1788  ;;  %v1889_v48 = vmul.f32 1.442695, %v1837_v24 }
 0x432   : > { %1971 = vadd.xlane.f32.xlu1 %v1970_v21  ;;  %v1832_v21 = vsub.f32 %v4430_v46, %v4544_v23 }
 0x433   : > { %v3201_v1 = vpack.c.bf16 %v3243_v57, %v3242_v43  ;;  %v4624_v25 = vpop.eup %3416 }
 0x434   : > { %v1994_v28 = vsel %vm605_vm2, %v4624_v25, 0.0  ;;  %v1879_v18 = vmul.f32 1.442695, %v1832_v21 }
 0x435   : > { %3202 = vmatprep.subr.bf16.mxu0 %v3201_v1 }
 0x436   : > { %1977 = vadd.xlane.f32.xlu1 %v1976_v27  ;;  %3204 = vmatpush3.bf16.msra.mxu0 %v3201_v1  ;;  %v1795_v1 = vpop.xlane.xlu0 %1794  ;;  %3422 = vpow2.f32 %v1879_v18 }
 0x437   : > { %v4628_v58 = vpop.eup %3418  ;;  %3424 = vpow2.f32 %v1889_v48  ;;  %v1841_v23 = vsub.f32 %v4476_v22, %v1795_v1 }
 0x438   : > { %v2000_v57 = vsel %vm605_vm2, %v4628_v58, 0.0 }
 0x43a   : > { %1983 = vadd.xlane.f32.xlu1 %v1982_v6  ;;  %v1839_v6 = vsub.f32 %v4468_v44, %v1789_v37 }
 0x43b   : > { %v4634_v43 = vpop.eup %3420 }
 0x43c   : > { %2077 = vrot.lane.b32.xlu0 %v3502_v59, %s3533_s5  ;;  %v2006_v27 = vsel %vm605_vm2, %v4634_v43, 0.0  ;;  %v1801_v59 = vpop.xlane.xlu0 %1800  ;;  %v1893_v46 = vmul.f32 1.442695, %v1839_v6 }
 0x43d   : > { %v1843_v21 = vsub.f32 %v4484_v26, %v1801_v59 }
 0x43e   : > { %1989 = vadd.xlane.f32.xlu1 %v1988_v61  ;;  %3426 = vpow2.f32 %v1893_v46 }
 0x43f   : > { %v1901_v47 = vmul.f32 1.442695, %v1843_v21 }
 0x440   : > { %v1807_v61 = vpop.xlane.xlu0 %1806 }
 0x441   : > { %v1845_v3 = vsub.f32 %v4492_v63, %v1807_v61 }
 0x442   : > { %1995 = vadd.xlane.f32.xlu1 %v1994_v28  ;;  %v1897_v28 = vmul.f32 1.442695, %v1841_v23 }
 0x443   : > { %v1905_v22 = vmul.f32 1.442695, %v1845_v3 }
 0x444   : > { %3428 = vpow2.f32 %v1897_v28  ;;  %v1813_v18 = vpop.xlane.xlu0 %1812 }
 0x445   : > { %3430 = vpow2.f32 %v1901_v47  ;;  %v1847_v1 = vsub.f32 %v4500_v33, %v1813_v18 }
 0x446   : > { %2001 = vadd.xlane.f32.xlu1 %v2000_v57  ;;  %v4642_v57 = vpop.eup %3422  ;;  %3432 = vpow2.f32 %v1905_v22 }
 0x447   : > { %v1958_v44 = vsel %vm605_vm2, %v4642_v57, 0.0  ;;  %v4647_v37 = vpop.eup %3424 }
 0x448   : > { %v1973_v26 = vsel %vm605_vm2, %v4647_v37, 0.0  ;;  %v4652_v24 = vpop.eup %3426 }
 0x449   : > { %v1979_v63 = vsel %vm605_vm2, %v4652_v24, 0.0 }
 0x44a   : > { %2007 = vadd.xlane.f32.xlu1 %v2006_v27  ;;  %v1909_v27 = vmul.f32 1.442695, %v1847_v1 }
 0x44c   : > { %3434 = vpow2.f32 %v1909_v27 }
 0x44e   : > { %v4656_v48 = vpop.eup %3428 }
 0x44f   : > { %v1985_v6 = vsel %vm605_vm2, %v4656_v48, 0.0  ;;  %v4660_v59 = vpop.eup %3430 }
 0x450   : > { %v1991_v33 = vsel %vm605_vm2, %v4660_v59, 0.0  ;;  %v4664_v46 = vpop.eup %3432 }
 0x451   : > { %v1997_v23 = vsel %vm605_vm2, %v4664_v46, 0.0 }
 0x456   : > { %v4668_v61 = vpop.eup %3434 }
 0x457   : > { %v2003_v28 = vsel %vm605_vm2, %v4668_v61, 0.0 }
 0x45b   : > { %1959 = vadd.xlane.f32.xlu0 %v1958_v44 }
 0x45f   : > { %1974 = vadd.xlane.f32.xlu0 %v1973_v26 }
 0x463   : > { %1980 = vadd.xlane.f32.xlu0 %v1979_v63 }
 0x467   : > { %1986 = vadd.xlane.f32.xlu0 %v1985_v6 }
 0x46b   : > { %1992 = vadd.xlane.f32.xlu0 %v1991_v33 }
 0x46f   : > { %1998 = vadd.xlane.f32.xlu0 %v1997_v23 }
 0x473   : > { %2004 = vadd.xlane.f32.xlu0 %v2003_v28 }
 0x48e   : > { %v1918_v1 = vpop.xlane.xlu1 %1917 }
 0x48f   : > { %v1915_v21 = vpop.xlane.xlu0 %1914 }
 0x490   : > { %3436 = vrcp.f32 %v1915_v21 }
 0x491   : > { %3438 = vrcp.f32 %v1918_v1 }
 0x493   : > { %v1924_v27 = vpop.xlane.xlu1 %1923 }
 0x497   : > { %v1921_v47 = vpop.xlane.xlu0 %1920  ;;  %v1930_v33 = vpop.xlane.xlu1 %1929 }
 0x498   : > { %3440 = vrcp.f32 %v1921_v47 }
 0x499   : > { %3442 = vrcp.f32 %v1924_v27 }
 0x49a   : > { %v3437_v3 = vpop.eup %3436 }
 0x49b   : > { %v1927_v18 = vpop.xlane.xlu0 %1926  ;;  %v2041_v44 = vmul.f32 %v3437_v3, %v4516_v56  ;;  %v1936_v28 = vpop.xlane.xlu1 %1935 }
 0x49c   : > { %3444 = vrcp.f32 %v1927_v18  ;;  %v3439_v2 = vpop.eup %3438 }
 0x49d   : > { %3137 = vmatprep.mubr.msk.f32.mxu0 %vm605_vm2, %v2041_v44  ;;  %3446 = vrcp.f32 %v1930_v33  ;;  %v2042_v44 = vmul.f32 %v3439_v2, %v4514_v20 }
 0x49f   : > { %v1933_v22 = vpop.xlane.xlu0 %1932  ;;  %v1942_v16 = vpop.xlane.xlu1 %1941 }
 0x4a0   : > { %3448 = vrcp.f32 %v1933_v22 }
 0x4a1   : > { %3450 = vrcp.f32 %v1936_v28 }
 0x4a2   : > { %v3441_v56 = vpop.eup %3440 }
 0x4a3   : > { %v1939_v26 = vpop.xlane.xlu0 %1938  ;;  %v3443_v1 = vpop.eup %3442  ;;  %v2043_v47 = vmul.f32 %v3441_v56, %v4532_v35 }
 0x4a4   : > { %3452 = vrcp.f32 %v1939_v26  ;;  %v2044_v22 = vmul.f32 %v3443_v1, %v4524_v54 }
 0x4a5   : > { %3454 = vrcp.f32 %v1942_v16 }
 0x4a6   : > { %v3445_v18 = vpop.eup %3444 }
 0x4a7   : > { %v1948_v63 = vpop.xlane.xlu0 %1947  ;;  %v3447_v27 = vpop.eup %3446  ;;  %v2045_v2 = vmul.f32 %v3445_v18, %v4541_v51 }
 0x4a8   : > { %v2046_v35 = vmul.f32 %v3447_v27, %v4530_v14 }
 0x4aa   : > { %v3449_v20 = vpop.eup %3448 }
 0x4ab   : > { %v1945_v6 = vpop.xlane.xlu0 %1944  ;;  %v3451_v26 = vpop.eup %3450  ;;  %v2047_v16 = vmul.f32 %v3449_v20, %v4553_v55 }
 0x4ac   : > { %3456 = vrcp.f32 %v1945_v6  ;;  %v2048_v54 = vmul.f32 %v3451_v26, %v4539_v52 }
 0x4ad   : > { %3458 = vrcp.f32 %v1948_v63 }
 0x4ae   : > { %v3453_v28 = vpop.eup %3452 }
 0x4af   : > { %v1954_v23 = vpop.xlane.xlu0 %1953  ;;  %v1957_v33 = vpop.xlane.xlu1 %1956  ;;  %v2049_v63 = vmul.f32 %v3453_v28, %v4561_v30 }
 0x4b0   : > { %v3455_v51 = vpop.eup %3454 }
 0x4b1   : > { %v2050_v14 = vmul.f32 %v3455_v51, %v4550_v40 }
 0x4b3   : > { %v1951_v21 = vpop.xlane.xlu0 %1950 }
 0x4b4   : > { %3460 = vrcp.f32 %v1951_v21 }
 0x4b5   : > { %3462 = vrcp.f32 %v1954_v23 }
 0x4b6   : > { %3464 = vrcp.f32 %v1957_v33  ;;  %v3457_v6 = vpop.eup %3456 }
 0x4b7   : > { %v2078_v3 = vpop.permute.xlu0 %2077  ;;  %v3459_v55 = vpop.eup %3458  ;;  %v2051_v21 = vmul.f32 %v3457_v6, %v4570_v5 }
 0x4b8   : > { %3135 = vmatprep.subr.msk.mxu0 %vm1062_vm3, %v2078_v3  ;;  %v2052_v52 = vmul.f32 %v3459_v55, %v4565_v42 }
 0x4b9   : > { %3136 = vmatpush3.msk.msra.mxu0 %vm1062_vm3, %v2078_v3 }
 0x4ba   : > { %3138 = vmatmul.mubr.msk.f32.vlgmr.msra.gmra.mrb[32].mxu0 %vm605_vm2, %v2042_v44  ;;  %v1966_v44 = vpop.xlane.xlu1 %1965 }
 0x4bb   : > { %3140 = vmatprep.mubr.msk.f32.mxu0 %vm605_vm2, %v2043_v47 }
 0x4be   : > { %3141 = vmatmul.mubr.msk.f32.gmra.mrb[34].mxu0 %vm605_vm2, %v2044_v22  ;;  %v3461_v56 = vpop.eup %3460  ;;  %v1963_v1 = vpop.xlane.xlu1 %1962 }
 0x4bf   : > { %3143 = vmatprep.mubr.msk.f32.mxu0 %vm605_vm2, %v2045_v2  ;;  %v3463_v23 = vpop.eup %3462  ;;  %v2053_v30 = vmul.f32 %v3461_v56, %v4581_v34  ;;  %3466 = vrcp.f32 %v1963_v1 }
 0x4c0   : > { %v3465_v3 = vpop.eup %3464  ;;  %v2054_v40 = vmul.f32 %v3463_v23, %v4576_v41 }
 0x4c1   : > { %v2055_v5 = vmul.f32 %v3465_v3, %v4578_v4 }
 0x4c2   : > { %3144 = vmatmul.mubr.msk.f32.gmra.mrb[36].mxu0 %vm605_vm2, %v2046_v35  ;;  %v1969_v47 = vpop.xlane.xlu1 %1968 }
 0x4c3   : > { %3146 = vmatprep.mubr.msk.f32.mxu0 %vm605_vm2, %v2047_v16 }
 0x4c6   : > { %3147 = vmatmul.mubr.msk.f32.gmra.mrb[38].mxu0 %vm605_vm2, %v2048_v54  ;;  %v1972_v42 = vpop.xlane.xlu1 %1971 }
 0x4c7   : > { %3149 = vmatprep.mubr.msk.f32.mxu0 %vm605_vm2, %v2049_v63 }
 0x4c9   : > { %v3467_v2 = vpop.eup %3466 }
 0x4ca   : > { %3150 = vmatmul.mubr.msk.f32.gmra.mrb[40].mxu0 %vm605_vm2, %v2050_v14  ;;  %v1978_v18 = vpop.xlane.xlu1 %1977  ;;  %v2057_v16 = vmul.f32 %v3467_v2, %v4594_v29 }
 0x4cb   : > { %3152 = vmatprep.mubr.msk.f32.mxu0 %vm605_vm2, %v2051_v21 }
 0x4ce   : > { %3153 = vmatmul.mubr.msk.f32.gmra.mrb[42].mxu0 %vm605_vm2, %v2052_v52  ;;  %v1984_v22 = vpop.xlane.xlu1 %1983 }
 0x4cf   : > { %3155 = vmatprep.mubr.msk.f32.mxu0 %vm605_vm2, %v2053_v30 }
 0x4d2   : > { %3156 = vmatmul.mubr.msk.f32.gmra.mrb[44].mxu0 %vm605_vm2, %v2054_v40  ;;  %v1990_v4 = vpop.xlane.xlu1 %1989 }
 0x4d3   : > { %3158 = vmatprep.mubr.msk.f32.mxu0 %vm605_vm2, %v2055_v5 }
 0x4d6   : > { %v1996_v54 = vpop.xlane.xlu1 %1995 }
 0x4da   : > { %v2002_v23 = vpop.xlane.xlu1 %2001 }
 0x4e8   : > { %v1960_v34 = vpop.xlane.xlu0 %1959 }
 0x4e9   : > { %3468 = vrcp.f32 %v1960_v34 }
 0x4ea   : > { %3470 = vrcp.f32 %v1966_v44 }
 0x4eb   : > { %3472 = vrcp.f32 %v1969_v47 }
 0x4ec   : > { %v1975_v27 = vpop.xlane.xlu0 %1974  ;;  %3474 = vrcp.f32 %v1972_v42 }
 0x4ed   : > { %3476 = vrcp.f32 %v1975_v27 }
 0x4ee   : > { %3478 = vrcp.f32 %v1978_v18 }
 0x4f0   : > { %v1981_v41 = vpop.xlane.xlu0 %1980 }
 0x4f1   : > { %3480 = vrcp.f32 %v1981_v41 }
 0x4f2   : > { %3482 = vrcp.f32 %v1984_v22 }
 0x4f3   : > { %v3469_v20 = vpop.eup %3468 }
 0x4f4   : > { %v1987_v35 = vpop.xlane.xlu0 %1986  ;;  %v2056_v26 = vmul.f32 %v3469_v20, %v4642_v57  ;;  %v3471_v33 = vpop.eup %3470 }
 0x4f5   : > { %v3473_v28 = vpop.eup %3472  ;;  %3484 = vrcp.f32 %v1987_v35  ;;  %v2058_v63 = vmul.f32 %v3471_v33, %v4587_v38 }
 0x4f6   : > { %3159 = vmatmul.mubr.msk.f32.gmra.mrb[46].mxu0 %vm605_vm2, %v2056_v26  ;;  %v3475_v6 = vpop.eup %3474  ;;  %v2059_v14 = vmul.f32 %v3473_v28, %v4599_v60  ;;  %3486 = vrcp.f32 %v1990_v4 }
 0x4f7   : > { %3161 = vmatprep.mubr.msk.f32.mxu0 %vm605_vm2, %v2057_v16  ;;  %v3477_v55 = vpop.eup %3476  ;;  %v2060_v57 = vmul.f32 %v3475_v6, %v4604_v32  ;;  %v2008_v32 = vpop.xlane.xlu1 %2007 }
 0x4f8   : > { %v1993_v51 = vpop.xlane.xlu0 %1992  ;;  %v3479_v21 = vpop.eup %3478  ;;  %v2061_v56 = vmul.f32 %v3477_v55, %v4647_v37 }
 0x4f9   : > { %3488 = vrcp.f32 %v1993_v51  ;;  %v2062_v38 = vmul.f32 %v3479_v21, %v4609_v45 }
 0x4fa   : > { %3162 = vmatmul.mubr.msk.f32.gmra.mrb[48].mxu0 %vm605_vm2, %v2058_v63  ;;  %3490 = vrcp.f32 %v1996_v54 }
 0x4fb   : > { %3164 = vmatprep.mubr.msk.f32.mxu0 %vm605_vm2, %v2059_v14  ;;  %v3481_v52 = vpop.eup %3480 }
 0x4fc   : > { %v1999_v29 = vpop.xlane.xlu0 %1998  ;;  %v3483_v60 = vpop.eup %3482  ;;  %v2063_v3 = vmul.f32 %v3481_v52, %v4652_v24 }
 0x4fd   : > { %3492 = vrcp.f32 %v1999_v29  ;;  %v2064_v37 = vmul.f32 %v3483_v60, %v4614_v62 }
 0x4fe   : > { %3165 = vmatmul.mubr.msk.f32.gmra.mrb[50].mxu0 %vm605_vm2, %v2060_v57  ;;  %3494 = vrcp.f32 %v2002_v23 }
 0x4ff   : > { %3167 = vmatprep.mubr.msk.f32.mxu0 %vm605_vm2, %v2061_v56  ;;  %v3485_v44 = vpop.eup %3484 }
 0x500   : > { %v2005_v30 = vpop.xlane.xlu0 %2004  ;;  %v3487_v40 = vpop.eup %3486  ;;  %v2065_v5 = vmul.f32 %v3485_v44, %v4656_v48 }
 0x501   : > { %3496 = vrcp.f32 %v2005_v30  ;;  %v2066_v45 = vmul.f32 %v3487_v40, %v4618_v19 }
 0x502   : > { %3168 = vmatmul.mubr.msk.f32.gmra.mrb[52].mxu0 %vm605_vm2, %v2062_v38  ;;  %3498 = vrcp.f32 %v2008_v32 }
 0x503   : > { %3170 = vmatprep.mubr.msk.f32.mxu0 %vm605_vm2, %v2063_v3  ;;  %v3489_v1 = vpop.eup %3488 }
 0x504   : > { %v3491_v24 = vpop.eup %3490  ;;  %v2067_v47 = vmul.f32 %v3489_v1, %v4660_v59 }
 0x505   : > { %v2068_v62 = vmul.f32 %v3491_v24, %v4624_v25 }
 0x506   : > { %3171 = vmatmul.mubr.msk.f32.gmra.mrb[54].mxu0 %vm605_vm2, %v2064_v37 }
 0x507   : > { %3173 = vmatprep.mubr.msk.f32.mxu0 %vm605_vm2, %v2065_v5  ;;  %v3493_v42 = vpop.eup %3492 }
 0x508   : > { %v3495_v18 = vpop.eup %3494  ;;  %v2069_v48 = vmul.f32 %v3493_v42, %v4664_v46 }
 0x509   : > { %v2070_v19 = vmul.f32 %v3495_v18, %v4628_v58 }
 0x50a   : > { %3174 = vmatmul.mubr.msk.f32.gmra.mrb[56].mxu0 %vm605_vm2, %v2066_v45 }
 0x50b   : > { %3176 = vmatprep.mubr.msk.f32.mxu0 %vm605_vm2, %v2067_v47  ;;  %v3497_v34 = vpop.eup %3496 }
 0x50c   : > { %v3499_v22 = vpop.eup %3498  ;;  %v2071_v59 = vmul.f32 %v3497_v34, %v4668_v61 }
 0x50d   : > { %v2072_v27 = vmul.f32 %v3499_v22, %v4634_v43 }
 0x50e   : > { %3177 = vmatmul.mubr.msk.f32.gmra.mrb[58].mxu0 %vm605_vm2, %v2068_v62 }
 0x50f   : > { %3179 = vmatprep.mubr.msk.f32.mxu0 %vm605_vm2, %v2069_v48 }
 0x512   : > { %3180 = vmatmul.mubr.msk.f32.gmra.mrb[60].mxu0 %vm605_vm2, %v2070_v19 }
 0x513   : > { %3182 = vmatprep.mubr.msk.f32.mxu0 %vm605_vm2, %v2071_v59 }
 0x516   : > { %3183 = vmatmul.mubr.msk.f32.gmra.mrb[62].mxu0 %vm605_vm2, %v2072_v27 }
 0x58d   : > { %v3139_v25 = vpop.f32.mrb[32].mxu0 }
 0x58e   : > { %2438 = vrot.lane.b32.xlu1 %v3139_v25, %s3534_s6  ;;  %v2245_v46 = vpop.f32.mrb[33].mxu0 }
 0x58f   : > { %2436 = vrot.lane.b32.xlu0 %v2245_v46, %s3534_s6 }
 0x591   : > { %v3142_v41 = vpop.f32.mrb[34].mxu0 }
 0x592   : > { %2442 = vrot.lane.b32.xlu1 %v3142_v41, %s3534_s6  ;;  %v2255_v58 = vpop.f32.mrb[35].mxu0 }
 0x595   : > { %v3145_v61 = vpop.f32.mrb[36].mxu0 }
 0x596   : > { %2440 = vrot.lane.b32.xlu1 %v2255_v58, %s3534_s6  ;;  %v2265_v2 = vpop.f32.mrb[37].mxu0 }
 0x597   : > { %2444 = vrot.lane.b32.xlu0 %v2265_v2, %s3534_s6 }
 0x599   : > { %v3148_v43 = vpop.f32.mrb[38].mxu0 }
 0x59a   : > { %2446 = vrot.lane.b32.xlu1 %v3145_v61, %s3534_s6  ;;  %v2275_v4 = vpop.f32.mrb[39].mxu0  ;;  %v4983_v61 = vld [vmem:[#allocation8_spill] sm:$0xff] }
 0x59b   : > { %2448 = vrot.lane.b32.xlu0 %v2275_v4, %s3534_s6 }
 0x59d   : > { %v3151_v20 = vpop.f32.mrb[40].mxu0 }
 0x59e   : > { %2450 = vrot.lane.b32.xlu1 %v3148_v43, %s3534_s6  ;;  %v2285_v35 = vpop.f32.mrb[41].mxu0  ;;  %v4984_v43 = vld [vmem:[#allocation6_spill] sm:$0xff] }
 0x59f   : > { %2452 = vrot.lane.b32.xlu0 %v2285_v35, %s3534_s6 }
 0x5a1   : > { %v3154_v26 = vpop.f32.mrb[42].mxu0 }
 0x5a2   : > { %2454 = vrot.lane.b32.xlu1 %v3151_v20, %s3534_s6  ;;  %v2295_v33 = vpop.f32.mrb[43].mxu0  ;;  %v4985_v20 = vld [vmem:[#allocation10_spill] sm:$0xff] }
 0x5a3   : > { %2456 = vrot.lane.b32.xlu0 %v2295_v33, %s3534_s6 }
 0x5a5   : > { %v3157_v16 = vpop.f32.mrb[44].mxu0 }
 0x5a6   : > { %2458 = vrot.lane.b32.xlu1 %v3154_v26, %s3534_s6  ;;  %v2305_v28 = vpop.f32.mrb[45].mxu0  ;;  %v4986_v26 = vld [vmem:[#allocation7_spill] sm:$0xff] }
 0x5a7   : > { %2460 = vrot.lane.b32.xlu0 %v2305_v28, %s3534_s6  ;;  %v4987_v28 = vld [vmem:[#allocation12_spill] sm:$0xff] }
 0x5aa   : > { %2462 = vrot.lane.b32.xlu1 %v3157_v16, %s3534_s6 }
 0x5c9   : > { %v3160_v54 = vpop.f32.mrb[46].mxu0 }
 0x5ca   : > { %2466 = vrot.lane.b32.xlu1 %v3160_v54, %s3534_s6  ;;  %v2315_v51 = vpop.f32.mrb[47].mxu0 }
 0x5cb   : > { %2464 = vrot.lane.b32.xlu0 %v2315_v51, %s3534_s6 }
 0x5cd   : > { %v3163_v63 = vpop.f32.mrb[48].mxu0 }
 0x5ce   : > { %2470 = vrot.lane.b32.xlu1 %v3163_v63, %s3534_s6  ;;  %v2325_v6 = vpop.f32.mrb[49].mxu0  ;;  %v4988_v63 = vld [vmem:[#allocation9_spill] sm:$0xff] }
 0x5cf   : > { %2468 = vrot.lane.b32.xlu0 %v2325_v6, %s3534_s6 }
 0x5d1   : > { %v3166_v14 = vpop.f32.mrb[50].mxu0 }
 0x5d2   : > { %2474 = vrot.lane.b32.xlu1 %v3166_v14, %s3534_s6  ;;  %v2335_v55 = vpop.f32.mrb[51].mxu0 }
 0x5d3   : > { %2472 = vrot.lane.b32.xlu0 %v2335_v55, %s3534_s6  ;;  %v4989_v55 = vld [vmem:[#allocation14_spill] sm:$0xff] }
 0x5d5   : > { %v3169_v29 = vpop.f32.mrb[52].mxu0 }
 0x5d6   : > { %2478 = vrot.lane.b32.xlu1 %v3169_v29, %s3534_s6  ;;  %v2345_v57 = vpop.f32.mrb[53].mxu0 }
 0x5d7   : > { %2476 = vrot.lane.b32.xlu0 %v2345_v57, %s3534_s6 }
 0x5d9   : > { %v3172_v21 = vpop.f32.mrb[54].mxu0 }
 0x5da   : > { %2482 = vrot.lane.b32.xlu1 %v3172_v21, %s3534_s6  ;;  %v2355_v56 = vpop.f32.mrb[55].mxu0  ;;  %v4990_v21 = vld [vmem:[#allocation11_spill] sm:$0xff] }
 0x5db   : > { %2480 = vrot.lane.b32.xlu0 %v2355_v56, %s3534_s6 }
 0x5dd   : > { %v3175_v52 = vpop.f32.mrb[56].mxu0 }
 0x5de   : > { %2486 = vrot.lane.b32.xlu1 %v3175_v52, %s3534_s6  ;;  %v2365_v23 = vpop.f32.mrb[57].mxu0 }
 0x5df   : > { %2484 = vrot.lane.b32.xlu0 %v2365_v23, %s3534_s6  ;;  %v4991_v23 = vld [vmem:[#allocation16_spill] sm:$0xff] }
 0x5e1   : > { %v3178_v38 = vpop.f32.mrb[58].mxu0 }
 0x5e2   : > { %2490 = vrot.lane.b32.xlu1 %v3178_v38, %s3534_s6  ;;  %v2375_v60 = vpop.f32.mrb[59].mxu0 }
 0x5e3   : > { %2488 = vrot.lane.b32.xlu0 %v2375_v60, %s3534_s6 }
 0x5e5   : > { %v3181_v30 = vpop.f32.mrb[60].mxu0 }
 0x5e6   : > { %2494 = vrot.lane.b32.xlu1 %v3181_v30, %s3534_s6  ;;  %v2385_v3 = vpop.f32.mrb[61].mxu0  ;;  %v4992_v30 = vld [vmem:[#allocation13_spill] sm:$0xff] }
 0x5e7   : > { %2492 = vrot.lane.b32.xlu0 %v2385_v3, %s3534_s6 }
 0x5e9   : > { %v3184_v44 = vpop.f32.mrb[62].mxu0 }
 0x5ea   : > { %2498 = vrot.lane.b32.xlu1 %v3184_v44, %s3534_s6  ;;  %v2395_v32 = vpop.f32.mrb[63].mxu0 }
 0x5eb   : > { %2496 = vrot.lane.b32.xlu0 %v2395_v32, %s3534_s6  ;;  %v4993_v32 = vld [vmem:[#allocation18_spill] sm:$0xff] }
 0x600   : > { %v2439_v37 = vpop.permute.xlu1 %2438 }
 0x601   : > { %v2533_v40 = vsel %vm274_vm0, %v4312_v9, %v2439_v37  ;;  %v2437_v5 = vpop.permute.xlu0 %2436 }
 0x602   : > { %2566 = vst.msk [vmem:[%s4775_s9 + $0x8] sm:$0xff] %vm2564_vm4, %v2533_v40  ;;  %v2532_v1 = vsel %vm274_vm0, %v4314_v0, %v2437_v5  ;;  %v4994_v5 = vld [vmem:[#allocation15_spill] sm:$0xff] }
 0x603   : > { %2565 = vst.msk [vmem:[%s4775_s9] sm:$0xff] %vm2564_vm4, %v2532_v1 }
 0x604   : > { %v2443_v45 = vpop.permute.xlu1 %2442 }
 0x605   : > { %v2535_v24 = vsel %vm274_vm0, %v4316_v11, %v2443_v45 }
 0x606   : > { %2568 = vst.msk [vmem:[%s4775_s9 + $0x18] sm:$0xff] %vm2564_vm4, %v2535_v24  ;;  %v4995_v24 = vld [vmem:[#allocation20_spill] sm:$0xff] }
 0x608   : > { %v2441_v47 = vpop.permute.xlu1 %2440 }
 0x609   : > { %v2534_v9 = vsel %vm274_vm0, %v4318_v7, %v2441_v47  ;;  %v2445_v42 = vpop.permute.xlu0 %2444 }
 0x60a   : > { %2567 = vst.msk [vmem:[%s4775_s9 + $0x10] sm:$0xff] %vm2564_vm4, %v2534_v9  ;;  %v2536_v0 = vsel %vm274_vm0, %v4322_v36, %v2445_v42  ;;  %v4996_v42 = vld [vmem:[#allocation17_spill] sm:$0xff] }
 0x60b   : > { %2569 = vst.msk [vmem:[%s4775_s9 + $0x20] sm:$0xff] %vm2564_vm4, %v2536_v0 }
 0x60c   : > { %v2447_v62 = vpop.permute.xlu1 %2446 }
 0x60d   : > { %v2537_v11 = vsel %vm274_vm0, %v4320_v8, %v2447_v62  ;;  %v2449_v18 = vpop.permute.xlu0 %2448 }
 0x60e   : > { %2570 = vst.msk [vmem:[%s4775_s9 + $0x28] sm:$0xff] %vm2564_vm4, %v2537_v11  ;;  %v2538_v7 = vsel %vm274_vm0, %v4326_v50, %v2449_v18  ;;  %v4997_v11 = vld [vmem:[#allocation19_spill] sm:$0xff] }
 0x60f   : > { %2571 = vst.msk [vmem:[%s4775_s9 + $0x30] sm:$0xff] %vm2564_vm4, %v2538_v7 }
 0x610   : > { %v2451_v48 = vpop.permute.xlu1 %2450 }
 0x611   : > { %v2539_v36 = vsel %vm274_vm0, %v4324_v31, %v2451_v48  ;;  %v2453_v34 = vpop.permute.xlu0 %2452  ;;  %v4998_v48 = vld [vmem:[#allocation21_spill] sm:$0xff] }
 0x612   : > { %2572 = vst.msk [vmem:[%s4775_s9 + $0x38] sm:$0xff] %vm2564_vm4, %v2539_v36  ;;  %v2540_v8 = vsel %vm274_vm0, %v4330_v13, %v2453_v34 }
 0x613   : > { %2573 = vst.msk [vmem:[%s4775_s9 + $0x40] sm:$0xff] %vm2564_vm4, %v2540_v8 }
 0x614   : > { %v2455_v19 = vpop.permute.xlu1 %2454 }
 0x615   : > { %v2541_v50 = vsel %vm274_vm0, %v4328_v10, %v2455_v19  ;;  %v2457_v22 = vpop.permute.xlu0 %2456 }
 0x616   : > { %2574 = vst.msk [vmem:[%s4775_s9 + $0x48] sm:$0xff] %vm2564_vm4, %v2541_v50  ;;  %v2542_v31 = vsel %vm274_vm0, %v4334_v12, %v2457_v22 }
 0x617   : > { %2575 = vst.msk [vmem:[%s4775_s9 + $0x50] sm:$0xff] %vm2564_vm4, %v2542_v31 }
 0x618   : > { %v2459_v59 = vpop.permute.xlu1 %2458 }
 0x619   : > { %v2543_v13 = vsel %vm274_vm0, %v4332_v15, %v2459_v59  ;;  %v2461_v27 = vpop.permute.xlu0 %2460 }
 0x61a   : > { %2576 = vst.msk [vmem:[%s4775_s9 + $0x58] sm:$0xff] %vm2564_vm4, %v2543_v13  ;;  %v2544_v10 = vsel %vm274_vm0, %v4338_v39, %v2461_v27 }
 0x61b   : > { %2577 = vst.msk [vmem:[%s4775_s9 + $0x60] sm:$0xff] %vm2564_vm4, %v2544_v10 }
 0x61c   : > { %v2463_v25 = vpop.permute.xlu1 %2462 }
 0x61d   : > { %v2545_v12 = vsel %vm274_vm0, %v4336_v17, %v2463_v25 }
 0x61e   : > { %2578 = vst.msk [vmem:[%s4775_s9 + $0x68] sm:$0xff] %vm2564_vm4, %v2545_v12 }
 0x63c   : > { %v2467_v46 = vpop.permute.xlu1 %2466 }
 0x63d   : > { %v2547_v15 = vsel %vm274_vm0, %v4340_v49, %v2467_v46  ;;  %v2465_v41 = vpop.permute.xlu0 %2464 }
 0x63e   : > { %2580 = vst.msk [vmem:[%s4775_s9 + $0x78] sm:$0xff] %vm2564_vm4, %v2547_v15  ;;  %v2546_v39 = vsel %vm274_vm0, %v4342_v53, %v2465_v41 }
 0x63f   : > { %2579 = vst.msk [vmem:[%s4775_s9 + $0x70] sm:$0xff] %vm2564_vm4, %v2546_v39 }
 0x640   : > { %v2471_v58 = vpop.permute.xlu1 %2470 }
 0x641   : > { %v2549_v17 = vsel %vm274_vm0, %v4983_v61, %v2471_v58  ;;  %v2469_v2 = vpop.permute.xlu0 %2468 }
 0x642   : > { %2582 = vst.msk [vmem:[%s4775_s9 + $0x88] sm:$0xff] %vm2564_vm4, %v2549_v17  ;;  %v2548_v49 = vsel %vm274_vm0, %v4984_v43, %v2469_v2 }
 0x643   : > { %2581 = vst.msk [vmem:[%s4775_s9 + $0x80] sm:$0xff] %vm2564_vm4, %v2548_v49 }
 0x644   : > { %v2475_v4 = vpop.permute.xlu1 %2474 }
 0x645   : > { %v2551_v53 = vsel %vm274_vm0, %v4985_v20, %v2475_v4  ;;  %v2473_v35 = vpop.permute.xlu0 %2472 }
 0x646   : > { %2584 = vst.msk [vmem:[%s4775_s9 + $0x98] sm:$0xff] %vm2564_vm4, %v2551_v53  ;;  %v2550_v33 = vsel %vm274_vm0, %v4986_v26, %v2473_v35 }
 0x647   : > { %2583 = vst.msk [vmem:[%s4775_s9 + $0x90] sm:$0xff] %vm2564_vm4, %v2550_v33 }
 0x648   : > { %v2479_v16 = vpop.permute.xlu1 %2478 }
 0x649   : > { %v2553_v54 = vsel %vm274_vm0, %v4987_v28, %v2479_v16  ;;  %v2477_v51 = vpop.permute.xlu0 %2476 }
 0x64a   : > { %2586 = vst.msk [vmem:[%s4775_s9 + $0xa8] sm:$0xff] %vm2564_vm4, %v2553_v54  ;;  %v2552_v6 = vsel %vm274_vm0, %v4988_v63, %v2477_v51 }
 0x64b   : > { %2585 = vst.msk [vmem:[%s4775_s9 + $0xa0] sm:$0xff] %vm2564_vm4, %v2552_v6 }
 0x64c   : > { %v2483_v14 = vpop.permute.xlu1 %2482 }
 0x64d   : > { %v2555_v29 = vsel %vm274_vm0, %v4989_v55, %v2483_v14  ;;  %v2481_v57 = vpop.permute.xlu0 %2480 }
 0x64e   : > { %2588 = vst.msk [vmem:[%s4775_s9 + $0xb8] sm:$0xff] %vm2564_vm4, %v2555_v29  ;;  %v2554_v56 = vsel %vm274_vm0, %v4990_v21, %v2481_v57 }
 0x64f   : > { %2587 = vst.msk [vmem:[%s4775_s9 + $0xb0] sm:$0xff] %vm2564_vm4, %v2554_v56 }
 0x650   : > { %v2487_v52 = vpop.permute.xlu1 %2486 }
 0x651   : > { %v2557_v38 = vsel %vm274_vm0, %v4991_v23, %v2487_v52  ;;  %v2485_v60 = vpop.permute.xlu0 %2484 }
 0x652   : > { %2590 = vst.msk [vmem:[%s4775_s9 + $0xc8] sm:$0xff] %vm2564_vm4, %v2557_v38  ;;  %v2556_v3 = vsel %vm274_vm0, %v4992_v30, %v2485_v60 }
 0x653   : > { %2589 = vst.msk [vmem:[%s4775_s9 + $0xc0] sm:$0xff] %vm2564_vm4, %v2556_v3 }
 0x654   : > { %v2491_v44 = vpop.permute.xlu1 %2490 }
 0x655   : > { %v2559_v37 = vsel %vm274_vm0, %v4993_v32, %v2491_v44  ;;  %v2489_v40 = vpop.permute.xlu0 %2488 }
 0x656   : > { %2592 = vst.msk [vmem:[%s4775_s9 + $0xd8] sm:$0xff] %vm2564_vm4, %v2559_v37  ;;  %v2558_v1 = vsel %vm274_vm0, %v4994_v5, %v2489_v40 }
 0x657   : > { %2591 = vst.msk [vmem:[%s4775_s9 + $0xd0] sm:$0xff] %vm2564_vm4, %v2558_v1 }
 0x658   : > { %v2495_v45 = vpop.permute.xlu1 %2494 }
 0x659   : > { %v2561_v47 = vsel %vm274_vm0, %v4995_v24, %v2495_v45  ;;  %v2493_v9 = vpop.permute.xlu0 %2492 }
 0x65a   : > { %2594 = vst.msk [vmem:[%s4775_s9 + $0xe8] sm:$0xff] %vm2564_vm4, %v2561_v47  ;;  %v2560_v0 = vsel %vm274_vm0, %v4996_v42, %v2493_v9 }
 0x65b   : > { %2593 = vst.msk [vmem:[%s4775_s9 + $0xe0] sm:$0xff] %vm2564_vm4, %v2560_v0 }
 0x65c   : > { %v2499_v62 = vpop.permute.xlu1 %2498 }
 0x65d   : > { %v2563_v18 = vsel %vm274_vm0, %v4997_v11, %v2499_v62  ;;  %v2497_v7 = vpop.permute.xlu0 %2496 }
 0x65e   : > { %2596 = vst.msk [vmem:[%s4775_s9 + $0xf8] sm:$0xff] %vm2564_vm4, %v2563_v18  ;;  %v2562_v36 = vsel %vm274_vm0, %v4998_v48, %v2497_v7 }
 0x65f   : > { %2595 = vst.msk [vmem:[%s4775_s9 + $0xf0] sm:$0xff] %vm2564_vm4, %v2562_v36 }
 0x660 PF: > { %s14_s12 = sadd.s32 1, %s3528_s12  }
 0x661   : > { %p11_p1 = scmp.ge.s32.totalorder %s14_s12, 4  }
 0x663   :  { %13 = sbr.rel (!%p11_p1) target bundleno = 1 (0x1), region = 70 }
 0x66a   :  { %2618 = vsyncpa [#allocation3], 1 }
 0x66b   :  { %2620 = vsyncpa [#allocation3 + $0x1], 1 }

</bundles_post_ra>
